<compile_context>
chip_gen: v5e
topology: v5e:2x2
jax: 0.10.0
libtpu: 0.0.40
codegen_flags: <defaults>
</compile_context>

<pallas_src>
import functools

import jax
import jax.numpy as jnp
from jax.experimental import pallas as pl
from jax.experimental.pallas import tpu as pltpu

EPS = 1e-5


def _conv3x3_stats_kernel(xp_ref, w1_ref, y1_ref, s1_ref, q1_ref, *, H, W, Cp):
    """Pass A: y1 = conv3x3(relu(x_pad)); per-image per-channel sum / sumsq."""
    # ReLU on the padded tile (ReLU(0)=0, so zero padding is preserved).
    h = jnp.maximum(xp_ref[...], 0.0)                      # (H+2, W+2, Cp)

    # 3x3 conv = 9 shifted matmuls accumulated in f32.
    acc = jnp.zeros((H * W, Cp), jnp.float32)
    for ky in range(3):
        for kx in range(3):
            xs = h[ky:ky + H, kx:kx + W, :].reshape(H * W, Cp)
            acc = acc + jnp.dot(xs, w1_ref[3 * ky + kx],
                                preferred_element_type=jnp.float32)

    y1_ref[...] = acc
    # Single-pass BN stats for this image (reduced over batch in JAX).
    s1_ref[...] = jnp.sum(acc, axis=0, keepdims=True)
    q1_ref[...] = jnp.sum(acc * acc, axis=0, keepdims=True)


def _bn_relu_conv1x1_stats_kernel(y1_ref, w2_ref, sc1_ref, sh1_ref,
                                  y2_ref, s2_ref, q2_ref):
    """Pass B: y2 = conv1x1(relu(y1*scale1 + shift1)); per-image stats of y2."""
    z = jnp.maximum(y1_ref[...] * sc1_ref[...] + sh1_ref[...], 0.0)
    y2 = jnp.dot(z, w2_ref[...], preferred_element_type=jnp.float32)

    y2_ref[...] = y2
    s2_ref[...] = jnp.sum(y2, axis=0, keepdims=True)
    q2_ref[...] = jnp.sum(y2 * y2, axis=0, keepdims=True)


def _bn_residual_kernel(xp_ref, y2_ref, sc2_ref, sh2_ref, out_ref, *, H, W, Cp):
    """Pass C: out = x + y2*scale2 + shift2 (x from the padded tile center)."""
    xc = xp_ref[1:H + 1, 1:W + 1, :].reshape(H * W, Cp)
    out_ref[...] = xc + y2_ref[...] * sc2_ref[...] + sh2_ref[...]


def res_block_forward(x_nchw, params):
    """ResBlock forward. x_nchw: (N, C, H, W) float32."""
    w1, b1, g1, be1, w2, b2, g2, be2 = params   # w1: (C,C,3,3) OIHW, w2: (C,C,1,1)
    del b1, b2  # conv biases before training-mode BN cancel exactly
    N, C, H, W = x_nchw.shape
    HW = H * W
    Cp = max(128, ((C + 127) // 128) * 128)     # lane-dense channel dim
    pc = Cp - C

    # --- layout glue (plain JAX): NHWC, spatial zero-pad, channel pad to 128 ---
    x = jnp.transpose(x_nchw, (0, 2, 3, 1))
    xp = jnp.pad(x, ((0, 0), (1, 1), (1, 1), (0, pc)))          # (N, H+2, W+2, Cp)

    # conv1 weight OIHW -> (ky, kx, ci, co), channel-pad, flatten taps: (9, Cp, Cp)
    w1t = jnp.pad(jnp.transpose(w1, (2, 3, 1, 0)),
                  ((0, 0), (0, 0), (0, pc), (0, pc))).reshape(9, Cp, Cp)
    # conv2 weight -> (ci, co), channel-pad
    w2t = jnp.pad(w2[:, :, 0, 0].T, ((0, pc), (0, pc)))          # (Cp, Cp)

    g1p = jnp.pad(g1, (0, pc)).reshape(1, Cp)
    be1p = jnp.pad(be1, (0, pc)).reshape(1, Cp)
    g2p = jnp.pad(g2, (0, pc)).reshape(1, Cp)
    be2p = jnp.pad(be2, (0, pc)).reshape(1, Cp)

    img_spec = pl.BlockSpec((None, H + 2, W + 2, Cp), lambda n: (n, 0, 0, 0))
    row_spec = pl.BlockSpec((None, HW, Cp), lambda n: (n, 0, 0))
    stat_spec = pl.BlockSpec((None, 1, Cp), lambda n: (n, 0, 0))   # per-image stats
    vec_spec = pl.BlockSpec((1, Cp), lambda n: (0, 0))             # resident vectors

    par = pltpu.CompilerParams(dimension_semantics=("parallel",))
    cnt = jnp.float32(N * HW)

    # ---- pass A: conv3x3(relu(x)) + per-image BN1 stats ----
    y1, s1n, q1n = pl.pallas_call(
        functools.partial(_conv3x3_stats_kernel, H=H, W=W, Cp=Cp),
        grid=(N,),
        in_specs=[img_spec,
                  pl.BlockSpec((9, Cp, Cp), lambda n: (0, 0, 0))],
        out_specs=[row_spec, stat_spec, stat_spec],
        out_shape=[jax.ShapeDtypeStruct((N, HW, Cp), jnp.float32),
                   jax.ShapeDtypeStruct((N, 1, Cp), jnp.float32),
                   jax.ShapeDtypeStruct((N, 1, Cp), jnp.float32)],
        compiler_params=par,
    )(xp, w1t)

    # Finalize BN1: fold affine into per-channel scale/shift (tiny, plain JAX).
    s1 = jnp.sum(s1n, axis=0)                      # (1, Cp)
    q1 = jnp.sum(q1n, axis=0)
    mu1 = s1 / cnt
    var1 = jnp.maximum(q1 / cnt - mu1 * mu1, 0.0)
    sc1 = g1p * jax.lax.rsqrt(var1 + EPS)
    sh1 = be1p - mu1 * sc1

    # ---- pass B: conv1x1(relu(BN1(y1))) + per-image BN2 stats ----
    y2, s2n, q2n = pl.pallas_call(
        _bn_relu_conv1x1_stats_kernel,
        grid=(N,),
        in_specs=[row_spec,
                  pl.BlockSpec((Cp, Cp), lambda n: (0, 0)),
                  vec_spec, vec_spec],
        out_specs=[row_spec, stat_spec, stat_spec],
        out_shape=[jax.ShapeDtypeStruct((N, HW, Cp), jnp.float32),
                   jax.ShapeDtypeStruct((N, 1, Cp), jnp.float32),
                   jax.ShapeDtypeStruct((N, 1, Cp), jnp.float32)],
        compiler_params=par,
    )(y1, w2t, sc1, sh1)

    s2 = jnp.sum(s2n, axis=0)
    q2 = jnp.sum(q2n, axis=0)
    mu2 = s2 / cnt
    var2 = jnp.maximum(q2 / cnt - mu2 * mu2, 0.0)
    sc2 = g2p * jax.lax.rsqrt(var2 + EPS)
    sh2 = be2p - mu2 * sc2

    # ---- pass C: BN2 apply + residual add (residual reuses padded input) ----
    out2 = pl.pallas_call(
        functools.partial(_bn_residual_kernel, H=H, W=W, Cp=Cp),
        grid=(N,),
        in_specs=[img_spec, row_spec, vec_spec, vec_spec],
        out_specs=row_spec,
        out_shape=jax.ShapeDtypeStruct((N, HW, Cp), jnp.float32),
        compiler_params=par,
    )(xp, y2, sc2, sh2)

    y = out2.reshape(N, H, W, Cp)[:, :, :, :C]
    return jnp.transpose(y, (0, 3, 1, 2))                         # back to NCHW


def res_block_reference(x_nchw, params):
    """Pure-JAX reference matching PyTorch semantics (for validation)."""
    w1, b1, g1, be1, w2, b2, g2, be2 = params
    dn = ('NCHW', 'OIHW', 'NCHW')

    def bn(y, g, be):
        mu = jnp.mean(y, axis=(0, 2, 3), keepdims=True)
        var = jnp.mean((y - mu) ** 2, axis=(0, 2, 3), keepdims=True)
        return (y - mu) / jnp.sqrt(var + EPS) * g[None, :, None, None] + be[None, :, None, None]

    h = jax.nn.relu(x_nchw)
    y = jax.lax.conv_general_dilated(h, w1, (1, 1), ((1, 1), (1, 1)),
                                     dimension_numbers=dn,
                                     precision=jax.lax.Precision.HIGHEST)
    y = bn(y + b1[None, :, None, None], g1, be1)
    y = jax.nn.relu(y)
    y = jax.lax.conv_general_dilated(y, w2, (1, 1), ((0, 0), (0, 0)),
                                     dimension_numbers=dn,
                                     precision=jax.lax.Precision.HIGHEST)
    y = bn(y + b2[None, :, None, None], g2, be2)
    return x_nchw + y


if __name__ == "__main__":
    key = jax.random.PRNGKey(0)
    N, C, H, W = 2, 4, 16, 16          # dim = 4

    kx_, k1, kb1, k2, kb2 = jax.random.split(key, 5)
    x = jax.random.normal(kx_, (N, C, H, W), dtype=jnp.float32)

    # Deterministic parameter init (PyTorch-style uniform bounds; BN affine defaults).
    bound1 = 1.0 / (C * 3 * 3) ** 0.5
    w1 = jax.random.uniform(k1, (C, C, 3, 3), jnp.float32, -bound1, bound1)
    b1 = jax.random.uniform(kb1, (C,), jnp.float32, -bound1, bound1)
    bound2 = 1.0 / C ** 0.5
    w2 = jax.random.uniform(k2, (C, C, 1, 1), jnp.float32, -bound2, bound2)
    b2 = jax.random.uniform(kb2, (C,), jnp.float32, -bound2, bound2)
    g1 = jnp.ones((C,), jnp.float32)
    be1 = jnp.zeros((C,), jnp.float32)
    g2 = jnp.ones((C,), jnp.float32)
    be2 = jnp.zeros((C,), jnp.float32)
    params = (w1, b1, g1, be1, w2, b2, g2, be2)

    out = jax.jit(res_block_forward)(x, params)
    jax.block_until_ready(out)

    ref = res_block_reference(x, params)
    assert out.shape == x.shape and out.dtype == jnp.float32
    assert jnp.allclose(out, ref, atol=2e-2, rtol=2e-2), \
        float(jnp.max(jnp.abs(out - ref)))

    print("KERNEL_OK")
</pallas_src>

<mosaic_0001>
module attributes {stable_mosaic.version = 11 : i64} {
  func.func @_conv3x3_stats_kernel(%arg0: i32, %arg1: memref<1x18x18x128xf32, #tpu.memory_space<vmem>>, %arg2: memref<9x128x128xf32, #tpu.memory_space<vmem>>, %arg3: memref<1x256x128xf32, #tpu.memory_space<vmem>>, %arg4: memref<1x1x128xf32, #tpu.memory_space<vmem>>, %arg5: memref<1x1x128xf32, #tpu.memory_space<vmem>>) attributes {dimension_semantics = [#tpu.dimension_semantics<parallel>], iteration_bounds = array<i64: 2>, scalar_prefetch = 0 : i64, scratch_operands = 0 : i64, tpu.core_type = #tpu.core_type<tc>, window_params = [{transform_indices = @transform_0, window_bounds = array<i64: 1, 18, 18, 128>}, {pipeline_mode = #tpu.pipeline_mode<synchronous>, transform_indices = @transform_1, window_bounds = array<i64: 9, 128, 128>}, {transform_indices = @transform_2, window_bounds = array<i64: 1, 256, 128>}, {transform_indices = @transform_3, window_bounds = array<i64: 1, 1, 128>}, {transform_indices = @transform_4, window_bounds = array<i64: 1, 1, 128>}]} {
    %c0 = arith.constant 0 : index
    %c0_0 = arith.constant 0 : index
    %c0_1 = arith.constant 0 : index
    %c0_2 = arith.constant 0 : index
    %0 = vector.load %arg1[%c0, %c0_0, %c0_1, %c0_2] : memref<1x18x18x128xf32, #tpu.memory_space<vmem>>, vector<1x18x18x128xf32>
    %1 = vector.shape_cast %0 : vector<1x18x18x128xf32> to vector<18x18x128xf32>
    %cst = arith.constant 0.000000e+00 : f32
    %2 = vector.broadcast %cst : f32 to vector<18x18x128xf32>
    %3 = arith.maximumf %1, %2 : vector<18x18x128xf32>
    %cst_3 = arith.constant 0.000000e+00 : f32
    %4 = vector.broadcast %cst_3 : f32 to vector<256x128xf32>
    %5 = vector.extract_strided_slice %3 {offsets = [0, 0, 0], sizes = [16, 16, 128], strides = [1, 1, 1]} : vector<18x18x128xf32> to vector<16x16x128xf32>
    %6 = vector.shape_cast %5 : vector<16x16x128xf32> to vector<256x128xf32>
    %c0_4 = arith.constant 0 : index
    %c0_5 = arith.constant 0 : index
    %c0_6 = arith.constant 0 : index
    %7 = vector.load %arg2[%c0_4, %c0_5, %c0_6] : memref<9x128x128xf32, #tpu.memory_space<vmem>>, vector<1x128x128xf32>
    %8 = vector.shape_cast %7 : vector<1x128x128xf32> to vector<128x128xf32>
    %cst_7 = arith.constant dense<0.000000e+00> : vector<256x128xf32>
    %9 = tpu.matmul %6, %8, %cst_7 {dimension_numbers = #tpu.dot_dimension_numbers<[1], [0], [0], [1], [0, 0, 1, 1], [], []>} : vector<256x128xf32>, vector<128x128xf32>, vector<256x128xf32> -> vector<256x128xf32>
    %10 = arith.addf %4, %9 : vector<256x128xf32>
    %11 = vector.extract_strided_slice %3 {offsets = [0, 1, 0], sizes = [16, 16, 128], strides = [1, 1, 1]} : vector<18x18x128xf32> to vector<16x16x128xf32>
    %12 = vector.shape_cast %11 : vector<16x16x128xf32> to vector<256x128xf32>
    %c1 = arith.constant 1 : index
    %c0_8 = arith.constant 0 : index
    %c0_9 = arith.constant 0 : index
    %13 = vector.load %arg2[%c1, %c0_8, %c0_9] : memref<9x128x128xf32, #tpu.memory_space<vmem>>, vector<1x128x128xf32>
    %14 = vector.shape_cast %13 : vector<1x128x128xf32> to vector<128x128xf32>
    %cst_10 = arith.constant dense<0.000000e+00> : vector<256x128xf32>
    %15 = tpu.matmul %12, %14, %cst_10 {dimension_numbers = #tpu.dot_dimension_numbers<[1], [0], [0], [1], [0, 0, 1, 1], [], []>} : vector<256x128xf32>, vector<128x128xf32>, vector<256x128xf32> -> vector<256x128xf32>
    %16 = arith.addf %10, %15 : vector<256x128xf32>
    %17 = vector.extract_strided_slice %3 {offsets = [0, 2, 0], sizes = [16, 16, 128], strides = [1, 1, 1]} : vector<18x18x128xf32> to vector<16x16x128xf32>
    %18 = vector.shape_cast %17 : vector<16x16x128xf32> to vector<256x128xf32>
    %c2 = arith.constant 2 : index
    %c0_11 = arith.constant 0 : index
    %c0_12 = arith.constant 0 : index
    %19 = vector.load %arg2[%c2, %c0_11, %c0_12] : memref<9x128x128xf32, #tpu.memory_space<vmem>>, vector<1x128x128xf32>
    %20 = vector.shape_cast %19 : vector<1x128x128xf32> to vector<128x128xf32>
    %cst_13 = arith.constant dense<0.000000e+00> : vector<256x128xf32>
    %21 = tpu.matmul %18, %20, %cst_13 {dimension_numbers = #tpu.dot_dimension_numbers<[1], [0], [0], [1], [0, 0, 1, 1], [], []>} : vector<256x128xf32>, vector<128x128xf32>, vector<256x128xf32> -> vector<256x128xf32>
    %22 = arith.addf %16, %21 : vector<256x128xf32>
    %23 = vector.extract_strided_slice %3 {offsets = [1, 0, 0], sizes = [16, 16, 128], strides = [1, 1, 1]} : vector<18x18x128xf32> to vector<16x16x128xf32>
    %24 = vector.shape_cast %23 : vector<16x16x128xf32> to vector<256x128xf32>
    %c3 = arith.constant 3 : index
    %c0_14 = arith.constant 0 : index
    %c0_15 = arith.constant 0 : index
    %25 = vector.load %arg2[%c3, %c0_14, %c0_15] : memref<9x128x128xf32, #tpu.memory_space<vmem>>, vector<1x128x128xf32>
    %26 = vector.shape_cast %25 : vector<1x128x128xf32> to vector<128x128xf32>
    %cst_16 = arith.constant dense<0.000000e+00> : vector<256x128xf32>
    %27 = tpu.matmul %24, %26, %cst_16 {dimension_numbers = #tpu.dot_dimension_numbers<[1], [0], [0], [1], [0, 0, 1, 1], [], []>} : vector<256x128xf32>, vector<128x128xf32>, vector<256x128xf32> -> vector<256x128xf32>
    %28 = arith.addf %22, %27 : vector<256x128xf32>
    %29 = vector.extract_strided_slice %3 {offsets = [1, 1, 0], sizes = [16, 16, 128], strides = [1, 1, 1]} : vector<18x18x128xf32> to vector<16x16x128xf32>
    %30 = vector.shape_cast %29 : vector<16x16x128xf32> to vector<256x128xf32>
    %c4 = arith.constant 4 : index
    %c0_17 = arith.constant 0 : index
    %c0_18 = arith.constant 0 : index
    %31 = vector.load %arg2[%c4, %c0_17, %c0_18] : memref<9x128x128xf32, #tpu.memory_space<vmem>>, vector<1x128x128xf32>
    %32 = vector.shape_cast %31 : vector<1x128x128xf32> to vector<128x128xf32>
    %cst_19 = arith.constant dense<0.000000e+00> : vector<256x128xf32>
    %33 = tpu.matmul %30, %32, %cst_19 {dimension_numbers = #tpu.dot_dimension_numbers<[1], [0], [0], [1], [0, 0, 1, 1], [], []>} : vector<256x128xf32>, vector<128x128xf32>, vector<256x128xf32> -> vector<256x128xf32>
    %34 = arith.addf %28, %33 : vector<256x128xf32>
    %35 = vector.extract_strided_slice %3 {offsets = [1, 2, 0], sizes = [16, 16, 128], strides = [1, 1, 1]} : vector<18x18x128xf32> to vector<16x16x128xf32>
    %36 = vector.shape_cast %35 : vector<16x16x128xf32> to vector<256x128xf32>
    %c5 = arith.constant 5 : index
    %c0_20 = arith.constant 0 : index
    %c0_21 = arith.constant 0 : index
    %37 = vector.load %arg2[%c5, %c0_20, %c0_21] : memref<9x128x128xf32, #tpu.memory_space<vmem>>, vector<1x128x128xf32>
    %38 = vector.shape_cast %37 : vector<1x128x128xf32> to vector<128x128xf32>
    %cst_22 = arith.constant dense<0.000000e+00> : vector<256x128xf32>
    %39 = tpu.matmul %36, %38, %cst_22 {dimension_numbers = #tpu.dot_dimension_numbers<[1], [0], [0], [1], [0, 0, 1, 1], [], []>} : vector<256x128xf32>, vector<128x128xf32>, vector<256x128xf32> -> vector<256x128xf32>
    %40 = arith.addf %34, %39 : vector<256x128xf32>
    %41 = vector.extract_strided_slice %3 {offsets = [2, 0, 0], sizes = [16, 16, 128], strides = [1, 1, 1]} : vector<18x18x128xf32> to vector<16x16x128xf32>
    %42 = vector.shape_cast %41 : vector<16x16x128xf32> to vector<256x128xf32>
    %c6 = arith.constant 6 : index
    %c0_23 = arith.constant 0 : index
    %c0_24 = arith.constant 0 : index
    %43 = vector.load %arg2[%c6, %c0_23, %c0_24] : memref<9x128x128xf32, #tpu.memory_space<vmem>>, vector<1x128x128xf32>
    %44 = vector.shape_cast %43 : vector<1x128x128xf32> to vector<128x128xf32>
    %cst_25 = arith.constant dense<0.000000e+00> : vector<256x128xf32>
    %45 = tpu.matmul %42, %44, %cst_25 {dimension_numbers = #tpu.dot_dimension_numbers<[1], [0], [0], [1], [0, 0, 1, 1], [], []>} : vector<256x128xf32>, vector<128x128xf32>, vector<256x128xf32> -> vector<256x128xf32>
    %46 = arith.addf %40, %45 : vector<256x128xf32>
    %47 = vector.extract_strided_slice %3 {offsets = [2, 1, 0], sizes = [16, 16, 128], strides = [1, 1, 1]} : vector<18x18x128xf32> to vector<16x16x128xf32>
    %48 = vector.shape_cast %47 : vector<16x16x128xf32> to vector<256x128xf32>
    %c7 = arith.constant 7 : index
    %c0_26 = arith.constant 0 : index
    %c0_27 = arith.constant 0 : index
    %49 = vector.load %arg2[%c7, %c0_26, %c0_27] : memref<9x128x128xf32, #tpu.memory_space<vmem>>, vector<1x128x128xf32>
    %50 = vector.shape_cast %49 : vector<1x128x128xf32> to vector<128x128xf32>
    %cst_28 = arith.constant dense<0.000000e+00> : vector<256x128xf32>
    %51 = tpu.matmul %48, %50, %cst_28 {dimension_numbers = #tpu.dot_dimension_numbers<[1], [0], [0], [1], [0, 0, 1, 1], [], []>} : vector<256x128xf32>, vector<128x128xf32>, vector<256x128xf32> -> vector<256x128xf32>
    %52 = arith.addf %46, %51 : vector<256x128xf32>
    %53 = vector.extract_strided_slice %3 {offsets = [2, 2, 0], sizes = [16, 16, 128], strides = [1, 1, 1]} : vector<18x18x128xf32> to vector<16x16x128xf32>
    %54 = vector.shape_cast %53 : vector<16x16x128xf32> to vector<256x128xf32>
    %c8 = arith.constant 8 : index
    %c0_29 = arith.constant 0 : index
    %c0_30 = arith.constant 0 : index
    %55 = vector.load %arg2[%c8, %c0_29, %c0_30] : memref<9x128x128xf32, #tpu.memory_space<vmem>>, vector<1x128x128xf32>
    %56 = vector.shape_cast %55 : vector<1x128x128xf32> to vector<128x128xf32>
    %cst_31 = arith.constant dense<0.000000e+00> : vector<256x128xf32>
    %57 = tpu.matmul %54, %56, %cst_31 {dimension_numbers = #tpu.dot_dimension_numbers<[1], [0], [0], [1], [0, 0, 1, 1], [], []>} : vector<256x128xf32>, vector<128x128xf32>, vector<256x128xf32> -> vector<256x128xf32>
    %58 = arith.addf %52, %57 : vector<256x128xf32>
    %c0_32 = arith.constant 0 : index
    %c0_33 = arith.constant 0 : index
    %c0_34 = arith.constant 0 : index
    %59 = vector.load %arg3[%c0_32, %c0_33, %c0_34] : memref<1x256x128xf32, #tpu.memory_space<vmem>>, vector<1x256x128xf32>
    %60 = vector.shape_cast %59 : vector<1x256x128xf32> to vector<256x128xf32>
    %61 = vector.shape_cast %58 : vector<256x128xf32> to vector<1x256x128xf32>
    tpu.vector_store %arg3[%c0_32, %c0_33, %c0_34], %61 {strides = array<i32>} : memref<1x256x128xf32, #tpu.memory_space<vmem>>, vector<1x256x128xf32>,
    %cst_35 = arith.constant dense<0.000000e+00> : vector<128xf32>
    %62 = vector.multi_reduction <add>, %58, %cst_35 [0] : vector<256x128xf32> to vector<128xf32>
    %63 = vector.shape_cast %62 : vector<128xf32> to vector<1x128xf32>
    %c0_36 = arith.constant 0 : index
    %c0_37 = arith.constant 0 : index
    %c0_38 = arith.constant 0 : index
    %64 = vector.load %arg4[%c0_36, %c0_37, %c0_38] : memref<1x1x128xf32, #tpu.memory_space<vmem>>, vector<1x1x128xf32>
    %65 = vector.shape_cast %64 : vector<1x1x128xf32> to vector<1x128xf32>
    %66 = vector.shape_cast %63 : vector<1x128xf32> to vector<1x1x128xf32>
    tpu.vector_store %arg4[%c0_36, %c0_37, %c0_38], %66 {strides = array<i32>} : memref<1x1x128xf32, #tpu.memory_space<vmem>>, vector<1x1x128xf32>,
    %67 = arith.mulf %58, %58 : vector<256x128xf32>
    %cst_39 = arith.constant dense<0.000000e+00> : vector<128xf32>
    %68 = vector.multi_reduction <add>, %67, %cst_39 [0] : vector<256x128xf32> to vector<128xf32>
    %69 = vector.shape_cast %68 : vector<128xf32> to vector<1x128xf32>
    %c0_40 = arith.constant 0 : index
    %c0_41 = arith.constant 0 : index
    %c0_42 = arith.constant 0 : index
    %70 = vector.load %arg5[%c0_40, %c0_41, %c0_42] : memref<1x1x128xf32, #tpu.memory_space<vmem>>, vector<1x1x128xf32>
    %71 = vector.shape_cast %70 : vector<1x1x128xf32> to vector<1x128xf32>
    %72 = vector.shape_cast %69 : vector<1x128xf32> to vector<1x1x128xf32>
    tpu.vector_store %arg5[%c0_40, %c0_41, %c0_42], %72 {strides = array<i32>} : memref<1x1x128xf32, #tpu.memory_space<vmem>>, vector<1x1x128xf32>,
    return
  }
  func.func @transform_0(%arg0: i32) -> (i32, i32, i32, i32) {
    %c0_i32 = arith.constant 0 : i32
    %c0_i32_0 = arith.constant 0 : i32
    %c0_i32_1 = arith.constant 0 : i32
    %c0_i32_2 = arith.constant 0 : i32
    return %arg0, %c0_i32, %c0_i32_0, %c0_i32_1 : i32, i32, i32, i32
  }
  func.func @transform_1(%arg0: i32) -> (i32, i32, i32) {
    %c0_i32 = arith.constant 0 : i32
    %c0_i32_0 = arith.constant 0 : i32
    %c0_i32_1 = arith.constant 0 : i32
    %c0_i32_2 = arith.constant 0 : i32
    return %c0_i32, %c0_i32_0, %c0_i32_1 : i32, i32, i32
  }
  func.func @transform_2(%arg0: i32) -> (i32, i32, i32) {
    %c0_i32 = arith.constant 0 : i32
    %c0_i32_0 = arith.constant 0 : i32
    %c0_i32_1 = arith.constant 0 : i32
    return %arg0, %c0_i32, %c0_i32_0 : i32, i32, i32
  }
  func.func @transform_3(%arg0: i32) -> (i32, i32, i32) {
    %c0_i32 = arith.constant 0 : i32
    %c0_i32_0 = arith.constant 0 : i32
    %c0_i32_1 = arith.constant 0 : i32
    return %arg0, %c0_i32, %c0_i32_0 : i32, i32, i32
  }
  func.func @transform_4(%arg0: i32) -> (i32, i32, i32) {
    %c0_i32 = arith.constant 0 : i32
    %c0_i32_0 = arith.constant 0 : i32
    %c0_i32_1 = arith.constant 0 : i32
    return %arg0, %c0_i32, %c0_i32_0 : i32, i32, i32
  }
}

module attributes {stable_mosaic.version = 11 : i64} {
  func.func @_bn_residual_kernel(%arg0: i32, %arg1: memref<1x18x18x128xf32, #tpu.memory_space<vmem>>, %arg2: memref<1x256x128xf32, #tpu.memory_space<vmem>>, %arg3: memref<1x128xf32, #tpu.memory_space<vmem>>, %arg4: memref<1x128xf32, #tpu.memory_space<vmem>>, %arg5: memref<1x256x128xf32, #tpu.memory_space<vmem>>) attributes {dimension_semantics = [#tpu.dimension_semantics<parallel>], iteration_bounds = array<i64: 2>, scalar_prefetch = 0 : i64, scratch_operands = 0 : i64, tpu.core_type = #tpu.core_type<tc>, window_params = [{transform_indices = @transform_0, window_bounds = array<i64: 1, 18, 18, 128>}, {transform_indices = @transform_1, window_bounds = array<i64: 1, 256, 128>}, {pipeline_mode = #tpu.pipeline_mode<synchronous>, transform_indices = @transform_2, window_bounds = array<i64: 1, 128>}, {pipeline_mode = #tpu.pipeline_mode<synchronous>, transform_indices = @transform_3, window_bounds = array<i64: 1, 128>}, {transform_indices = @transform_4, window_bounds = array<i64: 1, 256, 128>}]} {
    %c0 = arith.constant 0 : index
    %c1 = arith.constant 1 : index
    %c1_0 = arith.constant 1 : index
    %c0_1 = arith.constant 0 : index
    %0 = vector.load %arg1[%c0, %c1, %c1_0, %c0_1] : memref<1x18x18x128xf32, #tpu.memory_space<vmem>>, vector<1x16x16x128xf32>
    %1 = vector.shape_cast %0 : vector<1x16x16x128xf32> to vector<16x16x128xf32>
    %2 = vector.shape_cast %1 : vector<16x16x128xf32> to vector<256x128xf32>
    %c0_2 = arith.constant 0 : index
    %c0_3 = arith.constant 0 : index
    %c0_4 = arith.constant 0 : index
    %3 = vector.load %arg2[%c0_2, %c0_3, %c0_4] : memref<1x256x128xf32, #tpu.memory_space<vmem>>, vector<1x256x128xf32>
    %4 = vector.shape_cast %3 : vector<1x256x128xf32> to vector<256x128xf32>
    %c0_5 = arith.constant 0 : index
    %c0_6 = arith.constant 0 : index
    %5 = vector.load %arg3[%c0_5, %c0_6] : memref<1x128xf32, #tpu.memory_space<vmem>>, vector<1x128xf32>
    %6 = vector.broadcast %5 : vector<1x128xf32> to vector<256x128xf32>
    %7 = arith.mulf %4, %6 : vector<256x128xf32>
    %8 = arith.addf %2, %7 : vector<256x128xf32>
    %c0_7 = arith.constant 0 : index
    %c0_8 = arith.constant 0 : index
    %9 = vector.load %arg4[%c0_7, %c0_8] : memref<1x128xf32, #tpu.memory_space<vmem>>, vector<1x128xf32>
    %10 = vector.broadcast %9 : vector<1x128xf32> to vector<256x128xf32>
    %11 = arith.addf %8, %10 : vector<256x128xf32>
    %c0_9 = arith.constant 0 : index
    %c0_10 = arith.constant 0 : index
    %c0_11 = arith.constant 0 : index
    %12 = vector.load %arg5[%c0_9, %c0_10, %c0_11] : memref<1x256x128xf32, #tpu.memory_space<vmem>>, vector<1x256x128xf32>
    %13 = vector.shape_cast %12 : vector<1x256x128xf32> to vector<256x128xf32>
    %14 = vector.shape_cast %11 : vector<256x128xf32> to vector<1x256x128xf32>
    tpu.vector_store %arg5[%c0_9, %c0_10, %c0_11], %14 {strides = array<i32>} : memref<1x256x128xf32, #tpu.memory_space<vmem>>, vector<1x256x128xf32>,
    return
  }
  func.func @transform_0(%arg0: i32) -> (i32, i32, i32, i32) {
    %c0_i32 = arith.constant 0 : i32
    %c0_i32_0 = arith.constant 0 : i32
    %c0_i32_1 = arith.constant 0 : i32
    %c0_i32_2 = arith.constant 0 : i32
    return %arg0, %c0_i32, %c0_i32_0, %c0_i32_1 : i32, i32, i32, i32
  }
  func.func @transform_1(%arg0: i32) -> (i32, i32, i32) {
    %c0_i32 = arith.constant 0 : i32
    %c0_i32_0 = arith.constant 0 : i32
    %c0_i32_1 = arith.constant 0 : i32
    return %arg0, %c0_i32, %c0_i32_0 : i32, i32, i32
  }
  func.func @transform_2(%arg0: i32) -> (i32, i32) {
    %c0_i32 = arith.constant 0 : i32
    %c0_i32_0 = arith.constant 0 : i32
    %c0_i32_1 = arith.constant 0 : i32
    return %c0_i32, %c0_i32_0 : i32, i32
  }
  func.func @transform_3(%arg0: i32) -> (i32, i32) {
    %c0_i32 = arith.constant 0 : i32
    %c0_i32_0 = arith.constant 0 : i32
    %c0_i32_1 = arith.constant 0 : i32
    return %c0_i32, %c0_i32_0 : i32, i32
  }
  func.func @transform_4(%arg0: i32) -> (i32, i32, i32) {
    %c0_i32 = arith.constant 0 : i32
    %c0_i32_0 = arith.constant 0 : i32
    %c0_i32_1 = arith.constant 0 : i32
    return %arg0, %c0_i32, %c0_i32_0 : i32, i32, i32
  }
}

module attributes {stable_mosaic.version = 11 : i64} {
  func.func @_bn_relu_conv1x1_stats_kernel(%arg0: i32, %arg1: memref<1x256x128xf32, #tpu.memory_space<vmem>>, %arg2: memref<128x128xf32, #tpu.memory_space<vmem>>, %arg3: memref<1x128xf32, #tpu.memory_space<vmem>>, %arg4: memref<1x128xf32, #tpu.memory_space<vmem>>, %arg5: memref<1x256x128xf32, #tpu.memory_space<vmem>>, %arg6: memref<1x1x128xf32, #tpu.memory_space<vmem>>, %arg7: memref<1x1x128xf32, #tpu.memory_space<vmem>>) attributes {dimension_semantics = [#tpu.dimension_semantics<parallel>], iteration_bounds = array<i64: 2>, scalar_prefetch = 0 : i64, scratch_operands = 0 : i64, tpu.core_type = #tpu.core_type<tc>, window_params = [{transform_indices = @transform_0, window_bounds = array<i64: 1, 256, 128>}, {pipeline_mode = #tpu.pipeline_mode<synchronous>, transform_indices = @transform_1, window_bounds = array<i64: 128, 128>}, {pipeline_mode = #tpu.pipeline_mode<synchronous>, transform_indices = @transform_2, window_bounds = array<i64: 1, 128>}, {pipeline_mode = #tpu.pipeline_mode<synchronous>, transform_indices = @transform_3, window_bounds = array<i64: 1, 128>}, {transform_indices = @transform_4, window_bounds = array<i64: 1, 256, 128>}, {transform_indices = @transform_5, window_bounds = array<i64: 1, 1, 128>}, {transform_indices = @transform_6, window_bounds = array<i64: 1, 1, 128>}]} {
    %c0 = arith.constant 0 : index
    %c0_0 = arith.constant 0 : index
    %c0_1 = arith.constant 0 : index
    %0 = vector.load %arg1[%c0, %c0_0, %c0_1] : memref<1x256x128xf32, #tpu.memory_space<vmem>>, vector<1x256x128xf32>
    %1 = vector.shape_cast %0 : vector<1x256x128xf32> to vector<256x128xf32>
    %c0_2 = arith.constant 0 : index
    %c0_3 = arith.constant 0 : index
    %2 = vector.load %arg3[%c0_2, %c0_3] : memref<1x128xf32, #tpu.memory_space<vmem>>, vector<1x128xf32>
    %3 = vector.broadcast %2 : vector<1x128xf32> to vector<256x128xf32>
    %4 = arith.mulf %1, %3 : vector<256x128xf32>
    %c0_4 = arith.constant 0 : index
    %c0_5 = arith.constant 0 : index
    %5 = vector.load %arg4[%c0_4, %c0_5] : memref<1x128xf32, #tpu.memory_space<vmem>>, vector<1x128xf32>
    %6 = vector.broadcast %5 : vector<1x128xf32> to vector<256x128xf32>
    %7 = arith.addf %4, %6 : vector<256x128xf32>
    %cst = arith.constant 0.000000e+00 : f32
    %8 = vector.broadcast %cst : f32 to vector<256x128xf32>
    %9 = arith.maximumf %7, %8 : vector<256x128xf32>
    %c0_6 = arith.constant 0 : index
    %c0_7 = arith.constant 0 : index
    %10 = vector.load %arg2[%c0_6, %c0_7] : memref<128x128xf32, #tpu.memory_space<vmem>>, vector<128x128xf32>
    %cst_8 = arith.constant dense<0.000000e+00> : vector<256x128xf32>
    %11 = tpu.matmul %9, %10, %cst_8 {dimension_numbers = #tpu.dot_dimension_numbers<[1], [0], [0], [1], [0, 0, 1, 1], [], []>} : vector<256x128xf32>, vector<128x128xf32>, vector<256x128xf32> -> vector<256x128xf32>
    %c0_9 = arith.constant 0 : index
    %c0_10 = arith.constant 0 : index
    %c0_11 = arith.constant 0 : index
    %12 = vector.load %arg5[%c0_9, %c0_10, %c0_11] : memref<1x256x128xf32, #tpu.memory_space<vmem>>, vector<1x256x128xf32>
    %13 = vector.shape_cast %12 : vector<1x256x128xf32> to vector<256x128xf32>
    %14 = vector.shape_cast %11 : vector<256x128xf32> to vector<1x256x128xf32>
    tpu.vector_store %arg5[%c0_9, %c0_10, %c0_11], %14 {strides = array<i32>} : memref<1x256x128xf32, #tpu.memory_space<vmem>>, vector<1x256x128xf32>,
    %cst_12 = arith.constant dense<0.000000e+00> : vector<128xf32>
    %15 = vector.multi_reduction <add>, %11, %cst_12 [0] : vector<256x128xf32> to vector<128xf32>
    %16 = vector.shape_cast %15 : vector<128xf32> to vector<1x128xf32>
    %c0_13 = arith.constant 0 : index
    %c0_14 = arith.constant 0 : index
    %c0_15 = arith.constant 0 : index
    %17 = vector.load %arg6[%c0_13, %c0_14, %c0_15] : memref<1x1x128xf32, #tpu.memory_space<vmem>>, vector<1x1x128xf32>
    %18 = vector.shape_cast %17 : vector<1x1x128xf32> to vector<1x128xf32>
    %19 = vector.shape_cast %16 : vector<1x128xf32> to vector<1x1x128xf32>
    tpu.vector_store %arg6[%c0_13, %c0_14, %c0_15], %19 {strides = array<i32>} : memref<1x1x128xf32, #tpu.memory_space<vmem>>, vector<1x1x128xf32>,
    %20 = arith.mulf %11, %11 : vector<256x128xf32>
    %cst_16 = arith.constant dense<0.000000e+00> : vector<128xf32>
    %21 = vector.multi_reduction <add>, %20, %cst_16 [0] : vector<256x128xf32> to vector<128xf32>
    %22 = vector.shape_cast %21 : vector<128xf32> to vector<1x128xf32>
    %c0_17 = arith.constant 0 : index
    %c0_18 = arith.constant 0 : index
    %c0_19 = arith.constant 0 : index
    %23 = vector.load %arg7[%c0_17, %c0_18, %c0_19] : memref<1x1x128xf32, #tpu.memory_space<vmem>>, vector<1x1x128xf32>
    %24 = vector.shape_cast %23 : vector<1x1x128xf32> to vector<1x128xf32>
    %25 = vector.shape_cast %22 : vector<1x128xf32> to vector<1x1x128xf32>
    tpu.vector_store %arg7[%c0_17, %c0_18, %c0_19], %25 {strides = array<i32>} : memref<1x1x128xf32, #tpu.memory_space<vmem>>, vector<1x1x128xf32>,
    return
  }
  func.func @transform_0(%arg0: i32) -> (i32, i32, i32) {
    %c0_i32 = arith.constant 0 : i32
    %c0_i32_0 = arith.constant 0 : i32
    %c0_i32_1 = arith.constant 0 : i32
    return %arg0, %c0_i32, %c0_i32_0 : i32, i32, i32
  }
  func.func @transform_1(%arg0: i32) -> (i32, i32) {
    %c0_i32 = arith.constant 0 : i32
    %c0_i32_0 = arith.constant 0 : i32
    %c0_i32_1 = arith.constant 0 : i32
    return %c0_i32, %c0_i32_0 : i32, i32
  }
  func.func @transform_2(%arg0: i32) -> (i32, i32) {
    %c0_i32 = arith.constant 0 : i32
    %c0_i32_0 = arith.constant 0 : i32
    %c0_i32_1 = arith.constant 0 : i32
    return %c0_i32, %c0_i32_0 : i32, i32
  }
  func.func @transform_3(%arg0: i32) -> (i32, i32) {
    %c0_i32 = arith.constant 0 : i32
    %c0_i32_0 = arith.constant 0 : i32
    %c0_i32_1 = arith.constant 0 : i32
    return %c0_i32, %c0_i32_0 : i32, i32
  }
  func.func @transform_4(%arg0: i32) -> (i32, i32, i32) {
    %c0_i32 = arith.constant 0 : i32
    %c0_i32_0 = arith.constant 0 : i32
    %c0_i32_1 = arith.constant 0 : i32
    return %arg0, %c0_i32, %c0_i32_0 : i32, i32, i32
  }
  func.func @transform_5(%arg0: i32) -> (i32, i32, i32) {
    %c0_i32 = arith.constant 0 : i32
    %c0_i32_0 = arith.constant 0 : i32
    %c0_i32_1 = arith.constant 0 : i32
    return %arg0, %c0_i32, %c0_i32_0 : i32, i32, i32
  }
  func.func @transform_6(%arg0: i32) -> (i32, i32, i32) {
    %c0_i32 = arith.constant 0 : i32
    %c0_i32_0 = arith.constant 0 : i32
    %c0_i32_1 = arith.constant 0 : i32
    return %arg0, %c0_i32, %c0_i32_0 : i32, i32, i32
  }
}

</mosaic_0001>

<bundles_post_ra>
// kernel: res_block_forward.5
= control target key start
LH: loop header
LB: loop body
LE: loop exit
PB: predicated region body
PF: predicated region fallthrough
CT: control target
= control target key end

     0   :  { %s576_s15 = smov 0   ;;  %s772_s0 = inlined_call_operand.vmem [shape: f32[2,18,18,128], index: 0, kind: input, shape index: {}]   ;;  %s773_s1 = inlined_call_operand.vmem [shape: f32[2,256,128], index: 1, kind: input, shape index: {}]   ;;  %s774_s2 = inlined_call_operand.vmem [shape: f32[1,128], index: 2, kind: input, shape index: {}]   ;;  %s775_s3 = inlined_call_operand.vmem [shape: f32[1,128], index: 3, kind: input, shape index: {}]   ;;  %s776_s4 = inlined_call_operand.vmem [shape: f32[2,256,128], index: 4, kind: output, shape index: {}]  }
   0x1 LB: > { %s486_s16 = sadd.s32 4294967295, %s549_s15   ;;  %p490_p0 = scmp.ge.s32.totalorder %s549_s15, 1  ;;  %s549_s15 = sphi %s576_s15, %s14_s15  }
   0x2   : > { %p172_p1 = scmp.lt.s32.totalorder %s549_s15, 3 }
   0x4   : > { %p173_p2 = pnand %p490_p0, %p172_p1 }
   0x5   : > { %p203_p3 = scmp.lt.s32.totalorder (!%p173_p2), %s486_s16, 1 }
   0x6   : > { %176 = sbr.rel (%p173_p2) target bundleno = 53 (0x35), region = 36 }
   0xb   : > { %s778_s16 = smov (!%p203_p3, %s486_s16), 1  ;;  %v587_v0 = vld [vmem:[%s774_s2] ss:$0 sm:$0xff] }
   0xc   : > { %s532_s19 = smul.u32 432, %s778_s16  ;;  %s530_s20 = sshll.u32 %s778_s16, 8  ;;  %v597_v1 = vld [vmem:[%s775_s3] ss:$0 sm:$0xff] }
   0xd   : > { %s592_s23 = scalar_lea.vmem %s773_s1, %s530_s20  ;;  %s623_s5 = scalar_lea.vmem %s776_s4, %s530_s20 }
   0xe   : > { %s602_s28 = scalar_lea.vmem %s772_s0, %s532_s19  ;;  %v251_v2 = vld [vmem:[%s592_s23] sm:$0xff]  ;;  %v252_v3 = vld [vmem:[%s592_s23 + $0x8] sm:$0xff]  ;;  %v253_v4 = vld [vmem:[%s592_s23 + $0x10] sm:$0xff] }
   0xf   : > { %v496_v5 = vld [vmem:[%s602_s28 + $0x19] sm:$0xff]  ;;  %v287_v6 = vmul.f32 %v587_v0, %v251_v2  ;;  %v497_v7 = vld [vmem:[%s602_s28 + $0x21] sm:$0xff]  ;;  %v288_v8 = vmul.f32 %v587_v0, %v252_v3  ;;  %v498_v9 = vld [vmem:[%s602_s28 + $0x31] sm:$0xff]  ;;  %v289_v10 = vmul.f32 %v587_v0, %v253_v4 }
  0x10   : > { %v499_v11 = vld [vmem:[%s602_s28 + $0x39] sm:$0xff]  ;;  %v500_v13 = vld [vmem:[%s602_s28 + $0x49] sm:$0xff]  ;;  %v501_v19 = vld [vmem:[%s602_s28 + $0x51] sm:$0xff] }
  0x11   : > { %v254_v12 = vld [vmem:[%s592_s23 + $0x18] sm:$0xff]  ;;  %v319_v14 = vadd.f32 %v496_v5, %v287_v6  ;;  %v320_v15 = vadd.f32 %v497_v7, %v288_v8  ;;  %v321_v16 = vadd.f32 %v498_v9, %v289_v10  ;;  %v255_v18 = vld [vmem:[%s592_s23 + $0x20] sm:$0xff]  ;;  %v256_v20 = vld [vmem:[%s592_s23 + $0x28] sm:$0xff] }
  0x12   : > { %v290_v17 = vmul.f32 %v587_v0, %v254_v12  ;;  %v291_v21 = vmul.f32 %v587_v0, %v255_v18  ;;  %v292_v22 = vmul.f32 %v587_v0, %v256_v20  ;;  %v502_v23 = vld [vmem:[%s602_s28 + $0x61] sm:$0xff]  ;;  %v257_v24 = vld [vmem:[%s592_s23 + $0x30] sm:$0xff]  ;;  %v258_v30 = vld [vmem:[%s592_s23 + $0x38] sm:$0xff] }
  0x13   : > { %v355_v25 = vadd.f32 %v597_v1, %v319_v14  ;;  %v356_v26 = vadd.f32 %v597_v1, %v320_v15  ;;  %v357_v27 = vadd.f32 %v597_v1, %v321_v16  ;;  %v503_v29 = vld [vmem:[%s602_s28 + $0x69] sm:$0xff]  ;;  %v259_v31 = vld [vmem:[%s592_s23 + $0x40] sm:$0xff]  ;;  %v293_v34 = vmul.f32 %v587_v0, %v257_v24  ;;  %v506_v42 = vld [vmem:[%s602_s28 + $0x91] sm:$0xff] }
  0x14   : > { %v322_v28 = vadd.f32 %v499_v11, %v290_v17  ;;  %v323_v32 = vadd.f32 %v500_v13, %v291_v21  ;;  %v324_v33 = vadd.f32 %v501_v19, %v292_v22  ;;  %v294_v35 = vmul.f32 %v587_v0, %v258_v30  ;;  %v504_v36 = vld [vmem:[%s602_s28 + $0x79] sm:$0xff]  ;;  %v505_v37 = vld [vmem:[%s602_s28 + $0x81] sm:$0xff]  ;;  %v261_v43 = vld [vmem:[%s592_s23 + $0x50] sm:$0xff] }
  0x15   : > { %v260_v38 = vld [vmem:[%s592_s23 + $0x48] sm:$0xff]  ;;  %387 = vst [vmem:[%s623_s5] sm:$0xff] %v355_v25  ;;  %v295_v40 = vmul.f32 %v587_v0, %v259_v31  ;;  %v262_v44 = vld [vmem:[%s592_s23 + $0x58] sm:$0xff]  ;;  %v325_v47 = vadd.f32 %v502_v23, %v293_v34  ;;  %v263_v51 = vld [vmem:[%s592_s23 + $0x60] sm:$0xff]  ;;  %v297_v54 = vmul.f32 %v587_v0, %v261_v43 }
  0x16   : > { %v358_v39 = vadd.f32 %v597_v1, %v322_v28  ;;  %v296_v41 = vmul.f32 %v587_v0, %v260_v38  ;;  %388 = vst [vmem:[%s623_s5 + $0x8] sm:$0xff] %v356_v26  ;;  %v359_v45 = vadd.f32 %v597_v1, %v323_v32  ;;  %v360_v46 = vadd.f32 %v597_v1, %v324_v33  ;;  %v507_v49 = vld [vmem:[%s602_s28 + $0x99] sm:$0xff]  ;;  %v508_v50 = vld [vmem:[%s602_s28 + $0xa9] sm:$0xff]  ;;  %v509_v56 = vld [vmem:[%s602_s28 + $0xb1] sm:$0xff] }
  0x17   : > { %v326_v48 = vadd.f32 %v503_v29, %v294_v35  ;;  %389 = vst [vmem:[%s623_s5 + $0x10] sm:$0xff] %v357_v27  ;;  %v327_v52 = vadd.f32 %v504_v36, %v295_v40  ;;  %v298_v55 = vmul.f32 %v587_v0, %v262_v44  ;;  %v264_v57 = vld [vmem:[%s592_s23 + $0x68] sm:$0xff]  ;;  %v265_v58 = vld [vmem:[%s592_s23 + $0x70] sm:$0xff]  ;;  %v361_v59 = vadd.f32 %v597_v1, %v325_v47  ;;  %v266_v2 = vld [vmem:[%s592_s23 + $0x78] sm:$0xff] }
  0x18   : > { %v328_v53 = vadd.f32 %v505_v37, %v296_v41  ;;  %390 = vst [vmem:[%s623_s5 + $0x18] sm:$0xff] %v358_v39  ;;  %v299_v61 = vmul.f32 %v587_v0, %v263_v51  ;;  %v300_v62 = vmul.f32 %v587_v0, %v264_v57  ;;  %v510_v63 = vld [vmem:[%s602_s28 + $0xc1] sm:$0xff]  ;;  %v329_v5 = vadd.f32 %v506_v42, %v297_v54  ;;  %v511_v7 = vld [vmem:[%s602_s28 + $0xc9] sm:$0xff]  ;;  %v512_v14 = vld [vmem:[%s602_s28 + $0xd9] sm:$0xff] }
  0x19   : > { %v362_v60 = vadd.f32 %v597_v1, %v326_v48  ;;  %391 = vst [vmem:[%s623_s5 + $0x20] sm:$0xff] %v359_v45  ;;  %v363_v3 = vadd.f32 %v597_v1, %v327_v52  ;;  %v330_v6 = vadd.f32 %v507_v49, %v298_v55  ;;  %v267_v8 = vld [vmem:[%s592_s23 + $0x80] sm:$0xff]  ;;  %v268_v9 = vld [vmem:[%s592_s23 + $0x88] sm:$0xff]  ;;  %v301_v12 = vmul.f32 %v587_v0, %v265_v58  ;;  %v269_v15 = vld [vmem:[%s592_s23 + $0x90] sm:$0xff] }
  0x1a   : > { %v364_v4 = vadd.f32 %v597_v1, %v328_v53  ;;  %392 = vst [vmem:[%s623_s5 + $0x28] sm:$0xff] %v360_v46  ;;  %v331_v10 = vadd.f32 %v508_v50, %v299_v61  ;;  %v332_v11 = vadd.f32 %v509_v56, %v300_v62  ;;  %v302_v13 = vmul.f32 %v587_v0, %v266_v2  ;;  %v513_v18 = vld [vmem:[%s602_s28 + $0xe1] sm:$0xff]  ;;  %v270_v20 = vld [vmem:[%s592_s23 + $0x98] sm:$0xff]  ;;  %v273_v32 = vld [vmem:[%s592_s23 + $0xb0] sm:$0xff] }
  0x1b   : > { %393 = vst [vmem:[%s623_s5 + $0x30] sm:$0xff] %v361_v59  ;;  %v365_v16 = vadd.f32 %v597_v1, %v329_v5  ;;  %v303_v17 = vmul.f32 %v587_v0, %v267_v8  ;;  %v304_v19 = vmul.f32 %v587_v0, %v268_v9  ;;  %v271_v21 = vld [vmem:[%s592_s23 + $0xa0] sm:$0xff]  ;;  %v366_v22 = vadd.f32 %v597_v1, %v330_v6  ;;  %v514_v25 = vld [vmem:[%s602_s28 + $0xf1] sm:$0xff]  ;;  %v272_v26 = vld [vmem:[%s592_s23 + $0xa8] sm:$0xff] }
  0x1c   : > { %394 = vst [vmem:[%s623_s5 + $0x38] sm:$0xff] %v362_v60  ;;  %v333_v23 = vadd.f32 %v510_v63, %v301_v12  ;;  %v334_v24 = vadd.f32 %v511_v7, %v302_v13  ;;  %v367_v27 = vadd.f32 %v597_v1, %v331_v10  ;;  %v305_v29 = vmul.f32 %v587_v0, %v269_v15  ;;  %v515_v30 = vld [vmem:[%s602_s28 + $0xf9] sm:$0xff]  ;;  %v516_v36 = vld [vmem:[%s602_s28 + $0x109] sm:$0xff]  ;;  %v517_v42 = vld [vmem:[%s602_s28 + $0x111] sm:$0xff] }
  0x1d   : > { %395 = vst [vmem:[%s623_s5 + $0x40] sm:$0xff] %v363_v3  ;;  %v335_v28 = vadd.f32 %v512_v14, %v303_v17  ;;  %v306_v31 = vmul.f32 %v587_v0, %v270_v20  ;;  %v274_v33 = vld [vmem:[%s592_s23 + $0xb8] sm:$0xff]  ;;  %v368_v34 = vadd.f32 %v597_v1, %v332_v11  ;;  %v336_v35 = vadd.f32 %v513_v18, %v304_v19  ;;  %v275_v39 = vld [vmem:[%s592_s23 + $0xc0] sm:$0xff]  ;;  %v276_v43 = vld [vmem:[%s592_s23 + $0xc8] sm:$0xff] }
  0x1e   : > { %396 = vst [vmem:[%s623_s5 + $0x48] sm:$0xff] %v364_v4  ;;  %v307_v37 = vmul.f32 %v587_v0, %v271_v21  ;;  %v308_v38 = vmul.f32 %v587_v0, %v272_v26  ;;  %v369_v40 = vadd.f32 %v597_v1, %v333_v23  ;;  %v337_v41 = vadd.f32 %v514_v25, %v305_v29  ;;  %v518_v46 = vld [vmem:[%s602_s28 + $0x121] sm:$0xff]  ;;  %v277_v49 = vld [vmem:[%s592_s23 + $0xd0] sm:$0xff]  ;;  %v278_v54 = vld [vmem:[%s592_s23 + $0xd8] sm:$0xff] }
  0x1f   : > { %397 = vst [vmem:[%s623_s5 + $0x50] sm:$0xff] %v365_v16  ;;  %v370_v44 = vadd.f32 %v597_v1, %v334_v24  ;;  %v338_v45 = vadd.f32 %v515_v30, %v306_v31  ;;  %v309_v47 = vmul.f32 %v587_v0, %v273_v32  ;;  %v310_v48 = vmul.f32 %v587_v0, %v274_v33  ;;  %v519_v52 = vld [vmem:[%s602_s28 + $0x129] sm:$0xff]  ;;  %v520_v57 = vld [vmem:[%s602_s28 + $0x139] sm:$0xff]  ;;  %v521_v62 = vld [vmem:[%s602_s28 + $0x141] sm:$0xff] }
  0x20   : > { %398 = vst [vmem:[%s623_s5 + $0x58] sm:$0xff] %v366_v22  ;;  %v371_v50 = vadd.f32 %v597_v1, %v335_v28  ;;  %v339_v51 = vadd.f32 %v516_v36, %v307_v37  ;;  %v311_v53 = vmul.f32 %v587_v0, %v275_v39  ;;  %v372_v55 = vadd.f32 %v597_v1, %v336_v35  ;;  %v279_v59 = vld [vmem:[%s592_s23 + $0xe0] sm:$0xff]  ;;  %v280_v2 = vld [vmem:[%s592_s23 + $0xe8] sm:$0xff]  ;;  %v522_v5 = vld [vmem:[%s602_s28 + $0x151] sm:$0xff] }
  0x21   : > { %399 = vst [vmem:[%s623_s5 + $0x60] sm:$0xff] %v367_v27  ;;  %v340_v56 = vadd.f32 %v517_v42, %v308_v38  ;;  %v312_v58 = vmul.f32 %v587_v0, %v276_v43  ;;  %v373_v60 = vadd.f32 %v597_v1, %v337_v41  ;;  %v341_v61 = vadd.f32 %v518_v46, %v309_v47  ;;  %v281_v7 = vld [vmem:[%s592_s23 + $0xf0] sm:$0xff]  ;;  %v523_v10 = vld [vmem:[%s602_s28 + $0x159] sm:$0xff]  ;;  %v526_v23 = vld [vmem:[%s602_s28 + $0x181] sm:$0xff] }
  0x22   : > { %400 = vst [vmem:[%s623_s5 + $0x68] sm:$0xff] %v368_v34  ;;  %v313_v63 = vmul.f32 %v587_v0, %v277_v49  ;;  %v374_v3 = vadd.f32 %v597_v1, %v338_v45  ;;  %v342_v4 = vadd.f32 %v519_v52, %v310_v48  ;;  %v314_v6 = vmul.f32 %v587_v0, %v278_v54  ;;  %v282_v12 = vld [vmem:[%s592_s23 + $0xf8] sm:$0xff]  ;;  %v524_v15 = vld [vmem:[%s602_s28 + $0x169] sm:$0xff] }
  0x23   : > { %401 = vst [vmem:[%s623_s5 + $0x70] sm:$0xff] %v369_v40  ;;  %v375_v8 = vadd.f32 %v597_v1, %v339_v51  ;;  %v343_v9 = vadd.f32 %v520_v57, %v311_v53  ;;  %v315_v11 = vmul.f32 %v587_v0, %v279_v59  ;;  %v376_v13 = vadd.f32 %v597_v1, %v340_v56  ;;  %v525_v19 = vld [vmem:[%s602_s28 + $0x171] sm:$0xff]  ;;  %v527_v27 = vld [vmem:[%s602_s28 + $0x189] sm:$0xff] }
  0x24   : > { %402 = vst [vmem:[%s623_s5 + $0x78] sm:$0xff] %v370_v44  ;;  %v344_v14 = vadd.f32 %v521_v62, %v312_v58  ;;  %v316_v16 = vmul.f32 %v587_v0, %v280_v2  ;;  %v377_v17 = vadd.f32 %v597_v1, %v341_v61  ;;  %v345_v18 = vadd.f32 %v522_v5, %v313_v63 }
  0x25   : > { %403 = vst [vmem:[%s623_s5 + $0x80] sm:$0xff] %v371_v50  ;;  %v317_v20 = vmul.f32 %v587_v0, %v281_v7  ;;  %v378_v21 = vadd.f32 %v597_v1, %v342_v4  ;;  %v346_v22 = vadd.f32 %v523_v10, %v314_v6  ;;  %v318_v24 = vmul.f32 %v587_v0, %v282_v12 }
  0x26   : > { %404 = vst [vmem:[%s623_s5 + $0x88] sm:$0xff] %v372_v55  ;;  %v379_v25 = vadd.f32 %v597_v1, %v343_v9  ;;  %v347_v26 = vadd.f32 %v524_v15, %v315_v11  ;;  %v380_v28 = vadd.f32 %v597_v1, %v344_v14  ;;  %v348_v29 = vadd.f32 %v525_v19, %v316_v16 }
  0x27   : > { %405 = vst [vmem:[%s623_s5 + $0x90] sm:$0xff] %v373_v60  ;;  %v381_v30 = vadd.f32 %v597_v1, %v345_v18  ;;  %v349_v0 = vadd.f32 %v526_v23, %v317_v20  ;;  %v382_v31 = vadd.f32 %v597_v1, %v346_v22  ;;  %v350_v32 = vadd.f32 %v527_v27, %v318_v24 }
  0x28   : > { %406 = vst [vmem:[%s623_s5 + $0x98] sm:$0xff] %v374_v3  ;;  %v383_v33 = vadd.f32 %v597_v1, %v347_v26  ;;  %v384_v34 = vadd.f32 %v597_v1, %v348_v29 }
  0x29   : > { %407 = vst [vmem:[%s623_s5 + $0xa0] sm:$0xff] %v375_v8  ;;  %v385_v35 = vadd.f32 %v597_v1, %v349_v0  ;;  %v386_v36 = vadd.f32 %v597_v1, %v350_v32 }
  0x2a   : > { %408 = vst [vmem:[%s623_s5 + $0xa8] sm:$0xff] %v376_v13 }
  0x2b   : > { %409 = vst [vmem:[%s623_s5 + $0xb0] sm:$0xff] %v377_v17 }
  0x2c   : > { %410 = vst [vmem:[%s623_s5 + $0xb8] sm:$0xff] %v378_v21 }
  0x2d   : > { %411 = vst [vmem:[%s623_s5 + $0xc0] sm:$0xff] %v379_v25 }
  0x2e   : > { %412 = vst [vmem:[%s623_s5 + $0xc8] sm:$0xff] %v380_v28 }
  0x2f   : > { %413 = vst [vmem:[%s623_s5 + $0xd0] sm:$0xff] %v381_v30 }
  0x30   : > { %414 = vst [vmem:[%s623_s5 + $0xd8] sm:$0xff] %v382_v31 }
  0x31   : > { %415 = vst [vmem:[%s623_s5 + $0xe0] sm:$0xff] %v383_v33 }
  0x32   : > { %416 = vst [vmem:[%s623_s5 + $0xe8] sm:$0xff] %v384_v34 }
  0x33   : > { %417 = vst [vmem:[%s623_s5 + $0xf0] sm:$0xff] %v385_v35 }
  0x34   : > { %418 = vst [vmem:[%s623_s5 + $0xf8] sm:$0xff] %v386_v36 }
  0x35 PF: > { %s14_s15 = sadd.s32 1, %s549_s15  }
  0x36   : > { %p11_p4 = scmp.ge.s32.totalorder %s14_s15, 4  }
  0x38   :  { %13 = sbr.rel (!%p11_p4) target bundleno = 1 (0x1), region = 70 }

// kernel: res_block_forward.4
= control target key start
LH: loop header
LB: loop body
LE: loop exit
PB: predicated region body
PF: predicated region fallthrough
CT: control target
= control target key end

     0   :  { %s893_s21 = smov 0   ;;  %s1223_s0 = inlined_call_operand.vmem [shape: f32[2,256,128], index: 0, kind: input, shape index: {}]   ;;  %s1224_s1 = inlined_call_operand.vmem [shape: f32[128,128], index: 1, kind: input, shape index: {}]   ;;  %s1225_s2 = inlined_call_operand.vmem [shape: f32[1,128], index: 2, kind: input, shape index: {}]   ;;  %s1226_s3 = inlined_call_operand.vmem [shape: f32[1,128], index: 3, kind: input, shape index: {}]   ;;  %s1227_s4 = inlined_call_operand.vmem [shape: f32[2,256,128], index: 4, kind: output, shape index: {0}]   ;;  %s1228_s5 = inlined_call_operand.vmem [shape: f32[2,1,128], index: 5, kind: output, shape index: {1}]   ;;  %s1229_s6 = inlined_call_operand.vmem [shape: f32[2,1,128], index: 6, kind: output, shape index: {2}]  }
   0x1 LB: > { %s779_s22 = sadd.s32 4294967295, %s856_s21   ;;  %p783_p0 = scmp.ge.s32.totalorder %s856_s21, 1  ;;  %s856_s21 = sphi %s893_s21, %s17_s21  }
   0x2   : > { %p217_p1 = scmp.lt.s32.totalorder %s856_s21, 3 }
   0x4   : > { %p218_p2 = pnand %p783_p0, %p217_p1 }
   0x5   : > { %p253_p3 = scmp.lt.s32.totalorder (!%p218_p2), %s779_s22, 1 }
   0x6   : > { %221 = sbr.rel (%p218_p2) target bundleno = 290 (0x122), region = 36 }
   0xb   : > { %v420_v0 = vld [vmem:[%s1224_s1 + $0x78] sm:$0xff]  ;;  %v419_v1 = vld [vmem:[%s1224_s1 + $0x70] sm:$0xff]  ;;  %v418_v2 = vld [vmem:[%s1224_s1 + $0x68] sm:$0xff]  ;;  %s1231_s22 = smov (!%p253_p3, %s779_s22), 1 }
   0xc   : > { %421 = vmatpush.msra.mxu0 %v420_v0  ;;  %792 = vmatpush.msra.mxu1 %v420_v0  ;;  %v417_v3 = vld [vmem:[%s1224_s1 + $0x60] sm:$0xff]  ;;  %v416_v4 = vld [vmem:[%s1224_s1 + $0x58] sm:$0xff]  ;;  %v415_v5 = vld [vmem:[%s1224_s1 + $0x50] sm:$0xff]  ;;  %s790_s13 = sshll.u32 %s1231_s22, 8  ;;  %s265_s24 = scalar_lea.vmem %s1228_s5, %s1231_s22 }
   0xd   : > { %793 = vmatpush.msra.mxu2 %v420_v0  ;;  %794 = vmatpush.msra.mxu3 %v420_v0  ;;  %v414_v6 = vld [vmem:[%s1224_s1 + $0x48] sm:$0xff]  ;;  %v413_v7 = vld [vmem:[%s1224_s1 + $0x40] sm:$0xff]  ;;  %v412_v8 = vld [vmem:[%s1224_s1 + $0x38] sm:$0xff]  ;;  %s936_s20 = scalar_lea.vmem %s1223_s0, %s790_s13  ;;  %s268_s27 = scalar_lea.vmem %s1229_s6, %s1231_s22 }
   0xe   : > { %422 = vmatpush.msra.mxu0 %v419_v1  ;;  %795 = vmatpush.msra.mxu1 %v419_v1  ;;  %v411_v9 = vld [vmem:[%s1224_s1 + $0x30] sm:$0xff]  ;;  %v944_v10 = vld [vmem:[%s1225_s2] ss:$0 sm:$0xff]  ;;  %v410_v13 = vld [vmem:[%s1224_s1 + $0x28] sm:$0xff] }
   0xf   : > { %796 = vmatpush.msra.mxu2 %v419_v1  ;;  %797 = vmatpush.msra.mxu3 %v419_v1  ;;  %v269_v11 = vld [vmem:[%s936_s20] sm:$0xff]  ;;  %v408_v19 = vld [vmem:[%s1224_s1 + $0x18] sm:$0xff]  ;;  %v407_v21 = vld [vmem:[%s1224_s1 + $0x10] sm:$0xff] }
  0x10   : > { %423 = vmatpush.msra.mxu0 %v418_v2  ;;  %798 = vmatpush.msra.mxu1 %v418_v2  ;;  %v277_v12 = vld [vmem:[%s936_s20 + $0x40] sm:$0xff]  ;;  %v305_v16 = vmul.f32 %v944_v10, %v269_v11  ;;  %v270_v24 = vld [vmem:[%s936_s20 + $0x8] sm:$0xff]  ;;  %v271_v37 = vld [vmem:[%s936_s20 + $0x10] sm:$0xff] }
  0x11   : > { %799 = vmatpush.msra.mxu2 %v418_v2  ;;  %800 = vmatpush.msra.mxu3 %v418_v2  ;;  %v285_v14 = vld [vmem:[%s936_s20 + $0x80] sm:$0xff]  ;;  %v313_v18 = vmul.f32 %v944_v10, %v277_v12  ;;  %v278_v25 = vld [vmem:[%s936_s20 + $0x48] sm:$0xff]  ;;  %v306_v31 = vmul.f32 %v944_v10, %v270_v24  ;;  %v279_v39 = vld [vmem:[%s936_s20 + $0x50] sm:$0xff]  ;;  %v307_v41 = vmul.f32 %v944_v10, %v271_v37 }
  0x12   : > { %424 = vmatpush.msra.mxu0 %v417_v3  ;;  %801 = vmatpush.msra.mxu1 %v417_v3  ;;  %v409_v15 = vld [vmem:[%s1224_s1 + $0x20] sm:$0xff]  ;;  %v321_v20 = vmul.f32 %v944_v10, %v285_v14  ;;  %v406_v26 = vld [vmem:[%s1224_s1 + $0x8] sm:$0xff]  ;;  %v314_v33 = vmul.f32 %v944_v10, %v278_v25  ;;  %v287_v42 = vld [vmem:[%s936_s20 + $0x90] sm:$0xff]  ;;  %v315_v46 = vmul.f32 %v944_v10, %v279_v39 }
  0x13   : > { %802 = vmatpush.msra.mxu2 %v417_v3  ;;  %803 = vmatpush.msra.mxu3 %v417_v3  ;;  %v959_v17 = vld [vmem:[%s1226_s3] ss:$0 sm:$0xff]  ;;  %v286_v28 = vld [vmem:[%s936_s20 + $0x88] sm:$0xff]  ;;  %v323_v49 = vmul.f32 %v944_v10, %v287_v42  ;;  %v272_v52 = vld [vmem:[%s936_s20 + $0x18] sm:$0xff] }
  0x14   : > { %425 = vmatpush.msra.mxu0 %v416_v4  ;;  %804 = vmatpush.msra.mxu1 %v416_v4  ;;  %v341_v22 = vadd.f32 %v959_v17, %v305_v16  ;;  %v349_v23 = vadd.f32 %v959_v17, %v313_v18  ;;  %v357_v27 = vadd.f32 %v959_v17, %v321_v20  ;;  %v405_v29 = vld [vmem:[%s1224_s1] sm:$0xff]  ;;  %v280_v55 = vld [vmem:[%s936_s20 + $0x58] sm:$0xff]  ;;  %v294_v59 = vld [vmem:[%s936_s20 + $0xc8] sm:$0xff] }
  0x15   : > { %805 = vmatpush.msra.mxu2 %v416_v4  ;;  %806 = vmatpush.msra.mxu3 %v416_v4  ;;  %v322_v35 = vmul.f32 %v944_v10, %v286_v28  ;;  %v342_v36 = vadd.f32 %v959_v17, %v306_v31  ;;  %v350_v38 = vadd.f32 %v959_v17, %v314_v33  ;;  %v293_v43 = vld [vmem:[%s936_s20 + $0xc0] sm:$0xff]  ;;  %v288_v58 = vld [vmem:[%s936_s20 + $0x98] sm:$0xff]  ;;  %v295_v12 = vld [vmem:[%s936_s20 + $0xd0] sm:$0xff] }
  0x16   : > { %426 = vmatpush.msra.mxu0 %v415_v5  ;;  %807 = vmatpush.msra.mxu1 %v415_v5  ;;  %v373_v30 = vmax.f32 %v341_v22, 0.0  ;;  %v381_v32 = vmax.f32 %v349_v23, 0.0  ;;  %v389_v34 = vmax.f32 %v357_v27, 0.0  ;;  %v329_v47 = vmul.f32 %v944_v10, %v293_v43  ;;  %v289_v11 = vld [vmem:[%s936_s20 + $0xa0] sm:$0xff]  ;;  %v296_v24 = vld [vmem:[%s936_s20 + $0xd8] sm:$0xff]  ;;  %v274_v25 = vld [vmem:[%s936_s20 + $0x28] sm:$0xff] }
  0x17   : > { %808 = vmatpush.msra.mxu2 %v415_v5  ;;  %809 = vmatpush.msra.mxu3 %v415_v5  ;;  %v358_v40 = vadd.f32 %v959_v17, %v322_v35  ;;  %v374_v44 = vmax.f32 %v342_v36, 0.0  ;;  %v382_v45 = vmax.f32 %v350_v38, 0.0  ;;  %v343_v51 = vadd.f32 %v959_v17, %v307_v41  ;;  %v297_v31 = vld [vmem:[%s936_s20 + $0xe0] sm:$0xff]  ;;  %v300_v36 = vld [vmem:[%s936_s20 + $0xf8] sm:$0xff] }
  0x18   : > { %427 = vmatpush.msra.mxu0 %v414_v6  ;;  %810 = vmatpush.msra.mxu1 %v414_v6  ;;  %v365_v50 = vadd.f32 %v959_v17, %v329_v47  ;;  %v351_v53 = vadd.f32 %v959_v17, %v315_v46  ;;  %v359_v56 = vadd.f32 %v959_v17, %v323_v49  ;;  %v291_v49 = vld [vmem:[%s936_s20 + $0xb0] sm:$0xff] }
  0x19   : > { %811 = vmatpush.msra.mxu2 %v414_v6  ;;  %812 = vmatpush.msra.mxu3 %v414_v6  ;;  %v390_v48 = vmax.f32 %v358_v40, 0.0  ;;  %v308_v57 = vmul.f32 %v944_v10, %v272_v52  ;;  %v375_v60 = vmax.f32 %v343_v51, 0.0  ;;  %v316_v62 = vmul.f32 %v944_v10, %v280_v55  ;;  %v273_v6 = vld [vmem:[%s936_s20 + $0x20] sm:$0xff] }
  0x1a   : > { %428 = vmatpush.msra.mxu0 %v413_v7  ;;  %813 = vmatpush.msra.mxu1 %v413_v7  ;;  %v397_v54 = vmax.f32 %v365_v50, 0.0  ;;  %v383_v61 = vmax.f32 %v351_v53, 0.0  ;;  %v330_v63 = vmul.f32 %v944_v10, %v294_v59  ;;  %v391_v0 = vmax.f32 %v359_v56, 0.0  ;;  %v298_v50 = vld [vmem:[%s936_s20 + $0xe8] sm:$0xff] }
  0x1b   : > { %814 = vmatpush.msra.mxu2 %v413_v7  ;;  %815 = vmatpush.msra.mxu3 %v413_v7  ;;  %v324_v1 = vmul.f32 %v944_v10, %v288_v58  ;;  %v344_v3 = vadd.f32 %v959_v17, %v308_v57  ;;  %v352_v4 = vadd.f32 %v959_v17, %v316_v62  ;;  %v281_v7 = vld [vmem:[%s936_s20 + $0x60] sm:$0xff]  ;;  %v284_v62 = vld [vmem:[%s936_s20 + $0x78] sm:$0xff] }
  0x1c   : > { %429 = vmatpush.msra.mxu0 %v412_v8  ;;  %816 = vmatpush.msra.mxu1 %v412_v8  ;;  %v366_v2 = vadd.f32 %v959_v17, %v330_v63  ;;  %v331_v16 = vmul.f32 %v944_v10, %v295_v12  ;;  %v332_v27 = vmul.f32 %v944_v10, %v296_v24 }
  0x1d   : > { %817 = vmatpush.msra.mxu2 %v412_v8  ;;  %818 = vmatpush.msra.mxu3 %v412_v8  ;;  %v360_v8 = vadd.f32 %v959_v17, %v324_v1  ;;  %v384_v14 = vmax.f32 %v352_v4, 0.0  ;;  %v310_v33 = vmul.f32 %v944_v10, %v274_v25  ;;  %v333_v40 = vmul.f32 %v944_v10, %v297_v31  ;;  %v292_v1 = vld [vmem:[%s936_s20 + $0xb8] sm:$0xff] }
  0x1e   : > { %430 = vmatpush.msra.mxu0 %v411_v9  ;;  %819 = vmatpush.msra.mxu1 %v411_v9  ;;  %v398_v5 = vmax.f32 %v366_v2, 0.0  ;;  %v367_v20 = vadd.f32 %v959_v17, %v331_v16  ;;  %v336_v41 = vmul.f32 %v944_v10, %v300_v36  ;;  %v327_v56 = vmul.f32 %v944_v10, %v291_v49  ;;  %v299_v2 = vld [vmem:[%s936_s20 + $0xf0] sm:$0xff] }
  0x1f   : > { %820 = vmatpush.msra.mxu2 %v411_v9  ;;  %821 = vmatpush.msra.mxu3 %v411_v9  ;;  %v376_v9 = vmax.f32 %v344_v3, 0.0  ;;  %v392_v18 = vmax.f32 %v360_v8, 0.0  ;;  %v346_v42 = vadd.f32 %v959_v17, %v310_v33  ;;  %v334_v58 = vmul.f32 %v944_v10, %v298_v50 }
  0x20   : > { %431 = vmatpush.msra.mxu0 %v410_v13  ;;  %822 = vmatpush.msra.mxu1 %v410_v13  ;;  %v399_v23 = vmax.f32 %v367_v20, 0.0  ;;  %v372_v46 = vadd.f32 %v959_v17, %v336_v41  ;;  %v363_v63 = vadd.f32 %v959_v17, %v327_v56  ;;  %v328_v8 = vmul.f32 %v944_v10, %v292_v1 }
  0x21   : > { %823 = vmatpush.msra.mxu2 %v410_v13  ;;  %824 = vmatpush.msra.mxu3 %v410_v13  ;;  %v309_v13 = vmul.f32 %v944_v10, %v273_v6  ;;  %v378_v51 = vmax.f32 %v346_v42, 0.0  ;;  %v320_v6 = vmul.f32 %v944_v10, %v284_v62 }
  0x22   : > { %432 = vmatpush.msra.mxu0 %v409_v15  ;;  %825 = vmatpush.msra.mxu1 %v409_v15 }
  0x23   : > { %826 = vmatpush.msra.mxu2 %v409_v15  ;;  %827 = vmatpush.msra.mxu3 %v409_v15  ;;  %v317_v15 = vmul.f32 %v944_v10, %v281_v7  ;;  %v395_v7 = vmax.f32 %v363_v63, 0.0 }
  0x24   : > { %433 = vmatpush.msra.mxu0 %v408_v19  ;;  %828 = vmatpush.msra.mxu1 %v408_v19 }
  0x25   : > { %829 = vmatpush.msra.mxu2 %v408_v19  ;;  %830 = vmatpush.msra.mxu3 %v408_v19  ;;  %v325_v19 = vmul.f32 %v944_v10, %v289_v11  ;;  %v353_v22 = vadd.f32 %v959_v17, %v317_v15  ;;  %v335_v11 = vmul.f32 %v944_v10, %v299_v2 }
  0x26   : > { %434 = vmatpush.msra.mxu0 %v407_v21  ;;  %831 = vmatpush.msra.mxu1 %v407_v21 }
  0x27   : > { %832 = vmatpush.msra.mxu2 %v407_v21  ;;  %833 = vmatpush.msra.mxu3 %v407_v21  ;;  %v345_v21 = vadd.f32 %v959_v17, %v309_v13  ;;  %v361_v28 = vadd.f32 %v959_v17, %v325_v19  ;;  %v356_v13 = vadd.f32 %v959_v17, %v320_v6 }
  0x28   : > { %435 = vmatpush.msra.mxu0 %v406_v26  ;;  %834 = vmatpush.msra.mxu1 %v406_v26  ;;  %v371_v15 = vadd.f32 %v959_v17, %v335_v11 }
  0x29   : > { %835 = vmatpush.msra.mxu2 %v406_v26  ;;  %836 = vmatpush.msra.mxu3 %v406_v26  ;;  %v282_v26 = vld [vmem:[%s936_s20 + $0x68] sm:$0xff]  ;;  %v393_v37 = vmax.f32 %v361_v28, 0.0 }
  0x2a   : > { %436 = vmatpush.msra.mxu0 %v405_v29  ;;  %837 = vmatpush.msra.mxu1 %v405_v29  ;;  %v318_v35 = vmul.f32 %v944_v10, %v282_v26  ;;  %v403_v20 = vmax.f32 %v371_v15, 0.0 }
  0x2b   : > { %437 = vmatmul.f32.vlgmr.msra.gmra.mxu0 %v373_v30  ;;  %461 = vmatmul.f32.vlgmr.msra.gmra.mxu1 %v381_v32  ;;  %v368_v30 = vadd.f32 %v959_v17, %v332_v27  ;;  %v377_v32 = vmax.f32 %v345_v21, 0.0 }
  0x2c   : > { %838 = vmatpush.msra.mxu2 %v405_v29  ;;  %839 = vmatpush.msra.mxu3 %v405_v29  ;;  %v290_v29 = vld [vmem:[%s936_s20 + $0xa8] sm:$0xff]  ;;  %v354_v43 = vadd.f32 %v959_v17, %v318_v35 }
  0x2d   : > { %485 = vmatmul.f32.vlgmr.msra.gmra.mxu2 %v389_v34  ;;  %509 = vmatmul.f32.vlgmr.msra.gmra.mxu3 %v397_v54  ;;  %v385_v34 = vmax.f32 %v353_v22, 0.0  ;;  %v326_v38 = vmul.f32 %v944_v10, %v290_v29  ;;  %v400_v39 = vmax.f32 %v368_v30, 0.0 }
  0x2e   : > { %v386_v53 = vmax.f32 %v354_v43, 0.0 }
  0x2f   : > { %v362_v47 = vadd.f32 %v959_v17, %v326_v38 }
  0x31   : > { %v394_v55 = vmax.f32 %v362_v47, 0.0 }
  0x33   : > { %440 = vmatmul.f32.gmra.mxu0 %v374_v44  ;;  %464 = vmatmul.f32.gmra.mxu1 %v382_v45  ;;  %v275_v44 = vld [vmem:[%s936_s20 + $0x30] sm:$0xff] }
  0x34   : > { %v283_v45 = vld [vmem:[%s936_s20 + $0x70] sm:$0xff]  ;;  %v311_v52 = vmul.f32 %v944_v10, %v275_v44 }
  0x35   : > { %488 = vmatmul.f32.gmra.mxu2 %v390_v48  ;;  %512 = vmatmul.f32.gmra.mxu3 %v398_v5  ;;  %v369_v48 = vadd.f32 %v959_v17, %v333_v40  ;;  %v319_v54 = vmul.f32 %v944_v10, %v283_v45 }
  0x36   : > { %v347_v59 = vadd.f32 %v959_v17, %v311_v52 }
  0x37   : > { %v401_v57 = vmax.f32 %v369_v48, 0.0 }
  0x38   : > { %v379_v3 = vmax.f32 %v347_v59, 0.0 }
  0x3b   : > { %443 = vmatmul.f32.gmra.mxu0 %v375_v60  ;;  %467 = vmatmul.f32.gmra.mxu1 %v383_v61  ;;  %v355_v60 = vadd.f32 %v959_v17, %v319_v54  ;;  %v276_v61 = vld [vmem:[%s936_s20 + $0x38] sm:$0xff]  ;;  %s1070_s20 = scalar_lea.vmem %s1227_s4, %s790_s13 }
  0x3c   : > { %v312_v4 = vmul.f32 %v944_v10, %v276_v61  ;;  %v404_v10 = vmax.f32 %v372_v46, 0.0 }
  0x3d   : > { %491 = vmatmul.f32.gmra.mxu2 %v391_v0  ;;  %515 = vmatmul.f32.gmra.mxu3 %v399_v23  ;;  %v370_v0 = vadd.f32 %v959_v17, %v334_v58  ;;  %v387_v5 = vmax.f32 %v355_v60, 0.0 }
  0x3e   : > { %v348_v12 = vadd.f32 %v959_v17, %v312_v4 }
  0x40   : > { %v380_v16 = vmax.f32 %v348_v12, 0.0 }
  0x43   : > { %446 = vmatmul.f32.gmra.mxu0 %v376_v9  ;;  %470 = vmatmul.f32.gmra.mxu1 %v384_v14  ;;  %v402_v9 = vmax.f32 %v370_v0, 0.0  ;;  %v364_v14 = vadd.f32 %v959_v17, %v328_v8 }
  0x45   : > { %494 = vmatmul.f32.gmra.mxu2 %v392_v18  ;;  %518 = vmatmul.f32.gmra.mxu3 %v400_v39  ;;  %v388_v18 = vmax.f32 %v356_v13, 0.0  ;;  %v396_v19 = vmax.f32 %v364_v14, 0.0 }
  0x4b   : > { %449 = vmatmul.f32.gmra.mxu0 %v377_v32  ;;  %473 = vmatmul.f32.gmra.mxu1 %v385_v34 }
  0x4d   : > { %497 = vmatmul.f32.gmra.mxu2 %v393_v37  ;;  %521 = vmatmul.f32.gmra.mxu3 %v401_v57 }
  0x53   : > { %452 = vmatmul.f32.gmra.mxu0 %v378_v51  ;;  %476 = vmatmul.f32.gmra.mxu1 %v386_v53 }
  0x55   : > { %500 = vmatmul.f32.gmra.mxu2 %v394_v55  ;;  %524 = vmatmul.f32.gmra.mxu3 %v402_v9 }
  0x5b   : > { %455 = vmatmul.f32.gmra.mxu0 %v379_v3  ;;  %479 = vmatmul.f32.gmra.mxu1 %v387_v5 }
  0x5d   : > { %503 = vmatmul.f32.gmra.mxu2 %v395_v7  ;;  %527 = vmatmul.f32.gmra.mxu3 %v403_v20 }
  0x63   : > { %458 = vmatmul.f32.gmra.mxu0 %v380_v16  ;;  %482 = vmatmul.f32.gmra.mxu1 %v388_v18 }
  0x65   : > { %506 = vmatmul.f32.gmra.mxu2 %v396_v19  ;;  %530 = vmatmul.f32.gmra.mxu3 %v404_v10 }
  0xa8   : > { %v438_v17 = vpop.f32.mrf.mxu0  ;;  %v1072_v21 = vpop.f32.mrf.mxu1 }
  0xa9   : > { %534 = vst [vmem:[%s1070_s20] sm:$0xff] %v438_v17  ;;  %v604_v42 = vmul.f32 %v438_v17, %v438_v17  ;;  %v612_v6 = vmul.f32 %v1072_v21, %v1072_v21 }
  0xaa   : > { %542 = vst [vmem:[%s1070_s20 + $0x40] sm:$0xff] %v1072_v21 }
  0xb0   : > { %v441_v22 = vpop.f32.mrf.mxu0  ;;  %v1077_v23 = vpop.f32.mrf.mxu1 }
  0xb1   : > { %535 = vst [vmem:[%s1070_s20 + $0x8] sm:$0xff] %v441_v22  ;;  %v1080_v24 = vpop.f32.mrf.mxu2  ;;  %v1091_v28 = vpop.f32.mrf.mxu3  ;;  %v605_v41 = vmul.f32 %v441_v22, %v441_v22  ;;  %v566_v43 = vadd.f32 %v441_v22, %v438_v17  ;;  %v613_v9 = vmul.f32 %v1077_v23, %v1077_v23 }
  0xb2   : > { %543 = vst [vmem:[%s1070_s20 + $0x48] sm:$0xff] %v1077_v23 }
  0xb3   : > { %550 = vst [vmem:[%s1070_s20 + $0x80] sm:$0xff] %v1080_v24  ;;  %v636_v45 = vadd.f32 %v605_v41, %v604_v42 }
  0xb4   : > { %558 = vst [vmem:[%s1070_s20 + $0xc0] sm:$0xff] %v1091_v28 }
  0xb8   : > { %v444_v25 = vpop.f32.mrf.mxu0  ;;  %v1086_v26 = vpop.f32.mrf.mxu1 }
  0xb9   : > { %536 = vst [vmem:[%s1070_s20 + $0x10] sm:$0xff] %v444_v25  ;;  %v1089_v27 = vpop.f32.mrf.mxu2  ;;  %v1104_v32 = vpop.f32.mrf.mxu3  ;;  %v606_v44 = vmul.f32 %v444_v25, %v444_v25  ;;  %v567_v46 = vadd.f32 %v566_v43, %v444_v25  ;;  %v614_v13 = vmul.f32 %v1086_v26, %v1086_v26 }
  0xba   : > { %544 = vst [vmem:[%s1070_s20 + $0x50] sm:$0xff] %v1086_v26 }
  0xbb   : > { %551 = vst [vmem:[%s1070_s20 + $0x88] sm:$0xff] %v1089_v27  ;;  %v637_v50 = vadd.f32 %v636_v45, %v606_v44  ;;  %v620_v44 = vmul.f32 %v1080_v24, %v1080_v24 }
  0xbc   : > { %559 = vst [vmem:[%s1070_s20 + $0xc8] sm:$0xff] %v1104_v32 }
  0xc0   : > { %v447_v29 = vpop.f32.mrf.mxu0  ;;  %v1099_v30 = vpop.f32.mrf.mxu1 }
  0xc1   : > { %537 = vst [vmem:[%s1070_s20 + $0x18] sm:$0xff] %v447_v29  ;;  %v1102_v31 = vpop.f32.mrf.mxu2  ;;  %v1117_v36 = vpop.f32.mrf.mxu3  ;;  %v607_v47 = vmul.f32 %v447_v29, %v447_v29  ;;  %v568_v51 = vadd.f32 %v567_v46, %v447_v29  ;;  %v615_v16 = vmul.f32 %v1099_v30, %v1099_v30  ;;  %v621_v46 = vmul.f32 %v1089_v27, %v1089_v27 }
  0xc2   : > { %545 = vst [vmem:[%s1070_s20 + $0x58] sm:$0xff] %v1099_v30 }
  0xc3   : > { %552 = vst [vmem:[%s1070_s20 + $0x90] sm:$0xff] %v1102_v31  ;;  %v638_v55 = vadd.f32 %v637_v50, %v607_v47 }
  0xc4   : > { %560 = vst [vmem:[%s1070_s20 + $0xd0] sm:$0xff] %v1117_v36 }
  0xc8   : > { %v450_v33 = vpop.f32.mrf.mxu0  ;;  %v1112_v34 = vpop.f32.mrf.mxu1 }
  0xc9   : > { %538 = vst [vmem:[%s1070_s20 + $0x20] sm:$0xff] %v450_v33  ;;  %v1115_v35 = vpop.f32.mrf.mxu2  ;;  %v1130_v40 = vpop.f32.mrf.mxu3  ;;  %v608_v52 = vmul.f32 %v450_v33, %v450_v33  ;;  %v569_v56 = vadd.f32 %v568_v51, %v450_v33  ;;  %v616_v17 = vmul.f32 %v1112_v34, %v1112_v34 }
  0xca   : > { %546 = vst [vmem:[%s1070_s20 + $0x60] sm:$0xff] %v1112_v34  ;;  %v623_v51 = vmul.f32 %v1115_v35, %v1115_v35 }
  0xcb   : > { %553 = vst [vmem:[%s1070_s20 + $0x98] sm:$0xff] %v1115_v35  ;;  %v639_v58 = vadd.f32 %v638_v55, %v608_v52 }
  0xcc   : > { %561 = vst [vmem:[%s1070_s20 + $0xd8] sm:$0xff] %v1130_v40 }
  0xd0   : > { %v453_v37 = vpop.f32.mrf.mxu0  ;;  %v1125_v38 = vpop.f32.mrf.mxu1 }
  0xd1   : > { %539 = vst [vmem:[%s1070_s20 + $0x28] sm:$0xff] %v453_v37  ;;  %v1128_v39 = vpop.f32.mrf.mxu2  ;;  %v1141_v54 = vpop.f32.mrf.mxu3  ;;  %v609_v57 = vmul.f32 %v453_v37, %v453_v37  ;;  %v570_v59 = vadd.f32 %v569_v56, %v453_v37  ;;  %v617_v25 = vmul.f32 %v1125_v38, %v1125_v38 }
  0xd2   : > { %547 = vst [vmem:[%s1070_s20 + $0x68] sm:$0xff] %v1125_v38 }
  0xd3   : > { %554 = vst [vmem:[%s1070_s20 + $0xa0] sm:$0xff] %v1128_v39  ;;  %v640_v61 = vadd.f32 %v639_v58, %v609_v57 }
  0xd4   : > { %562 = vst [vmem:[%s1070_s20 + $0xe0] sm:$0xff] %v1141_v54 }
  0xd8   : > { %v456_v48 = vpop.f32.mrf.mxu0  ;;  %v480_v49 = vpop.f32.mrf.mxu1 }
  0xd9   : > { %540 = vst [vmem:[%s1070_s20 + $0x30] sm:$0xff] %v456_v48  ;;  %v1139_v53 = vpop.f32.mrf.mxu2  ;;  %v610_v60 = vmul.f32 %v456_v48, %v456_v48  ;;  %v571_v62 = vadd.f32 %v570_v59, %v456_v48  ;;  %v1149_v5 = vpop.f32.mrf.mxu3  ;;  %v622_v48 = vmul.f32 %v1102_v31, %v1102_v31 }
  0xda   : > { %548 = vst [vmem:[%s1070_s20 + $0x70] sm:$0xff] %v480_v49  ;;  %v625_v58 = vmul.f32 %v1139_v53, %v1139_v53 }
  0xdb   : > { %555 = vst [vmem:[%s1070_s20 + $0xa8] sm:$0xff] %v1139_v53  ;;  %v641_v1 = vadd.f32 %v640_v61, %v610_v60 }
  0xdc   : > { %563 = vst [vmem:[%s1070_s20 + $0xe8] sm:$0xff] %v1149_v5 }
  0xe0   : > { %v459_v63 = vpop.f32.mrf.mxu0  ;;  %v483_v0 = vpop.f32.mrf.mxu1 }
  0xe1   : > { %541 = vst [vmem:[%s1070_s20 + $0x38] sm:$0xff] %v459_v63  ;;  %v572_v2 = vadd.f32 %v571_v62, %v459_v63  ;;  %v611_v3 = vmul.f32 %v459_v63, %v459_v63  ;;  %v504_v4 = vpop.f32.mrf.mxu2  ;;  %v528_v10 = vpop.f32.mrf.mxu3  ;;  %v619_v37 = vmul.f32 %v483_v0, %v483_v0 }
  0xe2   : > { %549 = vst [vmem:[%s1070_s20 + $0x78] sm:$0xff] %v483_v0  ;;  %v626_v61 = vmul.f32 %v504_v4, %v504_v4 }
  0xe3   : > { %v573_v7 = vadd.f32 %v572_v2, %v1072_v21  ;;  %v642_v8 = vadd.f32 %v641_v1, %v611_v3  ;;  %556 = vst [vmem:[%s1070_s20 + $0xb0] sm:$0xff] %v504_v4 }
  0xe4   : > { %564 = vst [vmem:[%s1070_s20 + $0xf0] sm:$0xff] %v528_v10 }
  0xe5   : > { %v574_v11 = vadd.f32 %v573_v7, %v1077_v23  ;;  %v643_v12 = vadd.f32 %v642_v8, %v612_v6  ;;  %v631_v8 = vmul.f32 %v1130_v40, %v1130_v40 }
  0xe7   : > { %v575_v14 = vadd.f32 %v574_v11, %v1086_v26  ;;  %v644_v15 = vadd.f32 %v643_v12, %v613_v9 }
  0xe9   : > { %v645_v18 = vadd.f32 %v644_v15, %v614_v13  ;;  %v576_v19 = vadd.f32 %v575_v14, %v1099_v30  ;;  %v507_v20 = vpop.f32.mrf.mxu2  ;;  %v618_v30 = vmul.f32 %v480_v49, %v480_v49  ;;  %v531_v43 = vpop.f32.mrf.mxu3  ;;  %v633_v14 = vmul.f32 %v1149_v5, %v1149_v5 }
  0xea   : > { %557 = vst [vmem:[%s1070_s20 + $0xb8] sm:$0xff] %v507_v20  ;;  %v627_v62 = vmul.f32 %v507_v20, %v507_v20 }
  0xeb   : > { %v577_v21 = vadd.f32 %v576_v19, %v1112_v34  ;;  %v646_v22 = vadd.f32 %v645_v18, %v615_v16  ;;  %565 = vst [vmem:[%s1070_s20 + $0xf8] sm:$0xff] %v531_v43  ;;  %v634_v18 = vmul.f32 %v528_v10, %v528_v10  ;;  %v635_v19 = vmul.f32 %v531_v43, %v531_v43 }
  0xed   : > { %v578_v23 = vadd.f32 %v577_v21, %v1125_v38  ;;  %v647_v26 = vadd.f32 %v646_v22, %v616_v17 }
  0xef   : > { %v648_v29 = vadd.f32 %v647_v26, %v617_v25  ;;  %v579_v33 = vadd.f32 %v578_v23, %v480_v49 }
  0xf1   : > { %v649_v41 = vadd.f32 %v648_v29, %v618_v30  ;;  %v580_v42 = vadd.f32 %v579_v33, %v483_v0 }
  0xf3   : > { %v581_v34 = vadd.f32 %v580_v42, %v1080_v24  ;;  %v650_v45 = vadd.f32 %v649_v41, %v619_v37  ;;  %v624_v24 = vmul.f32 %v1128_v39, %v1128_v39 }
  0xf5   : > { %v582_v38 = vadd.f32 %v581_v34, %v1089_v27  ;;  %v651_v47 = vadd.f32 %v650_v45, %v620_v44 }
  0xf7   : > { %v583_v49 = vadd.f32 %v582_v38, %v1102_v31  ;;  %v652_v50 = vadd.f32 %v651_v47, %v621_v46 }
  0xf9   : > { %v653_v52 = vadd.f32 %v652_v50, %v622_v48  ;;  %v584_v55 = vadd.f32 %v583_v49, %v1115_v35  ;;  %v628_v35 = vmul.f32 %v1091_v28, %v1091_v28 }
  0xfb   : > { %v585_v56 = vadd.f32 %v584_v55, %v1128_v39  ;;  %v654_v57 = vadd.f32 %v653_v52, %v623_v51  ;;  %v629_v39 = vmul.f32 %v1104_v32, %v1104_v32 }
  0xfd   : > { %v586_v27 = vadd.f32 %v585_v56, %v1139_v53  ;;  %v655_v59 = vadd.f32 %v654_v57, %v624_v24  ;;  %v630_v53 = vmul.f32 %v1117_v36, %v1117_v36 }
  0xff   : > { %v656_v31 = vadd.f32 %v655_v59, %v625_v58  ;;  %v587_v60 = vadd.f32 %v586_v27, %v504_v4 }
 0x101   : > { %v657_v63 = vadd.f32 %v656_v31, %v626_v61  ;;  %v588_v0 = vadd.f32 %v587_v60, %v507_v20 }
 0x103   : > { %v589_v1 = vadd.f32 %v588_v0, %v1091_v28  ;;  %v658_v2 = vadd.f32 %v657_v63, %v627_v62  ;;  %v632_v28 = vmul.f32 %v1141_v54, %v1141_v54 }
 0x105   : > { %v590_v3 = vadd.f32 %v589_v1, %v1104_v32  ;;  %v659_v6 = vadd.f32 %v658_v2, %v628_v35 }
 0x107   : > { %v591_v4 = vadd.f32 %v590_v3, %v1117_v36  ;;  %v660_v7 = vadd.f32 %v659_v6, %v629_v39 }
 0x109   : > { %v661_v9 = vadd.f32 %v660_v7, %v630_v53  ;;  %v592_v11 = vadd.f32 %v591_v4, %v1130_v40 }
 0x10b   : > { %v593_v12 = vadd.f32 %v592_v11, %v1141_v54  ;;  %v662_v13 = vadd.f32 %v661_v9, %v631_v8 }
 0x10d   : > { %v594_v32 = vadd.f32 %v593_v12, %v1149_v5  ;;  %v663_v15 = vadd.f32 %v662_v13, %v632_v28 }
 0x10f   : > { %v664_v36 = vadd.f32 %v663_v15, %v633_v14  ;;  %v595_v16 = vadd.f32 %v594_v32, %v528_v10 }
 0x111   : > { %v665_v20 = vadd.f32 %v664_v36, %v634_v18  ;;  %v596_v40 = vadd.f32 %v595_v16, %v531_v43 }
 0x113   : > { %v597_v17 = vrot.slane %v596_v40, 4  ;;  %v666_v21 = vadd.f32 %v665_v20, %v635_v19 }
 0x115   : > { %v598_v22 = vadd.f32 %v597_v17, %v596_v40  ;;  %v667_v23 = vrot.slane %v666_v21, 4 }
 0x117   : > { %v599_v54 = vrot.slane %v598_v22, 2  ;;  %v668_v25 = vadd.f32 %v667_v23, %v666_v21 }
 0x119   : > { %v600_v26 = vadd.f32 %v599_v54, %v598_v22  ;;  %v669_v29 = vrot.slane %v668_v25, 2 }
 0x11b   : > { %v601_v33 = vrot.slane %v600_v26, 1  ;;  %v670_v30 = vadd.f32 %v669_v29, %v668_v25 }
 0x11d   : > { %v602_v5 = vadd.f32 %v601_v33, %v600_v26  ;;  %v671_v10 = vrot.slane %v670_v30, 1 }
 0x11f   : > { %603 = vst [vmem:[%s265_s24] sm:$0x1] %v602_v5  ;;  %v672_v37 = vadd.f32 %v671_v10, %v670_v30 }
 0x121   : > { %673 = vst [vmem:[%s268_s27] sm:$0x1] %v672_v37 }
 0x122 PF: > { %s17_s21 = sadd.s32 1, %s856_s21  }
 0x123   : > { %p14_p4 = scmp.ge.s32.totalorder %s17_s21, 4  }
 0x125   :  { %16 = sbr.rel (!%p14_p4) target bundleno = 1 (0x1), region = 90 }

// kernel: res_block_forward.3
= control target key start
LH: loop header
LB: loop body
LE: loop exit
PB: predicated region body
PF: predicated region fallthrough
CT: control target
= control target key end

     0   :  { %s2498_s15 = smov 0   ;;  %s4010_s0 = inlined_call_operand.vmem [shape: f32[2,18,18,128], index: 0, kind: input, shape index: {}]   ;;  %s4011_s1 = inlined_call_operand.vmem [shape: f32[9,128,128], index: 1, kind: input, shape index: {}]   ;;  %s4012_s2 = inlined_call_operand.vmem [shape: f32[2,256,128], index: 2, kind: output, shape index: {0}]   ;;  %s4013_s3 = inlined_call_operand.vmem [shape: f32[2,1,128], index: 3, kind: output, shape index: {1}]   ;;  %s4014_s4 = inlined_call_operand.vmem [shape: f32[2,1,128], index: 4, kind: output, shape index: {2}]  }
   0x1 LB: > { %s2269_s16 = sadd.s32 4294967295, %s2471_s15   ;;  %p2273_p0 = scmp.ge.s32.totalorder %s2471_s15, 1  ;;  %s2471_s15 = sphi %s2498_s15, %s15_s15  }
   0x2   : > { %p167_p1 = scmp.lt.s32.totalorder %s2471_s15, 3 }
   0x4   : > { %p168_p2 = pnand %p2273_p0, %p167_p1 }
   0x6   : > { %171 = sbr.rel (%p168_p2) target bundleno = 766 (0x2fe), region = 28 }
   0xb   : > { %v2292_v0 = vld [vmem:[%s4011_s1 + $0xf8] sm:$0xff]  ;;  %v2291_v1 = vld [vmem:[%s4011_s1 + $0xf0] sm:$0xff]  ;;  %v2290_v2 = vld [vmem:[%s4011_s1 + $0xe8] sm:$0xff]  ;;  %p199_p3 = scmp.lt.s32.totalorder %s2269_s16, 1  ;;  %vm387_vm0 = vcmask 1046528   ;;  %vm743_vm1 = vcmask 1045504  }
   0xc   : > { %2408 = vmatpush.msra.mxu1 %v2292_v0  ;;  %2409 = vmatpush.msra.mxu2 %v2292_v0  ;;  %v2289_v3 = vld [vmem:[%s4011_s1 + $0xe0] sm:$0xff]  ;;  %v2288_v4 = vld [vmem:[%s4011_s1 + $0xd8] sm:$0xff]  ;;  %v2287_v5 = vld [vmem:[%s4011_s1 + $0xd0] sm:$0xff] }
   0xd   : > { %2410 = vmatpush.msra.mxu3 %v2292_v0  ;;  %517 = vmatpush.msra.mxu0 %v2292_v0  ;;  %s4340_s16 = smov (!%p199_p3, %s2269_s16), 1  ;;  %v2286_v6 = vld [vmem:[%s4011_s1 + $0xc8] sm:$0xff]  ;;  %v2285_v7 = vld [vmem:[%s4011_s1 + $0xc0] sm:$0xff]  ;;  %v2284_v8 = vld [vmem:[%s4011_s1 + $0xb8] sm:$0xff] }
   0xe   : > { %2411 = vmatpush.msra.mxu1 %v2291_v1  ;;  %2412 = vmatpush.msra.mxu2 %v2291_v1  ;;  %s2456_s5 = smul.u32 432, %s4340_s16  ;;  %v2283_v9 = vld [vmem:[%s4011_s1 + $0xb0] sm:$0xff]  ;;  %v2282_v10 = vld [vmem:[%s4011_s1 + $0xa8] sm:$0xff]  ;;  %v2281_v15 = vld [vmem:[%s4011_s1 + $0xa0] sm:$0xff]  ;;  %s2407_s6 = sshll.u32 %s4340_s16, 8 }
   0xf   : > { %2413 = vmatpush.msra.mxu3 %v2291_v1  ;;  %518 = vmatpush.msra.mxu0 %v2291_v1  ;;  %v2280_v22 = vld [vmem:[%s4011_s1 + $0x98] sm:$0xff]  ;;  %v2279_v25 = vld [vmem:[%s4011_s1 + $0x90] sm:$0xff]  ;;  %v2278_v33 = vld [vmem:[%s4011_s1 + $0x88] sm:$0xff]  ;;  %s3871_s9 = scalar_lea.vmem %s4012_s2, %s2407_s6  ;;  %s211_s11 = scalar_lea.vmem %s4013_s3, %s4340_s16 }
  0x10   : > { %2414 = vmatpush.msra.mxu1 %v2290_v2  ;;  %2415 = vmatpush.msra.mxu2 %v2290_v2  ;;  %s2539_s12 = scalar_lea.vmem %s4010_s0, %s2456_s5  ;;  %v2277_v39 = vld [vmem:[%s4011_s1 + $0x80] sm:$0xff]  ;;  %v2308_v45 = vld [vmem:[%s4011_s1 + $0x178] sm:$0xff]  ;;  %v2307_v52 = vld [vmem:[%s4011_s1 + $0x170] sm:$0xff]  ;;  %s214_s17 = scalar_lea.vmem %s4014_s4, %s4340_s16 }
  0x11   : > { %2416 = vmatpush.msra.mxu3 %v2290_v2  ;;  %519 = vmatpush.msra.mxu0 %v2290_v2  ;;  %v227_v11 = vld [vmem:[%s2539_s12 + $0x60] sm:$0xff]  ;;  %v228_v12 = vld [vmem:[%s2539_s12 + $0x68] sm:$0xff]  ;;  %v2581_v32 = vld [vmem:[%s2539_s12 + $0x70] sm:$0x3] }
  0x12   : > { %2417 = vmatpush.msra.mxu1 %v2289_v3  ;;  %2418 = vmatpush.msra.mxu2 %v2289_v3  ;;  %v239_v13 = vld [vmem:[%s2539_s12 + $0xc0] sm:$0xff]  ;;  %v240_v14 = vld [vmem:[%s2539_s12 + $0xc8] sm:$0xff]  ;;  %v2556_v18 = vmax.f32 %v227_v11, 0.0  ;;  %v2558_v19 = vmax.f32 %v228_v12, 0.0  ;;  %v2587_v34 = vld [vmem:[%s2539_s12 + $0xd0] sm:$0x3] }
  0x13   : > { %2419 = vmatpush.msra.mxu3 %v2289_v3  ;;  %520 = vmatpush.msra.mxu0 %v2289_v3  ;;  %v251_v16 = vld [vmem:[%s2539_s12 + $0x120] sm:$0xff]  ;;  %v252_v17 = vld [vmem:[%s2539_s12 + $0x128] sm:$0xff]  ;;  %v2560_v20 = vmax.f32 %v239_v13, 0.0  ;;  %v2562_v21 = vmax.f32 %v240_v14, 0.0  ;;  %v4020_v40 = vmax.f32 %v2581_v32, 0.0  ;;  %v4018_v44 = vmax.f32 %v2587_v34, 0.0 }
  0x14   : > { %2420 = vmatpush.msra.mxu1 %v2288_v4  ;;  %2421 = vmatpush.msra.mxu2 %v2288_v4  ;;  %v2567_v23 = vmax.f32 %v251_v16, 0.0  ;;  %v2569_v24 = vmax.f32 %v252_v17, 0.0  ;;  %v215_v26 = vld [vmem:[%s2539_s12] sm:$0xff]  ;;  %v216_v27 = vld [vmem:[%s2539_s12 + $0x8] sm:$0xff]  ;;  %v408_v28 = vrot.slane %v2556_v18, 1  ;;  %v409_v29 = vrot.slane %v2558_v19, 1 }
  0x15   : > { %2422 = vmatpush.msra.mxu3 %v2288_v4  ;;  %521 = vmatpush.msra.mxu0 %v2288_v4  ;;  %4131 = vst [vmem:[#allocation2_spill] sm:$0xff] %v2560_v20  ;;  %v428_v30 = vrot.slane %v2560_v20, 1  ;;  %v429_v31 = vrot.slane %v2562_v21, 1  ;;  %v2591_v37 = vmax.f32 %v215_v26, 0.0  ;;  %v2593_v38 = vmax.f32 %v216_v27, 0.0  ;;  %v2324_v47 = vld [vmem:[%s4011_s1 + $0x1f8] sm:$0xff] }
  0x16   : > { %2423 = vmatpush.msra.mxu1 %v2287_v5  ;;  %2424 = vmatpush.msra.mxu2 %v2287_v5  ;;  %4132 = vst [vmem:[#allocation3_spill] sm:$0xff] %v2567_v23  ;;  %v448_v35 = vrot.slane %v2567_v23, 1  ;;  %v449_v36 = vrot.slane %v2569_v24, 1  ;;  %v2600_v41 = vld [vmem:[%s2539_s12 + $0x130] sm:$0x3]  ;;  %v2603_v42 = vsel %vm387_vm0, %v408_v28, %v409_v29  ;;  %v338_v48 = vld [vmem:[%s4011_s1 + $0x78] sm:$0xff] }
  0x17   : > { %2425 = vmatpush.msra.mxu3 %v2287_v5  ;;  %522 = vmatpush.msra.mxu0 %v2287_v5  ;;  %4133 = vst [vmem:[#allocation4_spill] sm:$0xff] %v2569_v24  ;;  %v2608_v43 = vsel %vm387_vm0, %v428_v30, %v429_v31  ;;  %v388_v49 = vrot.slane %v2591_v37, 1  ;;  %v389_v50 = vrot.slane %v2593_v38, 1  ;;  %v4016_v51 = vmax.f32 %v2600_v41, 0.0  ;;  %v2323_v53 = vld [vmem:[%s4011_s1 + $0x1f0] sm:$0xff]  ;;  %v2306_v58 = vld [vmem:[%s4011_s1 + $0x168] sm:$0xff] }
  0x18   : > { %2426 = vmatpush.msra.mxu1 %v2286_v6  ;;  %2427 = vmatpush.msra.mxu2 %v2286_v6  ;;  %4134 = vst [vmem:[#allocation5_spill] sm:$0xff] %v2600_v41  ;;  %v2617_v46 = vsel %vm387_vm0, %v448_v35, %v449_v36  ;;  %v411_v54 = vrot.slane %v4020_v40, 1  ;;  %v2639_v55 = vld [vmem:[%s2539_s12 + $0x10] sm:$0x3]  ;;  %v431_v56 = vrot.slane %v4018_v44, 1  ;;  %v230_v59 = vld [vmem:[%s2539_s12 + $0x78] sm:$0xff] }
  0x19   : > { %2428 = vmatpush.msra.mxu3 %v2286_v6  ;;  %523 = vmatpush.msra.mxu0 %v2286_v6  ;;  %4135 = vst [vmem:[#allocation6_spill] sm:$0xff] %v2608_v43  ;;  %v337_v57 = vld [vmem:[%s4011_s1 + $0x70] sm:$0xff]  ;;  %v231_v60 = vld [vmem:[%s2539_s12 + $0x80] sm:$0xff]  ;;  %v242_v61 = vld [vmem:[%s2539_s12 + $0xd8] sm:$0xff]  ;;  %v390_v63 = vsel %vm387_vm0, %v388_v49, %v389_v50  ;;  %v451_v0 = vrot.slane %v4016_v51, 1  ;;  %v4022_v2 = vmax.f32 %v2639_v55, 0.0 }
  0x1a   : > { %2429 = vmatpush.msra.mxu1 %v2285_v7  ;;  %2430 = vmatpush.msra.mxu2 %v2285_v7  ;;  %4136 = vst [vmem:[#allocation7_spill] sm:$0xff] %v2617_v46  ;;  %v243_v62 = vld [vmem:[%s2539_s12 + $0xe0] sm:$0xff]  ;;  %v336_v1 = vld [vmem:[%s4011_s1 + $0x68] sm:$0xff]  ;;  %v254_v3 = vld [vmem:[%s2539_s12 + $0x138] sm:$0xff]  ;;  %v2665_v4 = vsel %vm387_vm0, %v409_v29, %v411_v54  ;;  %v2683_v11 = vmax.f32 %v242_v61, 0.0 }
  0x1b   : > { %2431 = vmatpush.msra.mxu3 %v2285_v7  ;;  %524 = vmatpush.msra.mxu0 %v2285_v7  ;;  %4137 = vst [vmem:[#allocation8_spill] sm:$0xff] %v2665_v4  ;;  %v2322_v5 = vld [vmem:[%s4011_s1 + $0x1e8] sm:$0xff]  ;;  %v2340_v6 = vld [vmem:[%s4011_s1 + $0x278] sm:$0xff]  ;;  %v2673_v7 = vmax.f32 %v230_v59, 0.0  ;;  %v2685_v12 = vmax.f32 %v243_v62, 0.0  ;;  %v2305_v13 = vld [vmem:[%s4011_s1 + $0x160] sm:$0xff]  ;;  %v2698_v16 = vsel %vm387_vm0, %v449_v36, %v451_v0 }
  0x1c   : > { %2432 = vmatpush.msra.mxu1 %v2284_v8  ;;  %2433 = vmatpush.msra.mxu2 %v2284_v8  ;;  %v2321_v14 = vld [vmem:[%s4011_s1 + $0x1e0] sm:$0xff]  ;;  %4142 = vst [vmem:[#allocation13_spill] sm:$0xff] %v2698_v16  ;;  %v2339_v17 = vld [vmem:[%s4011_s1 + $0x270] sm:$0xff]  ;;  %v2304_v28 = vld [vmem:[%s4011_s1 + $0x158] sm:$0xff] }
  0x1d   : > { %2434 = vmatpush.msra.mxu3 %v2284_v8  ;;  %525 = vmatpush.msra.mxu0 %v2284_v8  ;;  %4138 = vst [vmem:[#allocation9_spill] sm:$0xff] %v2673_v7  ;;  %v255_v8 = vld [vmem:[%s2539_s12 + $0x140] sm:$0xff]  ;;  %v413_v27 = vrot.slane %v2673_v7, 1  ;;  %v218_v29 = vld [vmem:[%s2539_s12 + $0x18] sm:$0xff]  ;;  %v434_v35 = vrot.slane %v2685_v12, 1 }
  0x1e   : > { %2435 = vmatpush.msra.mxu1 %v2283_v9  ;;  %2436 = vmatpush.msra.mxu2 %v2283_v9  ;;  %v2708_v26 = vmax.f32 %v255_v8, 0.0  ;;  %v219_v30 = vld [vmem:[%s2539_s12 + $0x20] sm:$0xff]  ;;  %v2320_v36 = vld [vmem:[%s4011_s1 + $0x1d8] sm:$0xff]  ;;  %v2736_v49 = vld [vmem:[%s2539_s12 + $0x88] sm:$0x3] }
  0x1f   : > { %2437 = vmatpush.msra.mxu3 %v2283_v9  ;;  %526 = vmatpush.msra.mxu0 %v2283_v9  ;;  %v2679_v9 = vsel %vm387_vm0, %v429_v31, %v431_v56  ;;  %v2319_v56 = vld [vmem:[%s4011_s1 + $0x1d0] sm:$0xff]  ;;  %v2337_v59 = vld [vmem:[%s4011_s1 + $0x260] sm:$0xff]  ;;  %v2332_v44 = vld [vmem:[%s4011_s1 + $0x238] sm:$0xff] }
  0x20   : > { %2438 = vmatpush.msra.mxu1 %v2282_v10  ;;  %2439 = vmatpush.msra.mxu2 %v2282_v10  ;;  %4139 = vst [vmem:[#allocation10_spill] sm:$0xff] %v2679_v9  ;;  %v454_v54 = vrot.slane %v2708_v26, 1  ;;  %v2898_v51 = vld [vmem:[%s2539_s12 + $0x100] sm:$0x3] }
  0x21   : > { %2440 = vmatpush.msra.mxu3 %v2282_v10  ;;  %527 = vmatpush.msra.mxu0 %v2282_v10  ;;  %v2681_v10 = vmax.f32 %v231_v60, 0.0  ;;  %4143 = vst [vmem:[#allocation14_spill] sm:$0xff] %v2708_v26  ;;  %v2759_v60 = vld [vmem:[%s2539_s12 + $0x148] sm:$0x3]  ;;  %v325_v26 = vld [vmem:[%s4011_s1 + $0x10] sm:$0xff] }
  0x22   : > { %2441 = vmatpush.msra.mxu1 %v2281_v15  ;;  %2442 = vmatpush.msra.mxu2 %v2281_v15  ;;  %4144 = vst [vmem:[#allocation15_spill] sm:$0xff] %v2759_v60 }
  0x23   : > { %2443 = vmatpush.msra.mxu3 %v2281_v15  ;;  %528 = vmatpush.msra.mxu0 %v2281_v15  ;;  %4140 = vst [vmem:[#allocation11_spill] sm:$0xff] %v2681_v10  ;;  %v2693_v15 = vmax.f32 %v254_v3, 0.0  ;;  %v414_v31 = vrot.slane %v2681_v10, 1  ;;  %v2318_v3 = vld [vmem:[%s4011_s1 + $0x1c8] sm:$0xff] }
  0x24   : > { %2444 = vmatpush.msra.mxu1 %v2280_v22  ;;  %2445 = vmatpush.msra.mxu2 %v2280_v22  ;;  %4154 = vst [vmem:[#allocation25_spill] sm:$0xff] %v2898_v51 }
  0x25   : > { %2446 = vmatpush.msra.mxu3 %v2280_v22  ;;  %529 = vmatpush.msra.mxu0 %v2280_v22  ;;  %4141 = vst [vmem:[#allocation12_spill] sm:$0xff] %v2693_v15  ;;  %v335_v22 = vld [vmem:[%s4011_s1 + $0x60] sm:$0xff]  ;;  %v2764_v61 = vsel %vm387_vm0, %v413_v27, %v414_v31  ;;  %v2335_v27 = vld [vmem:[%s4011_s1 + $0x250] sm:$0xff] }
  0x26   : > { %2447 = vmatpush.msra.mxu1 %v2279_v25  ;;  %2448 = vmatpush.msra.mxu2 %v2279_v25  ;;  %4145 = vst [vmem:[#allocation16_spill] sm:$0xff] %v2764_v61 }
  0x27   : > { %2449 = vmatpush.msra.mxu3 %v2279_v25  ;;  %530 = vmatpush.msra.mxu0 %v2279_v25  ;;  %v391_v25 = vrot.slane %v4022_v2, 1 }
  0x28   : > { %2450 = vmatpush.msra.mxu1 %v2278_v33  ;;  %2451 = vmatpush.msra.mxu2 %v2278_v33 }
  0x29   : > { %2452 = vmatpush.msra.mxu3 %v2278_v33  ;;  %531 = vmatpush.msra.mxu0 %v2278_v33  ;;  %v433_v33 = vrot.slane %v2683_v11, 1 }
  0x2a   : > { %2453 = vmatpush.msra.mxu1 %v2277_v39  ;;  %2454 = vmatpush.msra.mxu2 %v2277_v39 }
  0x2b   : > { %557 = vmatmul.f32.vlgmr.msra.gmra.mxu1 %v2603_v42  ;;  %581 = vmatmul.f32.vlgmr.msra.gmra.mxu2 %v2608_v43  ;;  %v2769_v62 = vsel %vm387_vm0, %v433_v33, %v434_v35  ;;  %v233_v33 = vld [vmem:[%s2539_s12 + $0x90] sm:$0xff] }
  0x2c   : > { %873 = vmatpush.msrb.mxu2 %v2308_v45  ;;  %2455 = vmatpush.msra.mxu3 %v2277_v39  ;;  %v334_v45 = vld [vmem:[%s4011_s1 + $0x58] sm:$0xff] }
  0x2d   : > { %605 = vmatmul.f32.vlgmr.msra.gmra.mxu3 %v2617_v46  ;;  %630 = vmatpush.msrb.mxu1 %v338_v48  ;;  %v2303_v48 = vld [vmem:[%s4011_s1 + $0x150] sm:$0xff] }
  0x2e   : > { %1035 = vmatpush.msrb.mxu3 %v2324_v47  ;;  %874 = vmatpush.msrb.mxu2 %v2307_v52  ;;  %v453_v47 = vrot.slane %v2693_v15, 1  ;;  %v2739_v52 = vld [vmem:[%s2539_s12 + $0xe8] sm:$0x3] }
  0x2f   : > { %631 = vmatpush.msrb.mxu1 %v337_v57  ;;  %532 = vmatpush.msra.mxu0 %v2277_v39  ;;  %v2338_v39 = vld [vmem:[%s4011_s1 + $0x268] sm:$0xff]  ;;  %v2748_v57 = vmax.f32 %v218_v29, 0.0  ;;  %v4017_v0 = vmax.f32 %v2739_v52, 0.0 }
  0x30   : > { %1036 = vmatpush.msrb.mxu3 %v2323_v53  ;;  %875 = vmatpush.msrb.mxu2 %v2306_v58  ;;  %v392_v53 = vsel %vm387_vm0, %v389_v50, %v391_v25  ;;  %v2750_v58 = vmax.f32 %v219_v30, 0.0  ;;  %v333_v50 = vld [vmem:[%s4011_s1 + $0x50] sm:$0xff]  ;;  %v2317_v25 = vld [vmem:[%s4011_s1 + $0x1c0] sm:$0xff] }
  0x31   : > { %533 = vmatmul.f32.vlgmr.msra.gmra.mxu0 %v390_v63  ;;  %632 = vmatpush.msrb.mxu1 %v336_v1  ;;  %v4019_v63 = vmax.f32 %v2736_v49, 0.0  ;;  %v2302_v1 = vld [vmem:[%s4011_s1 + $0x148] sm:$0xff]  ;;  %v436_v30 = vrot.slane %v4017_v0, 1 }
  0x32   : > { %1037 = vmatpush.msrb.mxu3 %v2322_v5  ;;  %1207 = vmatpush.msrb.mxu0 %v2340_v6  ;;  %v2782_v5 = vsel %vm387_vm0, %v453_v47, %v454_v54  ;;  %v393_v6 = vrot.slane %v2748_v57, 1  ;;  %v394_v8 = vrot.slane %v2750_v58, 1  ;;  %v331_v47 = vld [vmem:[%s4011_s1 + $0x40] sm:$0xff]  ;;  %v2314_v0 = vld [vmem:[%s4011_s1 + $0x1a8] sm:$0xff] }
  0x33   : > { %560 = vmatmul.f32.gmra.mxu1 %v2665_v4  ;;  %584 = vmatmul.f32.gmra.mxu2 %v2679_v9  ;;  %4146 = vst [vmem:[#allocation17_spill] sm:$0xff] %v2782_v5  ;;  %v416_v29 = vrot.slane %v4019_v63, 1 }
  0x34   : > { %876 = vmatpush.msrb.mxu2 %v2305_v13  ;;  %1038 = vmatpush.msrb.mxu3 %v2321_v14  ;;  %v4015_v13 = vmax.f32 %v2759_v60, 0.0  ;;  %v2336_v14 = vld [vmem:[%s4011_s1 + $0x258] sm:$0xff]  ;;  %v2930_v60 = vld [vmem:[%s2539_s12 + $0x160] sm:$0x3] }
  0x35   : > { %608 = vmatmul.f32.gmra.mxu3 %v2698_v16  ;;  %1208 = vmatpush.msrb.mxu0 %v2339_v17  ;;  %v332_v17 = vld [vmem:[%s4011_s1 + $0x48] sm:$0xff]  ;;  %4155 = vst [vmem:[#allocation26_spill] sm:$0xff] %v2930_v60  ;;  %v4162_v15 = vmax.f32 %v2930_v60, 0.0 }
  0x36   : > { %633 = vmatpush.msrb.mxu1 %v335_v22  ;;  %877 = vmatpush.msrb.mxu2 %v2304_v28  ;;  %v2301_v22 = vld [vmem:[%s4011_s1 + $0x140] sm:$0xff]  ;;  %v2805_v28 = vld [vmem:[%s2539_s12 + $0x28] sm:$0x3] }
  0x37   : > { %1039 = vmatpush.msrb.mxu3 %v2320_v36  ;;  %1209 = vmatpush.msrb.mxu0 %v2338_v39  ;;  %v234_v36 = vld [vmem:[%s2539_s12 + $0x98] sm:$0xff]  ;;  %v245_v39 = vld [vmem:[%s2539_s12 + $0xf0] sm:$0xff]  ;;  %v461_v41 = vrot.slane %v4162_v15, 1  ;;  %v260_v16 = vld [vmem:[%s2539_s12 + $0x168] sm:$0xff] }
  0x38   : > { %634 = vmatpush.msrb.mxu1 %v334_v45  ;;  %878 = vmatpush.msrb.mxu2 %v2303_v48  ;;  %v246_v45 = vld [vmem:[%s2539_s12 + $0xf8] sm:$0xff]  ;;  %v261_v15 = vld [vmem:[%s2539_s12 + $0x170] sm:$0xff]  ;;  %v2326_v60 = vld [vmem:[%s4011_s1 + $0x208] sm:$0xff] }
  0x39   : > { %536 = vmatmul.f32.gmra.mxu0 %v392_v53  ;;  %1040 = vmatpush.msrb.mxu3 %v2319_v56  ;;  %v2300_v48 = vld [vmem:[%s4011_s1 + $0x138] sm:$0xff]  ;;  %v2825_v53 = vsel %vm387_vm0, %v393_v6, %v394_v8  ;;  %v456_v56 = vrot.slane %v4015_v13, 1  ;;  %v2334_v13 = vld [vmem:[%s4011_s1 + $0x248] sm:$0xff] }
  0x3a   : > { %1210 = vmatpush.msrb.mxu0 %v2337_v59  ;;  %635 = vmatpush.msrb.mxu1 %v333_v50  ;;  %v4021_v59 = vmax.f32 %v2805_v28, 0.0  ;;  %v257_v50 = vld [vmem:[%s2539_s12 + $0x150] sm:$0xff]  ;;  %v258_v6 = vld [vmem:[%s2539_s12 + $0x158] sm:$0xff] }
  0x3b   : > { %563 = vmatmul.f32.gmra.mxu1 %v2764_v61  ;;  %587 = vmatmul.f32.gmra.mxu2 %v2769_v62 }
  0x3c   : > { %879 = vmatpush.msrb.mxu2 %v2302_v1  ;;  %1041 = vmatpush.msrb.mxu3 %v2318_v3  ;;  %v2316_v1 = vld [vmem:[%s4011_s1 + $0x1b8] sm:$0xff]  ;;  %v2834_v3 = vmax.f32 %v233_v33, 0.0  ;;  %v2857_v33 = vmax.f32 %v246_v45, 0.0  ;;  %v2333_v45 = vld [vmem:[%s4011_s1 + $0x240] sm:$0xff] }
  0x3d   : > { %611 = vmatmul.f32.gmra.mxu3 %v2782_v5  ;;  %1211 = vmatpush.msrb.mxu0 %v2336_v14  ;;  %v2836_v14 = vmax.f32 %v234_v36, 0.0  ;;  %v2860_v36 = vmax.f32 %v257_v50, 0.0  ;;  %v2298_v50 = vld [vmem:[%s4011_s1 + $0x128] sm:$0xff] }
  0x3e   : > { %636 = vmatpush.msrb.mxu1 %v332_v17  ;;  %880 = vmatpush.msrb.mxu2 %v2301_v22  ;;  %4147 = vst [vmem:[#allocation18_spill] sm:$0xff] %v2834_v3  ;;  %v330_v17 = vld [vmem:[%s4011_s1 + $0x38] sm:$0xff]  ;;  %v2848_v22 = vsel %vm387_vm0, %v414_v31, %v416_v29  ;;  %v2299_v31 = vld [vmem:[%s4011_s1 + $0x130] sm:$0xff]  ;;  %v2871_v29 = vsel %vm387_vm0, %v454_v54, %v456_v56  ;;  %v418_v54 = vrot.slane %v2834_v3, 1 }
  0x3f   : > { %1042 = vmatpush.msrb.mxu3 %v2317_v25  ;;  %1212 = vmatpush.msrb.mxu0 %v2335_v27  ;;  %4148 = vst [vmem:[#allocation19_spill] sm:$0xff] %v2836_v14  ;;  %v2853_v25 = vsel %vm387_vm0, %v434_v35, %v436_v30  ;;  %v2855_v27 = vmax.f32 %v245_v39, 0.0  ;;  %v2315_v35 = vld [vmem:[%s4011_s1 + $0x1b0] sm:$0xff]  ;;  %v396_v30 = vrot.slane %v4021_v59, 1  ;;  %v2875_v39 = vmax.f32 %v258_v6, 0.0 }
  0x40   : > { %4149 = vst [vmem:[#allocation20_spill] sm:$0xff] %v2848_v22  ;;  %637 = vmatpush.msrb.mxu1 %v331_v47  ;;  %881 = vmatpush.msrb.mxu2 %v2300_v48  ;;  %v2881_v47 = vld [vmem:[%s2539_s12 + $0xa0] sm:$0x3]  ;;  %v221_v48 = vld [vmem:[%s2539_s12 + $0x30] sm:$0xff]  ;;  %v458_v63 = vrot.slane %v2860_v36, 1  ;;  %v4163_v24 = vrot.slane %v2836_v14, 1 }
  0x41   : > { %4150 = vst [vmem:[#allocation21_spill] sm:$0xff] %v2857_v33  ;;  %539 = vmatmul.f32.gmra.mxu0 %v2825_v53  ;;  %1043 = vmatpush.msrb.mxu3 %v2316_v1  ;;  %v222_v1 = vld [vmem:[%s2539_s12 + $0x38] sm:$0xff]  ;;  %v438_v6 = vrot.slane %v2855_v27, 1  ;;  %v2917_v40 = vsel %vm387_vm0, %v394_v8, %v396_v30  ;;  %v4026_v59 = vrot.slane %v2875_v39, 1  ;;  %v2920_v2 = vmax.f32 %v221_v48, 0.0  ;;  %v2331_v8 = vld [vmem:[%s4011_s1 + $0x230] sm:$0xff] }
  0x42   : > { %4151 = vst [vmem:[#allocation22_spill] sm:$0xff] %v2860_v36  ;;  %1213 = vmatpush.msrb.mxu0 %v2334_v13  ;;  %638 = vmatpush.msrb.mxu1 %v330_v17  ;;  %v329_v13 = vld [vmem:[%s4011_s1 + $0x30] sm:$0xff]  ;;  %v2313_v17 = vld [vmem:[%s4011_s1 + $0x1a0] sm:$0xff]  ;;  %v4028_v56 = vmax.f32 %v2881_v47, 0.0  ;;  %v4027_v36 = vmax.f32 %v2898_v51, 0.0  ;;  %v4156_v48 = vrot.slane %v2836_v14, 1 }
  0x43   : > { %4152 = vst [vmem:[#allocation23_spill] sm:$0xff] %v2871_v29  ;;  %566 = vmatmul.f32.gmra.mxu1 %v2848_v22  ;;  %590 = vmatmul.f32.gmra.mxu2 %v2853_v25  ;;  %v327_v30 = vld [vmem:[%s4011_s1 + $0x20] sm:$0xff]  ;;  %v3079_v51 = vld [vmem:[%s2539_s12 + $0xb8] sm:$0x3] }
  0x44   : > { %4153 = vst [vmem:[#allocation24_spill] sm:$0xff] %v2875_v39  ;;  %882 = vmatpush.msrb.mxu2 %v2299_v31  ;;  %1044 = vmatpush.msrb.mxu3 %v2315_v35  ;;  %v328_v31 = vld [vmem:[%s4011_s1 + $0x28] sm:$0xff]  ;;  %v2297_v35 = vld [vmem:[%s4011_s1 + $0x120] sm:$0xff] }
  0x45   : > { %614 = vmatmul.f32.gmra.mxu3 %v2871_v29  ;;  %1214 = vmatpush.msrb.mxu0 %v2333_v45  ;;  %v2922_v45 = vmax.f32 %v222_v1, 0.0  ;;  %v249_v29 = vld [vmem:[%s2539_s12 + $0x110] sm:$0xff] }
  0x46   : > { %639 = vmatpush.msrb.mxu1 %v329_v13  ;;  %883 = vmatpush.msrb.mxu2 %v2298_v50  ;;  %v2941_v13 = vsel %vm387_vm0, %v418_v54, %v4156_v48  ;;  %v4158_v50 = vrot.slane %v2857_v33, 1  ;;  %v2958_v54 = vsel %vm387_vm0, %v458_v63, %v4026_v59  ;;  %v421_v63 = vrot.slane %v4028_v56, 1  ;;  %v237_v59 = vld [vmem:[%s2539_s12 + $0xb0] sm:$0xff]  ;;  %v2329_v56 = vld [vmem:[%s4011_s1 + $0x220] sm:$0xff] }
  0x47   : > { %1045 = vmatpush.msrb.mxu3 %v2314_v0  ;;  %1215 = vmatpush.msrb.mxu0 %v2332_v44  ;;  %4157 = vst [vmem:[#allocation27_spill] sm:$0xff] %v2941_v13  ;;  %v2296_v44 = vld [vmem:[%s4011_s1 + $0x118] sm:$0xff]  ;;  %v441_v48 = vrot.slane %v4027_v36, 1  ;;  %v2311_v36 = vld [vmem:[%s4011_s1 + $0x190] sm:$0xff] }
  0x48   : > { %v2946_v1 = vsel %vm387_vm0, %v438_v6, %v4158_v50  ;;  %640 = vmatpush.msrb.mxu1 %v328_v31  ;;  %884 = vmatpush.msrb.mxu2 %v2297_v35  ;;  %v2312_v0 = vld [vmem:[%s4011_s1 + $0x198] sm:$0xff]  ;;  %4160 = vst [vmem:[#allocation29_spill] sm:$0xff] %v2958_v54  ;;  %v398_v6 = vrot.slane %v2920_v2, 1  ;;  %v2330_v35 = vld [vmem:[%s4011_s1 + $0x228] sm:$0xff]  ;;  %v3013_v46 = vsel %vm387_vm0, %v4163_v24, %v421_v63  ;;  %v3029_v24 = vmax.f32 %v237_v59, 0.0  ;;  %v2309_v59 = vld [vmem:[%s4011_s1 + $0x180] sm:$0xff] }
  0x49   : > { %4159 = vst [vmem:[#allocation28_spill] sm:$0xff] %v2946_v1  ;;  %542 = vmatmul.f32.gmra.mxu0 %v2917_v40  ;;  %1046 = vmatpush.msrb.mxu3 %v2313_v17  ;;  %v236_v50 = vld [vmem:[%s2539_s12 + $0xa8] sm:$0xff]  ;;  %v2975_v17 = vld [vmem:[%s2539_s12 + $0x40] sm:$0x3] }
  0x4a   : > { %1216 = vmatpush.msrb.mxu0 %v2331_v8  ;;  %641 = vmatpush.msrb.mxu1 %v327_v30  ;;  %v326_v8 = vld [vmem:[%s4011_s1 + $0x18] sm:$0xff]  ;;  %v2295_v30 = vld [vmem:[%s4011_s1 + $0x110] sm:$0xff]  ;;  %v248_v31 = vld [vmem:[%s2539_s12 + $0x108] sm:$0xff]  ;;  %4164 = vst [vmem:[#allocation30_spill] sm:$0xff] %v3013_v46 }
  0x4b   : > { %569 = vmatmul.f32.gmra.mxu1 %v2941_v13  ;;  %593 = vmatmul.f32.gmra.mxu2 %v2946_v1  ;;  %4168 = vst [vmem:[#allocation33_spill] sm:$0xff] %v3029_v24  ;;  %v3031_v63 = vmax.f32 %v248_v31, 0.0  ;;  %v4172_v31 = vrot.slane %v2875_v39, 1  ;;  %v2388_v39 = vld [vmem:[%s4011_s1 + $0x3f8] sm:$0xff] }
  0x4c   : > { %885 = vmatpush.msrb.mxu2 %v2296_v44  ;;  %1047 = vmatpush.msrb.mxu3 %v2312_v0  ;;  %v2294_v44 = vld [vmem:[%s4011_s1 + $0x108] sm:$0xff]  ;;  %v4161_v0 = vrot.slane %v2922_v45, 1 }
  0x4d   : > { %617 = vmatmul.f32.gmra.mxu3 %v2958_v54  ;;  %1217 = vmatpush.msrb.mxu0 %v2330_v35  ;;  %v2310_v35 = vld [vmem:[%s4011_s1 + $0x188] sm:$0xff]  ;;  %v3027_v54 = vmax.f32 %v236_v50, 0.0  ;;  %4169 = vst [vmem:[#allocation34_spill] sm:$0xff] %v3031_v63 }
  0x4e   : > { %v3001_v5 = vsel %vm387_vm0, %v398_v6, %v4161_v0  ;;  %642 = vmatpush.msrb.mxu1 %v326_v8  ;;  %886 = vmatpush.msrb.mxu2 %v2295_v30  ;;  %v4165_v6 = vrot.slane %v2857_v33, 1  ;;  %v2328_v8 = vld [vmem:[%s4011_s1 + $0x218] sm:$0xff]  ;;  %v324_v30 = vld [vmem:[%s4011_s1 + $0x8] sm:$0xff] }
  0x4f   : > { %1048 = vmatpush.msrb.mxu3 %v2311_v36  ;;  %1218 = vmatpush.msrb.mxu0 %v2329_v56  ;;  %4167 = vst [vmem:[#allocation32_spill] sm:$0xff] %v3027_v54  ;;  %v3036_v36 = vmax.f32 %v260_v16, 0.0  ;;  %v2293_v56 = vld [vmem:[%s4011_s1 + $0x100] sm:$0xff]  ;;  %v224_v16 = vld [vmem:[%s2539_s12 + $0x48] sm:$0xff] }
  0x50   : > { %v3018_v0 = vsel %vm387_vm0, %v4165_v6, %v441_v48  ;;  %v3033_v48 = vmax.f32 %v249_v29, 0.0  ;;  %643 = vmatpush.msrb.mxu1 %v325_v26  ;;  %887 = vmatpush.msrb.mxu2 %v2294_v44  ;;  %v3047_v29 = vsel %vm387_vm0, %v4172_v31, %v461_v41  ;;  %v4174_v26 = vmax.f32 %v2975_v17, 0.0  ;;  %v225_v41 = vld [vmem:[%s2539_s12 + $0x50] sm:$0xff]  ;;  %v323_v6 = vld [vmem:[%s4011_s1] sm:$0xff] }
  0x51   : > { %4166 = vst [vmem:[#allocation31_spill] sm:$0xff] %v3018_v0  ;;  %545 = vmatmul.f32.gmra.mxu0 %v3001_v5  ;;  %1049 = vmatpush.msrb.mxu3 %v2310_v35  ;;  %v3051_v44 = vmax.f32 %v261_v15, 0.0  ;;  %v2327_v35 = vld [vmem:[%s4011_s1 + $0x210] sm:$0xff]  ;;  %v2372_v15 = vld [vmem:[%s4011_s1 + $0x378] sm:$0xff]  ;;  %v443_v31 = vrot.slane %v3031_v63, 1  ;;  %v463_v23 = vrot.slane %v3036_v36, 1 }
  0x52   : > { %4170 = vst [vmem:[#allocation35_spill] sm:$0xff] %v3033_v48  ;;  %v401_v50 = vrot.slane %v4174_v26, 1  ;;  %1219 = vmatpush.msrb.mxu0 %v2328_v8  ;;  %644 = vmatpush.msrb.mxu1 %v324_v30  ;;  %v423_v8 = vrot.slane %v3027_v54, 1  ;;  %v424_v30 = vrot.slane %v3029_v24, 1  ;;  %v444_v26 = vrot.slane %v3033_v48, 1 }
  0x53   : > { %4171 = vst [vmem:[#allocation36_spill] sm:$0xff] %v3036_v36  ;;  %572 = vmatmul.f32.gmra.mxu1 %v3013_v46  ;;  %596 = vmatmul.f32.gmra.mxu2 %v3018_v0  ;;  %v3082_v63 = vld [vmem:[%s2539_s12 + $0x118] sm:$0x3]  ;;  %v464_v0 = vrot.slane %v3051_v44, 1  ;;  %v3093_v33 = vmax.f32 %v224_v16, 0.0  ;;  %v4068_v16 = vmax.f32 %v3079_v51, 0.0 }
  0x54   : > { %4173 = vst [vmem:[#allocation37_spill] sm:$0xff] %v3047_v29  ;;  %888 = vmatpush.msrb.mxu2 %v2293_v56  ;;  %1050 = vmatpush.msrb.mxu3 %v2309_v59  ;;  %v2356_v56 = vld [vmem:[%s4011_s1 + $0x2f8] sm:$0xff]  ;;  %v4176_v59 = vrot.slane %v2922_v45, 1 }
  0x55   : > { %4175 = vst [vmem:[#allocation38_spill] sm:$0xff] %v3051_v44  ;;  %620 = vmatmul.f32.gmra.mxu3 %v3047_v29  ;;  %1220 = vmatpush.msrb.mxu0 %v2327_v35  ;;  %v3095_v29 = vmax.f32 %v225_v41, 0.0  ;;  %v3098_v36 = vld [vmem:[%s2539_s12 + $0x178] sm:$0x3]  ;;  %v2325_v35 = vld [vmem:[%s4011_s1 + $0x200] sm:$0xff]  ;;  %v4071_v41 = vmax.f32 %v3082_v63, 0.0 }
  0x56   : > { %v3090_v48 = vsel %vm387_vm0, %v4176_v59, %v401_v50  ;;  %645 = vmatpush.msrb.mxu1 %v323_v6  ;;  %1538 = vmatpush.msra.mxu2 %v2372_v15  ;;  %v3104_v50 = vsel %vm387_vm0, %v423_v8, %v424_v30  ;;  %v3107_v59 = vsel %vm387_vm0, %v443_v31, %v444_v26  ;;  %v403_v6 = vrot.slane %v3093_v33, 1  ;;  %v3124_v31 = vld [vmem:[%s2539_s12 + $0x58] sm:$0x3]  ;;  %v2355_v8 = vld [vmem:[%s4011_s1 + $0x2f0] sm:$0xff] }
  0x57   : > { %1221 = vmatpush.msrb.mxu0 %v2326_v60  ;;  %1710 = vmatpush.msra.mxu3 %v2388_v39  ;;  %4177 = vst [vmem:[#allocation39_spill] sm:$0xff] %v3104_v50  ;;  %v2404_v60 = vld [vmem:[%s4011_s1 + $0x478] sm:$0xff]  ;;  %v3116_v39 = vsel %vm387_vm0, %v463_v23, %v464_v0  ;;  %v404_v15 = vrot.slane %v3095_v29, 1  ;;  %v426_v23 = vrot.slane %v4068_v16, 1  ;;  %v446_v44 = vrot.slane %v4071_v41, 1 }
  0x58   : > { %4178 = vst [vmem:[#allocation40_spill] sm:$0xff] %v3107_v59  ;;  %1376 = vmatpush.msra.mxu1 %v2356_v56  ;;  %v2371_v56 = vld [vmem:[%s4011_s1 + $0x370] sm:$0xff]  ;;  %v4180_v16 = vmax.f32 %v3098_v36, 0.0  ;;  %v280_v41 = vmax.f32 %v3124_v31, 0.0  ;;  %v765_v31 = vrot.slane %v2558_v19, 2 }
  0x59   : > { %548 = vmatmul.f32.gmra.mxu0 %v3090_v48  ;;  %4179 = vst [vmem:[#allocation41_spill] sm:$0xff] %v3116_v39  ;;  %1539 = vmatpush.msra.mxu2 %v2371_v56  ;;  %v3150_v56 = vsel %vm387_vm0, %v444_v26, %v446_v44  ;;  %v2403_v44 = vld [vmem:[%s4011_s1 + $0x470] sm:$0xff]  ;;  %v2370_v26 = vld [vmem:[%s4011_s1 + $0x368] sm:$0xff] }
  0x5a   : > { %1222 = vmatpush.msrb.mxu0 %v2325_v35  ;;  %v2387_v35 = vld [vmem:[%s4011_s1 + $0x3f0] sm:$0xff]  ;;  %v466_v1 = vrot.slane %v4180_v16, 1  ;;  %1377 = vmatpush.msra.mxu1 %v2355_v8  ;;  %4182 = vst [vmem:[#allocation43_spill] sm:$0xff] %v3150_v56  ;;  %v744_v16 = vrot.slane %v2591_v37, 2  ;;  %v4184_v8 = vmax.f32 %v2639_v55, 0.0  ;;  %v749_v55 = vrot.slane %v2748_v57, 2 }
  0x5b   : > { %575 = vmatmul.f32.gmra.mxu1 %v3104_v50  ;;  %599 = vmatmul.f32.gmra.mxu2 %v3107_v59  ;;  %v3141_v59 = vsel %vm387_vm0, %v403_v6, %v404_v15  ;;  %v406_v6 = vrot.slane %v280_v41, 1 }
  0x5c   : > { %1879 = vmatpush.msra.mxu0 %v2404_v60  ;;  %1711 = vmatpush.msra.mxu3 %v2387_v35  ;;  %v3147_v60 = vsel %vm387_vm0, %v424_v30, %v426_v23  ;;  %v745_v30 = vrot.slane %v2593_v38, 2  ;;  %v747_v23 = vrot.slane %v4184_v8, 2  ;;  %v2354_v35 = vld [vmem:[%s4011_s1 + $0x2e8] sm:$0xff]  ;;  %v2401_v8 = vld [vmem:[%s4011_s1 + $0x460] sm:$0xff] }
  0x5d   : > { %623 = vmatmul.f32.gmra.mxu3 %v3116_v39  ;;  %4181 = vst [vmem:[#allocation42_spill] sm:$0xff] %v3147_v60  ;;  %v3154_v39 = vsel %vm387_vm0, %v464_v0, %v466_v1  ;;  %v3167_v1 = vsel %vm387_vm0, %v404_v15, %v406_v6  ;;  %1540 = vmatpush.msra.mxu2 %v2370_v26  ;;  %v2386_v15 = vld [vmem:[%s4011_s1 + $0x3e8] sm:$0xff]  ;;  %v750_v6 = vrot.slane %v2750_v58, 2  ;;  %v755_v26 = vrot.slane %v2922_v45, 2 }
  0x5e   : > { %4183 = vst [vmem:[#allocation44_spill] sm:$0xff] %v3154_v39  ;;  %1880 = vmatpush.msra.mxu0 %v2403_v44  ;;  %v746_v0 = vsel %vm743_vm1, %v744_v16, %v745_v30  ;;  %1712 = vmatpush.msra.mxu3 %v2386_v15  ;;  %v2402_v16 = vld [vmem:[%s4011_s1 + $0x468] sm:$0xff]  ;;  %v4186_v15 = vmax.f32 %v2975_v17, 0.0  ;;  %v759_v17 = vrot.slane %v3093_v33, 2 }
  0x5f   : > { %1378 = vmatpush.msra.mxu1 %v2354_v35  ;;  %v3194_v44 = vsel %vm743_vm1, %v749_v55, %v750_v6  ;;  %v2352_v55 = vld [vmem:[%s4011_s1 + $0x2d8] sm:$0xff] }
  0x60   : > { %1881 = vmatpush.msra.mxu0 %v2402_v16  ;;  %v757_v35 = vrot.slane %v4186_v15, 2  ;;  %v760_v16 = vrot.slane %v3095_v29, 2 }
  0x61   : > { %551 = vmatmul.f32.gmra.mxu0 %v3141_v59 }
  0x62   : > { %1882 = vmatpush.msra.mxu0 %v2401_v8  ;;  %v2399_v8 = vld [vmem:[%s4011_s1 + $0x450] sm:$0xff] }
  0x63   : > { %578 = vmatmul.f32.gmra.mxu1 %v3147_v60  ;;  %602 = vmatmul.f32.gmra.mxu2 %v3150_v56 }
  0x65   : > { %626 = vmatmul.f32.gmra.mxu3 %v3154_v39 }
  0x69   : > { %554 = vmatmul.f32.gmra.mxu0 %v3167_v1 }
  0x6b   : > { %646 = vmatmul.f32.vlgmr.msrb.gmra.mxu1 %v2591_v37  ;;  %889 = vmatmul.f32.vlgmr.msrb.gmra.mxu2 %v746_v0  ;;  %v748_v37 = vsel %vm743_vm1, %v745_v30, %v747_v23  ;;  %v2385_v0 = vld [vmem:[%s4011_s1 + $0x3e0] sm:$0xff] }
  0x6c   : > { %1713 = vmatpush.msra.mxu3 %v2385_v0  ;;  %v762_v0 = vrot.slane %v280_v41, 2  ;;  %v764_v41 = vrot.slane %v2556_v18, 2 }
  0x6d   : > { %1051 = vmatmul.f32.vlgmr.msrb.gmra.mxu3 %v2748_v57 }
  0x6e   : > { %v3286_v15 = vsel %vm743_vm1, %v764_v41, %v765_v31  ;;  %v770_v41 = vrot.slane %v2681_v10, 2 }
  0x71   : > { %1223 = vmatmul.f32.vlgmr.msrb.gmra.mxu0 %v2825_v53  ;;  %v4185_v53 = vmax.f32 %v2805_v28, 0.0  ;;  %v754_v28 = vrot.slane %v2920_v2, 2 }
  0x73   : > { %649 = vmatmul.f32.gmra.mxu1 %v2593_v38  ;;  %892 = vmatmul.f32.gmra.mxu2 %v748_v37  ;;  %v2369_v38 = vld [vmem:[%s4011_s1 + $0x360] sm:$0xff]  ;;  %v752_v30 = vrot.slane %v4185_v53, 2  ;;  %v3224_v23 = vsel %vm743_vm1, %v754_v28, %v755_v26  ;;  %v2384_v37 = vld [vmem:[%s4011_s1 + $0x3d8] sm:$0xff]  ;;  %v3254_v53 = vsel %vm743_vm1, %v759_v17, %v760_v16  ;;  %v2351_v28 = vld [vmem:[%s4011_s1 + $0x2d0] sm:$0xff] }
  0x74   : > { %1541 = vmatpush.msra.mxu2 %v2369_v38  ;;  %1714 = vmatpush.msra.mxu3 %v2384_v37  ;;  %v2400_v38 = vld [vmem:[%s4011_s1 + $0x458] sm:$0xff]  ;;  %v4187_v37 = vmax.f32 %v2581_v32, 0.0  ;;  %v2382_v17 = vld [vmem:[%s4011_s1 + $0x3c8] sm:$0xff] }
  0x75   : > { %1054 = vmatmul.f32.gmra.mxu3 %v2750_v58  ;;  %1883 = vmatpush.msra.mxu0 %v2400_v38 }
  0x77   : > { %1884 = vmatpush.msra.mxu0 %v2399_v8  ;;  %v2398_v8 = vld [vmem:[%s4011_s1 + $0x448] sm:$0xff] }
  0x79   : > { %1226 = vmatmul.f32.gmra.mxu0 %v2917_v40  ;;  %v2353_v40 = vld [vmem:[%s4011_s1 + $0x2e0] sm:$0xff] }
  0x7a   : > { %1379 = vmatpush.msra.mxu1 %v2353_v40  ;;  %v2383_v40 = vld [vmem:[%s4011_s1 + $0x3d0] sm:$0xff]  ;;  %1885 = vmatpush.msra.mxu0 %v2398_v8 }
  0x7b   : > { %652 = vmatmul.f32.gmra.mxu1 %v2748_v57  ;;  %895 = vmatmul.f32.gmra.mxu2 %v3194_v44  ;;  %v3212_v57 = vsel %vm743_vm1, %v750_v6, %v752_v30  ;;  %v3242_v6 = vsel %vm743_vm1, %v755_v26, %v757_v35  ;;  %v2367_v30 = vld [vmem:[%s4011_s1 + $0x350] sm:$0xff]  ;;  %v3272_v26 = vsel %vm743_vm1, %v760_v16, %v762_v0  ;;  %v2366_v35 = vld [vmem:[%s4011_s1 + $0x348] sm:$0xff] }
  0x7c   : > { %1380 = vmatpush.msra.mxu1 %v2352_v55  ;;  %1715 = vmatpush.msra.mxu3 %v2383_v40  ;;  %v767_v55 = vrot.slane %v4187_v37, 2 }
  0x7d   : > { %1057 = vmatmul.f32.gmra.mxu3 %v2920_v2 }
  0x7e   : > { %1381 = vmatpush.msra.mxu1 %v2351_v28  ;;  %1716 = vmatpush.msra.mxu3 %v2382_v17  ;;  %v3312_v40 = vsel %vm743_vm1, %v765_v31, %v767_v55  ;;  %v769_v28 = vrot.slane %v2673_v7, 2 }
  0x7f   : > { %4189 = vst [vmem:[#allocation46_spill] sm:$0xff] %v3312_v40 }
  0x80   : > { %v3332_v17 = vsel %vm743_vm1, %v769_v28, %v770_v41  ;;  %v2381_v28 = vld [vmem:[%s4011_s1 + $0x3c0] sm:$0xff] }
  0x81   : > { %1229 = vmatmul.f32.gmra.mxu0 %v3001_v5  ;;  %4191 = vst [vmem:[#allocation48_spill] sm:$0xff] %v3332_v17  ;;  %1717 = vmatpush.msra.mxu3 %v2381_v28  ;;  %v775_v28 = vrot.slane %v2836_v14, 2 }
  0x83   : > { %655 = vmatmul.f32.gmra.mxu1 %v2750_v58  ;;  %898 = vmatmul.f32.gmra.mxu2 %v3212_v57  ;;  %v2368_v58 = vld [vmem:[%s4011_s1 + $0x358] sm:$0xff] }
  0x84   : > { %1542 = vmatpush.msra.mxu2 %v2368_v58 }
  0x85   : > { %1060 = vmatmul.f32.gmra.mxu3 %v2922_v45 }
  0x86   : > { %1543 = vmatpush.msra.mxu2 %v2367_v30  ;;  %v2350_v30 = vld [vmem:[%s4011_s1 + $0x2c8] sm:$0xff] }
  0x87   : > { %1382 = vmatpush.msra.mxu1 %v2350_v30  ;;  %v2365_v30 = vld [vmem:[%s4011_s1 + $0x340] sm:$0xff] }
  0x88   : > { %1544 = vmatpush.msra.mxu2 %v2366_v35 }
  0x89   : > { %1232 = vmatmul.f32.gmra.mxu0 %v3090_v48 }
  0x8a   : > { %1545 = vmatpush.msra.mxu2 %v2365_v30  ;;  %v774_v30 = vrot.slane %v2834_v3, 2 }
  0x8b   : > { %658 = vmatmul.f32.gmra.mxu1 %v2920_v2  ;;  %901 = vmatmul.f32.gmra.mxu2 %v3224_v23 }
  0x8d   : > { %1063 = vmatmul.f32.gmra.mxu3 %v3093_v33 }
  0x91   : > { %1235 = vmatmul.f32.gmra.mxu0 %v3141_v59 }
  0x93   : > { %661 = vmatmul.f32.gmra.mxu1 %v2922_v45  ;;  %904 = vmatmul.f32.gmra.mxu2 %v3242_v6 }
  0x95   : > { %1066 = vmatmul.f32.gmra.mxu3 %v3095_v29 }
  0x99   : > { %1238 = vmatmul.f32.gmra.mxu0 %v3167_v1 }
  0x9b   : > { %664 = vmatmul.f32.gmra.mxu1 %v3093_v33  ;;  %907 = vmatmul.f32.gmra.mxu2 %v3254_v53 }
  0x9d   : > { %1069 = vmatmul.f32.gmra.mxu3 %v2556_v18 }
  0xa1   : > { %1241 = vmatmul.f32.gmra.mxu0 %v2603_v42 }
  0xa3   : > { %667 = vmatmul.f32.gmra.mxu1 %v3095_v29  ;;  %910 = vmatmul.f32.gmra.mxu2 %v3272_v26 }
  0xa5   : > { %1072 = vmatmul.f32.gmra.mxu3 %v2558_v19 }
  0xa8   : > { %v3283_v58 = vpop.f32.mrf.mxu1 }
  0xa9   : > { %1244 = vmatmul.f32.gmra.mxu0 %v2665_v4 }
  0xab   : > { %670 = vmatmul.f32.gmra.mxu1 %v2556_v18  ;;  %913 = vmatmul.f32.gmra.mxu2 %v3286_v15 }
  0xad   : > { %1075 = vmatmul.f32.gmra.mxu3 %v2673_v7 }
  0xae   : > { %v3300_v16 = vpop.f32.mrf.mxu2  ;;  %v3302_v38 = vpop.f32.mrf.mxu0 }
  0xb0   : > { %v3307_v0 = vpop.f32.mrf.mxu1  ;;  %v3309_v32 = vpop.f32.mrf.mxu3 }
  0xb1   : > { %4188 = vst [vmem:[#allocation45_spill] sm:$0xff] %v3309_v32  ;;  %1247 = vmatmul.f32.gmra.mxu0 %v2764_v61  ;;  %v4192_v32 = vmax.f32 %v2736_v49, 0.0 }
  0xb3   : > { %673 = vmatmul.f32.gmra.mxu1 %v2558_v19  ;;  %916 = vmatmul.f32.gmra.mxu2 %v3312_v40  ;;  %v772_v8 = vrot.slane %v4192_v32, 2 }
  0xb5   : > { %1078 = vmatmul.f32.gmra.mxu3 %v2681_v10  ;;  %v3358_v32 = vsel %vm743_vm1, %v770_v41, %v772_v8 }
  0xb6   : > { %v3323_v35 = vpop.f32.mrf.mxu2  ;;  %v3325_v31 = vpop.f32.mrf.mxu0  ;;  %4194 = vst [vmem:[#allocation50_spill] sm:$0xff] %v3358_v32 }
  0xb8   : > { %v3327_v37 = vpop.f32.mrf.mxu1  ;;  %v3329_v55 = vpop.f32.mrf.mxu3 }
  0xb9   : > { %4190 = vst [vmem:[#allocation47_spill] sm:$0xff] %v3329_v55  ;;  %1250 = vmatmul.f32.gmra.mxu0 %v2848_v22 }
  0xbb   : > { %676 = vmatmul.f32.gmra.mxu1 %v2673_v7  ;;  %919 = vmatmul.f32.gmra.mxu2 %v3332_v17  ;;  %v2349_v17 = vld [vmem:[%s4011_s1 + $0x2c0] sm:$0xff]  ;;  %v4197_v7 = vmax.f32 %v2881_v47, 0.0 }
  0xbc   : > { %1383 = vmatpush.msra.mxu1 %v2349_v17  ;;  %v2397_v17 = vld [vmem:[%s4011_s1 + $0x440] sm:$0xff] }
  0xbd   : > { %1081 = vmatmul.f32.gmra.mxu3 %v2834_v3  ;;  %1886 = vmatpush.msra.mxu0 %v2397_v17  ;;  %v777_v17 = vrot.slane %v4197_v7, 2 }
  0xbe   : > { %v3346_v55 = vpop.f32.mrf.mxu2  ;;  %v3348_v22 = vpop.f32.mrf.mxu0 }
  0xbf   : > { %v3404_v7 = vsel %vm743_vm1, %v775_v28, %v777_v17 }
  0xc0   : > { %v3353_v61 = vpop.f32.mrf.mxu1  ;;  %v3355_v49 = vpop.f32.mrf.mxu3  ;;  %4199 = vst [vmem:[#allocation54_spill] sm:$0xff] %v3404_v7 }
  0xc1   : > { %4193 = vst [vmem:[#allocation49_spill] sm:$0xff] %v3355_v49  ;;  %1253 = vmatmul.f32.gmra.mxu0 %v2941_v13 }
  0xc3   : > { %679 = vmatmul.f32.gmra.mxu1 %v2681_v10  ;;  %922 = vmatmul.f32.gmra.mxu2 %v3358_v32  ;;  %v3378_v32 = vsel %vm743_vm1, %v774_v30, %v775_v28  ;;  %v2364_v10 = vld [vmem:[%s4011_s1 + $0x338] sm:$0xff] }
  0xc4   : > { %4196 = vst [vmem:[#allocation52_spill] sm:$0xff] %v3378_v32  ;;  %1546 = vmatpush.msra.mxu2 %v2364_v10  ;;  %v2380_v30 = vld [vmem:[%s4011_s1 + $0x3b8] sm:$0xff]  ;;  %v779_v10 = vrot.slane %v3027_v54, 2 }
  0xc5   : > { %1084 = vmatmul.f32.gmra.mxu3 %v2836_v14 }
  0xc6   : > { %v3369_v49 = vpop.f32.mrf.mxu2  ;;  %v3371_v41 = vpop.f32.mrf.mxu0  ;;  %1718 = vmatpush.msra.mxu3 %v2380_v30  ;;  %v780_v30 = vrot.slane %v3029_v24, 2 }
  0xc8   : > { %v3373_v8 = vpop.f32.mrf.mxu1  ;;  %v3375_v13 = vpop.f32.mrf.mxu3 }
  0xc9   : > { %4195 = vst [vmem:[#allocation51_spill] sm:$0xff] %v3375_v13  ;;  %1256 = vmatmul.f32.gmra.mxu0 %v3013_v46 }
  0xcb   : > { %682 = vmatmul.f32.gmra.mxu1 %v2834_v3  ;;  %925 = vmatmul.f32.gmra.mxu2 %v3378_v32  ;;  %v2348_v32 = vld [vmem:[%s4011_s1 + $0x2b8] sm:$0xff] }
  0xcc   : > { %1384 = vmatpush.msra.mxu1 %v2348_v32 }
  0xcd   : > { %1087 = vmatmul.f32.gmra.mxu3 %v3027_v54 }
  0xce   : > { %v3392_v13 = vpop.f32.mrf.mxu2  ;;  %v3394_v46 = vpop.f32.mrf.mxu0 }
  0xd0   : > { %v3399_v3 = vpop.f32.mrf.mxu1  ;;  %v3401_v47 = vpop.f32.mrf.mxu3 }
  0xd1   : > { %4198 = vst [vmem:[#allocation53_spill] sm:$0xff] %v3401_v47  ;;  %1259 = vmatmul.f32.gmra.mxu0 %v3104_v50  ;;  %v2396_v47 = vld [vmem:[%s4011_s1 + $0x438] sm:$0xff]  ;;  %v3424_v50 = vsel %vm743_vm1, %v779_v10, %v780_v30  ;;  %v2379_v10 = vld [vmem:[%s4011_s1 + $0x3b0] sm:$0xff] }
  0xd2   : > { %1887 = vmatpush.msra.mxu0 %v2396_v47  ;;  %4201 = vst [vmem:[#allocation56_spill] sm:$0xff] %v3424_v50  ;;  %1719 = vmatpush.msra.mxu3 %v2379_v10  ;;  %v785_v10 = vrot.slane %v2562_v21, 2 }
  0xd3   : > { %685 = vmatmul.f32.gmra.mxu1 %v2836_v14  ;;  %928 = vmatmul.f32.gmra.mxu2 %v3404_v7  ;;  %v2363_v7 = vld [vmem:[%s4011_s1 + $0x330] sm:$0xff]  ;;  %v4202_v14 = vmax.f32 %v3079_v51, 0.0 }
  0xd4   : > { %1547 = vmatpush.msra.mxu2 %v2363_v7  ;;  %v784_v7 = vrot.slane %v2560_v20, 2 }
  0xd5   : > { %1090 = vmatmul.f32.gmra.mxu3 %v3029_v24  ;;  %v782_v47 = vrot.slane %v4202_v14, 2 }
  0xd6   : > { %v3415_v40 = vpop.f32.mrf.mxu2  ;;  %v3417_v28 = vpop.f32.mrf.mxu0 }
  0xd7   : > { %v3450_v14 = vsel %vm743_vm1, %v780_v30, %v782_v47 }
  0xd8   : > { %v3419_v32 = vpop.f32.mrf.mxu1  ;;  %v3421_v17 = vpop.f32.mrf.mxu3  ;;  %4205 = vst [vmem:[#allocation59_spill] sm:$0xff] %v3450_v14 }
  0xd9   : > { %4200 = vst [vmem:[#allocation55_spill] sm:$0xff] %v3421_v17  ;;  %1262 = vmatmul.f32.gmra.mxu0 %v3147_v60 }
  0xdb   : > { %688 = vmatmul.f32.gmra.mxu1 %v3027_v54  ;;  %931 = vmatmul.f32.gmra.mxu2 %v3424_v50  ;;  %v2347_v50 = vld [vmem:[%s4011_s1 + $0x2b0] sm:$0xff] }
  0xdc   : > { %1385 = vmatpush.msra.mxu1 %v2347_v50 }
  0xdd   : > { %1093 = vmatmul.f32.gmra.mxu3 %v2560_v20 }
  0xde   : > { %v3438_v17 = vpop.f32.mrf.mxu2  ;;  %v3440_v60 = vpop.f32.mrf.mxu0 }
  0xdf   : > { %4203 = vst [vmem:[#allocation57_spill] sm:$0xff] %v3438_v17 }
  0xe0   : > { %v3445_v54 = vpop.f32.mrf.mxu1  ;;  %v3447_v51 = vpop.f32.mrf.mxu3 }
  0xe1   : > { %4204 = vst [vmem:[#allocation58_spill] sm:$0xff] %v3447_v51  ;;  %1265 = vmatmul.f32.gmra.mxu0 %v2608_v43  ;;  %v2395_v51 = vld [vmem:[%s4011_s1 + $0x430] sm:$0xff]  ;;  %v3468_v43 = vsel %vm743_vm1, %v784_v7, %v785_v10  ;;  %v2378_v7 = vld [vmem:[%s4011_s1 + $0x3a8] sm:$0xff] }
  0xe2   : > { %1888 = vmatpush.msra.mxu0 %v2395_v51  ;;  %4208 = vst [vmem:[#allocation62_spill] sm:$0xff] %v3468_v43  ;;  %1720 = vmatpush.msra.mxu3 %v2378_v7 }
  0xe3   : > { %691 = vmatmul.f32.gmra.mxu1 %v3029_v24  ;;  %934 = vmatmul.f32.gmra.mxu2 %v3450_v14  ;;  %v2362_v14 = vld [vmem:[%s4011_s1 + $0x328] sm:$0xff]  ;;  %v4209_v24 = vmax.f32 %v2587_v34, 0.0 }
  0xe4   : > { %1548 = vmatpush.msra.mxu2 %v2362_v14 }
  0xe5   : > { %1096 = vmatmul.f32.gmra.mxu3 %v2562_v21 }
  0xe6   : > { %v3461_v17 = vpop.f32.mrf.mxu2  ;;  %v3463_v30 = vpop.f32.mrf.mxu0 }
  0xe7   : > { %4206 = vst [vmem:[#allocation60_spill] sm:$0xff] %v3461_v17  ;;  %v787_v17 = vrot.slane %v4209_v24, 2 }
  0xe8   : > { %v3465_v50 = vpop.f32.mrf.mxu3  ;;  %v647_v47 = vpop.f32.mrf.mxu1 }
  0xe9   : > { %4207 = vst [vmem:[#allocation61_spill] sm:$0xff] %v3465_v50  ;;  %1268 = vmatmul.f32.gmra.mxu0 %v2679_v9  ;;  %v648_v51 = vadd.f32 %v647_v47, %v3302_v38  ;;  %v3487_v24 = vsel %vm743_vm1, %v785_v10, %v787_v17  ;;  %v790_v47 = vrot.slane %v2685_v12, 2 }
  0xeb   : > { %694 = vmatmul.f32.gmra.mxu1 %v2560_v20  ;;  %937 = vmatmul.f32.gmra.mxu2 %v3468_v43  ;;  %v2346_v20 = vld [vmem:[%s4011_s1 + $0x2a8] sm:$0xff] }
  0xec   : > { %1386 = vmatpush.msra.mxu1 %v2346_v20  ;;  %v2394_v20 = vld [vmem:[%s4011_s1 + $0x428] sm:$0xff] }
  0xed   : > { %1099 = vmatmul.f32.gmra.mxu3 %v2683_v11  ;;  %1889 = vmatpush.msra.mxu0 %v2394_v20  ;;  %v2377_v20 = vld [vmem:[%s4011_s1 + $0x3a0] sm:$0xff] }
  0xee   : > { %v890_v50 = vpop.f32.mrf.mxu2  ;;  %v1224_v9 = vpop.f32.mrf.mxu0  ;;  %1721 = vmatpush.msra.mxu3 %v2377_v20  ;;  %v4216_v20 = vld [vmem:[#allocation21_spill] sm:$0xff] }
  0xef   : > { %v986_v43 = vadd.f32 %v890_v50, %v648_v51  ;;  %v789_v50 = vrot.slane %v2683_v11, 2 }
  0xf0   : > { %v650_v4 = vpop.f32.mrf.mxu1  ;;  %v1052_v34 = vpop.f32.mrf.mxu3 }
  0xf1   : > { %v1148_v38 = vadd.f32 %v1052_v34, %v986_v43  ;;  %1271 = vmatmul.f32.gmra.mxu0 %v2769_v62  ;;  %v651_v51 = vadd.f32 %v650_v4, %v3325_v31  ;;  %v3502_v34 = vsel %vm743_vm1, %v789_v50, %v790_v47  ;;  %v2361_v4 = vld [vmem:[%s4011_s1 + $0x320] sm:$0xff]  ;;  %v4212_v31 = vmax.f32 %v2739_v52, 0.0 }
  0xf2   : > { %1549 = vmatpush.msra.mxu2 %v2361_v4 }
  0xf3   : > { %v3490_v14 = vadd.f32 %v1224_v9, %v1148_v38  ;;  %697 = vmatmul.f32.gmra.mxu1 %v2562_v21  ;;  %940 = vmatmul.f32.gmra.mxu2 %v3487_v24 }
  0xf5   : > { %4210 = vst [vmem:[#allocation63_spill] sm:$0xff] %v3490_v14  ;;  %1102 = vmatmul.f32.gmra.mxu3 %v2685_v12 }
  0xf6   : > { %v893_v43 = vpop.f32.mrf.mxu2  ;;  %v1227_v17 = vpop.f32.mrf.mxu0 }
  0xf7   : > { %v987_v9 = vadd.f32 %v893_v43, %v651_v51  ;;  %v792_v51 = vrot.slane %v4212_v31, 2 }
  0xf8   : > { %v653_v10 = vpop.f32.mrf.mxu1  ;;  %v1055_v7 = vpop.f32.mrf.mxu3 }
  0xf9   : > { %v1149_v38 = vadd.f32 %v1055_v7, %v987_v9  ;;  %1274 = vmatmul.f32.gmra.mxu0 %v2853_v25  ;;  %v654_v50 = vadd.f32 %v653_v10, %v3348_v22  ;;  %v2345_v7 = vld [vmem:[%s4011_s1 + $0x2a0] sm:$0xff]  ;;  %v3523_v4 = vsel %vm743_vm1, %v790_v47, %v792_v51  ;;  %v4214_v10 = vld [vmem:[#allocation28_spill] sm:$0xff] }
  0xfa   : > { %4213 = vst [vmem:[#allocation65_spill] sm:$0xff] %v3523_v4  ;;  %1387 = vmatpush.msra.mxu1 %v2345_v7  ;;  %v2393_v47 = vld [vmem:[%s4011_s1 + $0x420] sm:$0xff] }
  0xfb   : > { %v3505_v14 = vadd.f32 %v1227_v17, %v1149_v38  ;;  %700 = vmatmul.f32.gmra.mxu1 %v2683_v11  ;;  %943 = vmatmul.f32.gmra.mxu2 %v3502_v34 }
  0xfc   : > { %1890 = vmatpush.msra.mxu0 %v2393_v47 }
  0xfd   : > { %4211 = vst [vmem:[#allocation64_spill] sm:$0xff] %v3505_v14  ;;  %1105 = vmatmul.f32.gmra.mxu3 %v2855_v27 }
  0xfe   : > { %v896_v43 = vpop.f32.mrf.mxu2  ;;  %v1230_v17 = vpop.f32.mrf.mxu0 }
  0xff   : > { %v988_v9 = vadd.f32 %v896_v43, %v654_v50  ;;  %v794_v50 = vrot.slane %v2855_v27, 2  ;;  %v795_v43 = vrot.slane %v4216_v20, 2 }
 0x100   : > { %v656_v38 = vpop.f32.mrf.mxu1  ;;  %v1058_v52 = vpop.f32.mrf.mxu3 }
 0x101   : > { %v1150_v22 = vadd.f32 %v1058_v52, %v988_v9  ;;  %1277 = vmatmul.f32.gmra.mxu0 %v4214_v10  ;;  %v657_v14 = vadd.f32 %v656_v38, %v3371_v41  ;;  %v4218_v10 = vld [vmem:[#allocation31_spill] sm:$0xff]  ;;  %v2360_v41 = vld [vmem:[%s4011_s1 + $0x318] sm:$0xff] }
 0x102   : > { %v4220_v38 = vld [vmem:[#allocation25_spill] sm:$0xff]  ;;  %1550 = vmatpush.msra.mxu2 %v2360_v41 }
 0x103   : > { %v3526_v31 = vadd.f32 %v1230_v17, %v1150_v22  ;;  %703 = vmatmul.f32.gmra.mxu1 %v2685_v12  ;;  %946 = vmatmul.f32.gmra.mxu2 %v3523_v4  ;;  %v3538_v22 = vsel %vm743_vm1, %v794_v50, %v795_v43 }
 0x104   : > { %4217 = vst [vmem:[#allocation21_spill] sm:$0xff] %v3538_v22 }
 0x105   : > { %4215 = vst [vmem:[#allocation66_spill] sm:$0xff] %v3526_v31  ;;  %1108 = vmatmul.f32.gmra.mxu3 %v4216_v20 }
 0x106   : > { %v899_v51 = vpop.f32.mrf.mxu2  ;;  %v1233_v9 = vpop.f32.mrf.mxu0 }
 0x107   : > { %v989_v17 = vadd.f32 %v899_v51, %v657_v14  ;;  %v4221_v14 = vmax.f32 %v4220_v38, 0.0  ;;  %v4222_v51 = vld [vmem:[#allocation34_spill] sm:$0xff] }
 0x108   : > { %v659_v7 = vpop.f32.mrf.mxu1  ;;  %v1061_v52 = vpop.f32.mrf.mxu3 }
 0x109   : > { %v1151_v31 = vadd.f32 %v1061_v52, %v989_v17  ;;  %1280 = vmatmul.f32.gmra.mxu0 %v4218_v10  ;;  %v797_v47 = vrot.slane %v4221_v14, 2  ;;  %v660_v50 = vadd.f32 %v659_v7, %v3394_v46  ;;  %v4223_v7 = vld [vmem:[#allocation40_spill] sm:$0xff] }
 0x10b   : > { %v3541_v4 = vadd.f32 %v1233_v9, %v1151_v31  ;;  %706 = vmatmul.f32.gmra.mxu1 %v2855_v27  ;;  %949 = vmatmul.f32.gmra.mxu2 %v3538_v22  ;;  %v2376_v31 = vld [vmem:[%s4011_s1 + $0x398] sm:$0xff]  ;;  %v3559_v41 = vsel %vm743_vm1, %v795_v43, %v797_v47 }
 0x10c   : > { %1722 = vmatpush.msra.mxu3 %v2376_v31  ;;  %v4225_v31 = vld [vmem:[#allocation35_spill] sm:$0xff] }
 0x10d   : > { %4219 = vst [vmem:[#allocation67_spill] sm:$0xff] %v3541_v4  ;;  %1111 = vmatmul.f32.gmra.mxu3 %v4222_v51  ;;  %v2344_v4 = vld [vmem:[%s4011_s1 + $0x298] sm:$0xff] }
 0x10e   : > { %v902_v9 = vpop.f32.mrf.mxu2  ;;  %v1236_v17 = vpop.f32.mrf.mxu0  ;;  %1388 = vmatpush.msra.mxu1 %v2344_v4  ;;  %v2392_v4 = vld [vmem:[%s4011_s1 + $0x418] sm:$0xff] }
 0x10f   : > { %v990_v52 = vadd.f32 %v902_v9, %v660_v50  ;;  %v799_v50 = vrot.slane %v4222_v51, 2  ;;  %v800_v9 = vrot.slane %v4225_v31, 2  ;;  %1891 = vmatpush.msra.mxu0 %v2392_v4  ;;  %v4228_v4 = vld [vmem:[#allocation3_spill] sm:$0xff] }
 0x110   : > { %v662_v10 = vpop.f32.mrf.mxu1  ;;  %v1064_v38 = vpop.f32.mrf.mxu3 }
 0x111   : > { %v1152_v46 = vadd.f32 %v1064_v38, %v990_v52  ;;  %1283 = vmatmul.f32.gmra.mxu0 %v4223_v7  ;;  %v663_v22 = vadd.f32 %v662_v10, %v3417_v28  ;;  %v2359_v28 = vld [vmem:[%s4011_s1 + $0x310] sm:$0xff]  ;;  %v4227_v10 = vmax.f32 %v3082_v63, 0.0 }
 0x112   : > { %1551 = vmatpush.msra.mxu2 %v2359_v28 }
 0x113   : > { %v3562_v14 = vadd.f32 %v1236_v17, %v1152_v46  ;;  %709 = vmatmul.f32.gmra.mxu1 %v4216_v20  ;;  %952 = vmatmul.f32.gmra.mxu2 %v3559_v41  ;;  %v3574_v46 = vsel %vm743_vm1, %v799_v50, %v800_v9 }
 0x115   : > { %4224 = vst [vmem:[#allocation25_spill] sm:$0xff] %v3562_v14  ;;  %1114 = vmatmul.f32.gmra.mxu3 %v4225_v31 }
 0x116   : > { %v905_v43 = vpop.f32.mrf.mxu2  ;;  %v1239_v47 = vpop.f32.mrf.mxu0 }
 0x117   : > { %v991_v17 = vadd.f32 %v905_v43, %v663_v22  ;;  %v802_v22 = vrot.slane %v4227_v10, 2 }
 0x118   : > { %v665_v52 = vpop.f32.mrf.mxu1  ;;  %v1067_v38 = vpop.f32.mrf.mxu3 }
 0x119   : > { %v1153_v14 = vadd.f32 %v1067_v38, %v991_v17  ;;  %1286 = vmatmul.f32.gmra.mxu0 %v3150_v56  ;;  %v666_v50 = vadd.f32 %v665_v52, %v3440_v60  ;;  %v2343_v38 = vld [vmem:[%s4011_s1 + $0x290] sm:$0xff]  ;;  %v3595_v28 = vsel %vm743_vm1, %v800_v9, %v802_v22  ;;  %v4230_v52 = vld [vmem:[#allocation7_spill] sm:$0xff] }
 0x11a   : > { %4229 = vst [vmem:[#allocation35_spill] sm:$0xff] %v3595_v28  ;;  %1389 = vmatpush.msra.mxu1 %v2343_v38  ;;  %v2391_v9 = vld [vmem:[%s4011_s1 + $0x410] sm:$0xff] }
 0x11b   : > { %v3577_v7 = vadd.f32 %v1239_v47, %v1153_v14  ;;  %712 = vmatmul.f32.gmra.mxu1 %v4222_v51  ;;  %955 = vmatmul.f32.gmra.mxu2 %v3574_v46  ;;  %v2375_v14 = vld [vmem:[%s4011_s1 + $0x390] sm:$0xff] }
 0x11c   : > { %1723 = vmatpush.msra.mxu3 %v2375_v14  ;;  %v4232_v14 = vld [vmem:[#allocation4_spill] sm:$0xff]  ;;  %1892 = vmatpush.msra.mxu0 %v2391_v9 }
 0x11d   : > { %4226 = vst [vmem:[#allocation34_spill] sm:$0xff] %v3577_v7  ;;  %1117 = vmatmul.f32.gmra.mxu3 %v4228_v4 }
 0x11e   : > { %v908_v43 = vpop.f32.mrf.mxu2  ;;  %v1242_v47 = vpop.f32.mrf.mxu0 }
 0x11f   : > { %v992_v17 = vadd.f32 %v908_v43, %v666_v50  ;;  %v804_v50 = vrot.slane %v4228_v4, 2  ;;  %v805_v43 = vrot.slane %v4232_v14, 2 }
 0x120   : > { %v668_v7 = vpop.f32.mrf.mxu1  ;;  %v1070_v63 = vpop.f32.mrf.mxu3 }
 0x121   : > { %v1154_v60 = vadd.f32 %v1070_v63, %v992_v17  ;;  %1289 = vmatmul.f32.gmra.mxu0 %v4230_v52  ;;  %v669_v56 = vadd.f32 %v668_v7, %v3463_v30  ;;  %v4234_v52 = vld [vmem:[#allocation13_spill] sm:$0xff]  ;;  %v2358_v30 = vld [vmem:[%s4011_s1 + $0x308] sm:$0xff] }
 0x122   : > { %v4236_v7 = vld [vmem:[#allocation5_spill] sm:$0xff]  ;;  %1552 = vmatpush.msra.mxu2 %v2358_v30 }
 0x123   : > { %v3598_v10 = vadd.f32 %v1242_v47, %v1154_v60  ;;  %715 = vmatmul.f32.gmra.mxu1 %v4225_v31  ;;  %958 = vmatmul.f32.gmra.mxu2 %v3595_v28  ;;  %v3610_v60 = vsel %vm743_vm1, %v804_v50, %v805_v43 }
 0x124   : > { %4233 = vst [vmem:[#allocation4_spill] sm:$0xff] %v3610_v60 }
 0x125   : > { %4231 = vst [vmem:[#allocation3_spill] sm:$0xff] %v3598_v10  ;;  %1120 = vmatmul.f32.gmra.mxu3 %v4232_v14 }
 0x126   : > { %v911_v22 = vpop.f32.mrf.mxu2  ;;  %v1245_v17 = vpop.f32.mrf.mxu0 }
 0x127   : > { %v993_v47 = vadd.f32 %v911_v22, %v669_v56  ;;  %v4237_v56 = vmax.f32 %v4236_v7, 0.0  ;;  %v4238_v22 = vld [vmem:[#allocation12_spill] sm:$0xff] }
 0x128   : > { %v671_v38 = vpop.f32.mrf.mxu1  ;;  %v1073_v63 = vpop.f32.mrf.mxu3 }
 0x129   : > { %v1155_v10 = vadd.f32 %v1073_v63, %v993_v47  ;;  %1292 = vmatmul.f32.gmra.mxu0 %v4234_v52  ;;  %v807_v9 = vrot.slane %v4237_v56, 2  ;;  %v672_v50 = vadd.f32 %v671_v38, %v3283_v58  ;;  %v4240_v38 = vld [vmem:[#allocation17_spill] sm:$0xff] }
 0x12b   : > { %v3613_v28 = vadd.f32 %v1245_v17, %v1155_v10  ;;  %718 = vmatmul.f32.gmra.mxu1 %v4228_v4  ;;  %961 = vmatmul.f32.gmra.mxu2 %v3610_v60  ;;  %v2374_v10 = vld [vmem:[%s4011_s1 + $0x388] sm:$0xff]  ;;  %v3631_v30 = vsel %vm743_vm1, %v805_v43, %v807_v9 }
 0x12c   : > { %1724 = vmatpush.msra.mxu3 %v2374_v10  ;;  %4239 = vst [vmem:[#allocation5_spill] sm:$0xff] %v3631_v30  ;;  %v4242_v10 = vld [vmem:[#allocation14_spill] sm:$0xff] }
 0x12d   : > { %4235 = vst [vmem:[#allocation68_spill] sm:$0xff] %v3613_v28  ;;  %1123 = vmatmul.f32.gmra.mxu3 %v4238_v22  ;;  %v2342_v28 = vld [vmem:[%s4011_s1 + $0x288] sm:$0xff] }
 0x12e   : > { %v914_v17 = vpop.f32.mrf.mxu2  ;;  %v1248_v47 = vpop.f32.mrf.mxu0  ;;  %1390 = vmatpush.msra.mxu1 %v2342_v28  ;;  %v2390_v28 = vld [vmem:[%s4011_s1 + $0x408] sm:$0xff] }
 0x12f   : > { %v994_v63 = vadd.f32 %v914_v17, %v672_v50  ;;  %v809_v50 = vrot.slane %v4238_v22, 2  ;;  %v810_v17 = vrot.slane %v4242_v10, 2  ;;  %1893 = vmatpush.msra.mxu0 %v2390_v28 }
 0x130   : > { %v674_v52 = vpop.f32.mrf.mxu1  ;;  %v1076_v7 = vpop.f32.mrf.mxu3 }
 0x131   : > { %v1156_v58 = vadd.f32 %v1076_v7, %v994_v63  ;;  %1295 = vmatmul.f32.gmra.mxu0 %v4240_v38  ;;  %v675_v60 = vadd.f32 %v674_v52, %v3307_v0  ;;  %v4244_v38 = vld [vmem:[#allocation23_spill] sm:$0xff]  ;;  %v2357_v0 = vld [vmem:[%s4011_s1 + $0x300] sm:$0xff] }
 0x132   : > { %v4246_v52 = vld [vmem:[#allocation15_spill] sm:$0xff]  ;;  %1553 = vmatpush.msra.mxu2 %v2357_v0 }
 0x133   : > { %v3634_v56 = vadd.f32 %v1248_v47, %v1156_v58  ;;  %721 = vmatmul.f32.gmra.mxu1 %v4232_v14  ;;  %964 = vmatmul.f32.gmra.mxu2 %v3631_v30  ;;  %v3646_v58 = vsel %vm743_vm1, %v809_v50, %v810_v17 }
 0x134   : > { %4243 = vst [vmem:[#allocation69_spill] sm:$0xff] %v3646_v58 }
 0x135   : > { %4241 = vst [vmem:[#allocation12_spill] sm:$0xff] %v3634_v56  ;;  %1126 = vmatmul.f32.gmra.mxu3 %v4242_v10 }
 0x136   : > { %v917_v43 = vpop.f32.mrf.mxu2  ;;  %v1251_v9 = vpop.f32.mrf.mxu0 }
 0x137   : > { %v995_v47 = vadd.f32 %v917_v43, %v675_v60  ;;  %v4247_v60 = vmax.f32 %v4246_v52, 0.0  ;;  %v4248_v43 = vld [vmem:[#allocation22_spill] sm:$0xff] }
 0x138   : > { %v677_v63 = vpop.f32.mrf.mxu1  ;;  %v1079_v7 = vpop.f32.mrf.mxu3 }
 0x139   : > { %v1157_v56 = vadd.f32 %v1079_v7, %v995_v47  ;;  %1298 = vmatmul.f32.gmra.mxu0 %v4244_v38  ;;  %v812_v28 = vrot.slane %v4247_v60, 2  ;;  %v678_v50 = vadd.f32 %v677_v63, %v3327_v37  ;;  %v4250_v63 = vld [vmem:[#allocation29_spill] sm:$0xff] }
 0x13b   : > { %v3649_v30 = vadd.f32 %v1251_v9, %v1157_v56  ;;  %724 = vmatmul.f32.gmra.mxu1 %v4238_v22  ;;  %967 = vmatmul.f32.gmra.mxu2 %v3646_v58  ;;  %v2373_v56 = vld [vmem:[%s4011_s1 + $0x380] sm:$0xff]  ;;  %v3667_v0 = vsel %vm743_vm1, %v810_v17, %v812_v28 }
 0x13c   : > { %1725 = vmatpush.msra.mxu3 %v2373_v56  ;;  %4249 = vst [vmem:[#allocation15_spill] sm:$0xff] %v3667_v0  ;;  %v4252_v56 = vld [vmem:[#allocation24_spill] sm:$0xff] }
 0x13d   : > { %4245 = vst [vmem:[#allocation70_spill] sm:$0xff] %v3649_v30  ;;  %1129 = vmatmul.f32.gmra.mxu3 %v4248_v43  ;;  %v2341_v30 = vld [vmem:[%s4011_s1 + $0x280] sm:$0xff] }
 0x13e   : > { %v920_v9 = vpop.f32.mrf.mxu2  ;;  %v1254_v47 = vpop.f32.mrf.mxu0  ;;  %1391 = vmatpush.msra.mxu1 %v2341_v30  ;;  %v2389_v30 = vld [vmem:[%s4011_s1 + $0x400] sm:$0xff] }
 0x13f   : > { %v996_v7 = vadd.f32 %v920_v9, %v678_v50  ;;  %v814_v50 = vrot.slane %v4248_v43, 2  ;;  %v815_v9 = vrot.slane %v4252_v56, 2  ;;  %1894 = vmatpush.msra.mxu0 %v2389_v30  ;;  %v4258_v30 = vld [vmem:[#allocation36_spill] sm:$0xff] }
 0x140   : > { %v680_v38 = vpop.f32.mrf.mxu1  ;;  %v1082_v52 = vpop.f32.mrf.mxu3 }
 0x141   : > { %v1158_v37 = vadd.f32 %v1082_v52, %v996_v7  ;;  %1301 = vmatmul.f32.gmra.mxu0 %v4250_v63  ;;  %v681_v58 = vadd.f32 %v680_v38, %v3353_v61  ;;  %v4254_v63 = vld [vmem:[#allocation37_spill] sm:$0xff]  ;;  %v4256_v61 = vld [vmem:[#allocation26_spill] sm:$0xff] }
 0x142   : > { %v4257_v38 = vmax.f32 %v4256_v61, 0.0  ;;  %v4262_v61 = vld [vmem:[#allocation38_spill] sm:$0xff] }
 0x143   : > { %v3670_v60 = vadd.f32 %v1254_v47, %v1158_v37  ;;  %727 = vmatmul.f32.gmra.mxu1 %v4242_v10  ;;  %970 = vmatmul.f32.gmra.mxu2 %v3667_v0  ;;  %v3682_v37 = vsel %vm743_vm1, %v814_v50, %v815_v9 }
 0x144   : > { %4253 = vst [vmem:[#allocation71_spill] sm:$0xff] %v3682_v37  ;;  %v817_v10 = vrot.slane %v4257_v38, 2  ;;  %v820_v38 = vrot.slane %v4262_v61, 2 }
 0x145   : > { %4251 = vst [vmem:[#allocation22_spill] sm:$0xff] %v3670_v60  ;;  %1132 = vmatmul.f32.gmra.mxu3 %v4252_v56 }
 0x146   : > { %v923_v17 = vpop.f32.mrf.mxu2  ;;  %v1257_v28 = vpop.f32.mrf.mxu0 }
 0x147   : > { %v997_v47 = vadd.f32 %v923_v17, %v681_v58 }
 0x148   : > { %v683_v7 = vpop.f32.mrf.mxu1  ;;  %v1085_v52 = vpop.f32.mrf.mxu3 }
 0x149   : > { %v1159_v60 = vadd.f32 %v1085_v52, %v997_v47  ;;  %1304 = vmatmul.f32.gmra.mxu0 %v4254_v63  ;;  %v684_v58 = vadd.f32 %v683_v7, %v3373_v8  ;;  %v264_v8 = vld [vmem:[%s2539_s12 + $0x188] sm:$0xff]  ;;  %v819_v7 = vrot.slane %v4258_v30, 2 }
 0x14b   : > { %v3685_v0 = vadd.f32 %v1257_v28, %v1159_v60  ;;  %730 = vmatmul.f32.gmra.mxu1 %v4248_v43  ;;  %973 = vmatmul.f32.gmra.mxu2 %v3682_v37  ;;  %v3694_v60 = vsel %vm743_vm1, %v815_v9, %v817_v10  ;;  %v263_v10 = vld [vmem:[%s2539_s12 + $0x180] sm:$0xff] }
 0x14c   : > { %4259 = vst [vmem:[#allocation26_spill] sm:$0xff] %v3694_v60 }
 0x14d   : > { %4255 = vst [vmem:[#allocation72_spill] sm:$0xff] %v3685_v0  ;;  %1135 = vmatmul.f32.gmra.mxu3 %v4258_v30  ;;  %v4260_v0 = vld [vmem:[#allocation41_spill] sm:$0xff] }
 0x14e   : > { %v926_v17 = vpop.f32.mrf.mxu2  ;;  %v1260_v50 = vpop.f32.mrf.mxu0 }
 0x14f   : > { %v998_v47 = vadd.f32 %v926_v17, %v684_v58  ;;  %v3707_v17 = vmax.f32 %v264_v8, 0.0  ;;  %v3722_v8 = vld [vmem:[%s2539_s12 + $0x190] sm:$0x3] }
 0x150   : > { %v686_v52 = vpop.f32.mrf.mxu1  ;;  %v1088_v63 = vpop.f32.mrf.mxu3 }
 0x151   : > { %v1160_v28 = vadd.f32 %v1088_v63, %v998_v47  ;;  %1307 = vmatmul.f32.gmra.mxu0 %v4260_v0  ;;  %v687_v58 = vadd.f32 %v686_v52, %v3399_v3  ;;  %v3712_v0 = vmax.f32 %v263_v10, 0.0  ;;  %v1184_v52 = vrot.slane %v3707_v17, 1 }
 0x153   : > { %v3697_v37 = vadd.f32 %v1260_v50, %v1160_v28  ;;  %733 = vmatmul.f32.gmra.mxu1 %v4252_v56  ;;  %976 = vmatmul.f32.gmra.mxu2 %v3694_v60  ;;  %v1183_v3 = vrot.slane %v3712_v0, 1 }
 0x155   : > { %4261 = vst [vmem:[#allocation73_spill] sm:$0xff] %v3697_v37  ;;  %1138 = vmatmul.f32.gmra.mxu3 %v4262_v61  ;;  %v3710_v37 = vsel %vm743_vm1, %v819_v7, %v820_v38  ;;  %v4265_v7 = vmax.f32 %v3098_v36, 0.0 }
 0x156   : > { %v929_v63 = vpop.f32.mrf.mxu2  ;;  %v1263_v9 = vpop.f32.mrf.mxu0  ;;  %4263 = vst [vmem:[#allocation38_spill] sm:$0xff] %v3710_v37 }
 0x157   : > { %v999_v50 = vadd.f32 %v929_v63, %v687_v58  ;;  %v822_v58 = vrot.slane %v4265_v7, 2 }
 0x158   : > { %v689_v47 = vpop.f32.mrf.mxu1  ;;  %v1091_v28 = vpop.f32.mrf.mxu3 }
 0x159   : > { %v1161_v60 = vadd.f32 %v1091_v28, %v999_v50  ;;  %1310 = vmatmul.f32.gmra.mxu0 %v3154_v39  ;;  %v690_v10 = vadd.f32 %v689_v47, %v3419_v32  ;;  %v3729_v28 = vsel %vm387_vm0, %v1183_v3, %v1184_v52 }
 0x15b   : > { %v3717_v56 = vadd.f32 %v1263_v9, %v1161_v60  ;;  %736 = vmatmul.f32.gmra.mxu1 %v4258_v30  ;;  %979 = vmatmul.f32.gmra.mxu2 %v3710_v37  ;;  %v319_v60 = vmax.f32 %v3722_v8, 0.0  ;;  %v3733_v37 = vsel %vm743_vm1, %v820_v38, %v822_v58 }
 0x15d   : > { %4264 = vst [vmem:[#allocation74_spill] sm:$0xff] %v3717_v56  ;;  %1141 = vmatmul.f32.gmra.mxu3 %v3712_v0  ;;  %v1186_v36 = vrot.slane %v319_v60, 1 }
 0x15e   : > { %v932_v63 = vpop.f32.mrf.mxu2  ;;  %v1266_v50 = vpop.f32.mrf.mxu0 }
 0x15f   : > { %v1000_v9 = vadd.f32 %v932_v63, %v690_v10  ;;  %v3745_v38 = vsel %vm387_vm0, %v1184_v52, %v1186_v36 }
 0x160   : > { %v692_v56 = vpop.f32.mrf.mxu1  ;;  %v1094_v39 = vpop.f32.mrf.mxu3 }
 0x161   : > { %v1162_v30 = vadd.f32 %v1094_v39, %v1000_v9  ;;  %1313 = vmatmul.f32.gmra.mxu0 %v3729_v28  ;;  %v693_v47 = vadd.f32 %v692_v56, %v3445_v54 }
 0x163   : > { %v3738_v32 = vadd.f32 %v1266_v50, %v1162_v30  ;;  %739 = vmatmul.f32.gmra.mxu1 %v4262_v61  ;;  %982 = vmatmul.f32.gmra.mxu2 %v3733_v37 }
 0x165   : > { %1144 = vmatmul.f32.gmra.mxu3 %v3707_v17 }
 0x166   : > { %v935_v3 = vpop.f32.mrf.mxu2  ;;  %v1269_v7 = vpop.f32.mrf.mxu0 }
 0x167   : > { %v1001_v39 = vadd.f32 %v935_v3, %v693_v47 }
 0x168   : > { %v695_v58 = vpop.f32.mrf.mxu1  ;;  %v1097_v10 = vpop.f32.mrf.mxu3 }
 0x169   : > { %v1163_v63 = vadd.f32 %v1097_v10, %v1001_v39  ;;  %1316 = vmatmul.f32.gmra.mxu0 %v3745_v38  ;;  %v696_v54 = vadd.f32 %v695_v58, %v3300_v16 }
 0x16b   : > { %v3748_v30 = vadd.f32 %v1269_v7, %v1163_v63  ;;  %1392 = vmatmul.f32.vlgmr.msra.gmra.mxu1 %v3194_v44  ;;  %1554 = vmatmul.f32.vlgmr.msra.gmra.mxu2 %v2920_v2 }
 0x16d   : > { %1726 = vmatmul.f32.vlgmr.msra.gmra.mxu3 %v3001_v5 }
 0x16e   : > { %v938_v56 = vpop.f32.mrf.mxu2  ;;  %v1272_v50 = vpop.f32.mrf.mxu0 }
 0x16f   : > { %v1002_v52 = vadd.f32 %v938_v56, %v696_v54 }
 0x170   : > { %v698_v9 = vpop.f32.mrf.mxu1  ;;  %v1100_v36 = vpop.f32.mrf.mxu3 }
 0x171   : > { %v1164_v47 = vadd.f32 %v1100_v36, %v1002_v52  ;;  %1895 = vmatmul.f32.vlgmr.msra.gmra.mxu0 %v3224_v23  ;;  %v699_v2 = vadd.f32 %v698_v9, %v3323_v35 }
 0x173   : > { %v3755_v3 = vadd.f32 %v1272_v50, %v1164_v47  ;;  %1395 = vmatmul.f32.gmra.mxu1 %v3212_v57  ;;  %1557 = vmatmul.f32.gmra.mxu2 %v2922_v45 }
 0x175   : > { %1729 = vmatmul.f32.gmra.mxu3 %v3090_v48 }
 0x176   : > { %v941_v44 = vpop.f32.mrf.mxu2  ;;  %v1275_v5 = vpop.f32.mrf.mxu0 }
 0x177   : > { %v1003_v16 = vadd.f32 %v941_v44, %v699_v2 }
 0x178   : > { %v701_v7 = vpop.f32.mrf.mxu1  ;;  %v1103_v39 = vpop.f32.mrf.mxu3 }
 0x179   : > { %v1165_v58 = vadd.f32 %v1103_v39, %v1003_v16  ;;  %1898 = vmatmul.f32.gmra.mxu0 %v3242_v6  ;;  %v702_v45 = vadd.f32 %v701_v7, %v3346_v55 }
 0x17b   : > { %v3762_v10 = vadd.f32 %v1275_v5, %v1165_v58  ;;  %1398 = vmatmul.f32.gmra.mxu1 %v3224_v23  ;;  %1560 = vmatmul.f32.gmra.mxu2 %v3093_v33 }
 0x17d   : > { %1732 = vmatmul.f32.gmra.mxu3 %v3141_v59 }
 0x17e   : > { %v944_v57 = vpop.f32.mrf.mxu2  ;;  %v1278_v48 = vpop.f32.mrf.mxu0 }
 0x17f   : > { %v1004_v35 = vadd.f32 %v944_v57, %v702_v45  ;;  %v4267_v57 = vld [vmem:[#allocation46_spill] sm:$0xff] }
 0x180   : > { %v704_v63 = vpop.f32.mrf.mxu1  ;;  %v1106_v54 = vpop.f32.mrf.mxu3 }
 0x181   : > { %v1166_v56 = vadd.f32 %v1106_v54, %v1004_v35  ;;  %1901 = vmatmul.f32.gmra.mxu0 %v3254_v53  ;;  %v705_v33 = vadd.f32 %v704_v63, %v3369_v49  ;;  %v4268_v35 = vld [vmem:[#allocation9_spill] sm:$0xff]  ;;  %v4270_v63 = vld [vmem:[#allocation16_spill] sm:$0xff] }
 0x183   : > { %v3769_v50 = vadd.f32 %v1278_v48, %v1166_v56  ;;  %1401 = vmatmul.f32.gmra.mxu1 %v3242_v6  ;;  %1563 = vmatmul.f32.gmra.mxu2 %v3095_v29 }
 0x185   : > { %1735 = vmatmul.f32.gmra.mxu3 %v3167_v1 }
 0x186   : > { %v947_v23 = vpop.f32.mrf.mxu2  ;;  %v1281_v59 = vpop.f32.mrf.mxu0 }
 0x187   : > { %v1005_v55 = vadd.f32 %v947_v23, %v705_v33 }
 0x188   : > { %v707_v52 = vpop.f32.mrf.mxu1  ;;  %v1109_v9 = vpop.f32.mrf.mxu3 }
 0x189   : > { %v1167_v36 = vadd.f32 %v1109_v9, %v1005_v55  ;;  %1904 = vmatmul.f32.gmra.mxu0 %v3272_v26  ;;  %v708_v29 = vadd.f32 %v707_v52, %v3392_v13  ;;  %v4271_v55 = vld [vmem:[#allocation48_spill] sm:$0xff]  ;;  %v4272_v9 = vld [vmem:[#allocation11_spill] sm:$0xff] }
 0x18b   : > { %v3776_v47 = vadd.f32 %v1281_v59, %v1167_v36  ;;  %1404 = vmatmul.f32.gmra.mxu1 %v3254_v53  ;;  %1566 = vmatmul.f32.gmra.mxu2 %v2556_v18  ;;  %v4266_v53 = vld [vmem:[#allocation8_spill] sm:$0xff] }
 0x18d   : > { %1738 = vmatmul.f32.gmra.mxu3 %v2603_v42 }
 0x18e   : > { %v950_v6 = vpop.f32.mrf.mxu2  ;;  %v1284_v1 = vpop.f32.mrf.mxu0 }
 0x18f   : > { %v1006_v49 = vadd.f32 %v950_v6, %v708_v29  ;;  %v4274_v29 = vld [vmem:[#allocation20_spill] sm:$0xff] }
 0x190   : > { %v710_v2 = vpop.f32.mrf.mxu1  ;;  %v1112_v44 = vpop.f32.mrf.mxu3 }
 0x191   : > { %v1168_v5 = vadd.f32 %v1112_v44, %v1006_v49  ;;  %1907 = vmatmul.f32.gmra.mxu0 %v3286_v15  ;;  %v711_v18 = vadd.f32 %v710_v2, %v3415_v40 }
 0x193   : > { %v3783_v16 = vadd.f32 %v1284_v1, %v1168_v5  ;;  %1407 = vmatmul.f32.gmra.mxu1 %v3272_v26  ;;  %1569 = vmatmul.f32.gmra.mxu2 %v2558_v19  ;;  %v4269_v26 = vld [vmem:[#allocation57_spill] sm:$0xff] }
 0x195   : > { %1741 = vmatmul.f32.gmra.mxu3 %v4266_v53 }
 0x196   : > { %v953_v13 = vpop.f32.mrf.mxu2  ;;  %v1287_v42 = vpop.f32.mrf.mxu0 }
 0x197   : > { %v1007_v7 = vadd.f32 %v953_v13, %v711_v18  ;;  %v4275_v18 = vld [vmem:[#allocation50_spill] sm:$0xff] }
 0x198   : > { %v713_v39 = vpop.f32.mrf.mxu1  ;;  %v1115_v58 = vpop.f32.mrf.mxu3  ;;  %v4276_v13 = vld [vmem:[#allocation18_spill] sm:$0xff] }
 0x199   : > { %v1169_v45 = vadd.f32 %v1115_v58, %v1007_v7  ;;  %1910 = vmatmul.f32.gmra.mxu0 %v4267_v57  ;;  %v714_v19 = vadd.f32 %v713_v39, %v4269_v26  ;;  %v4278_v39 = vld [vmem:[#allocation27_spill] sm:$0xff] }
 0x19b   : > { %v3790_v48 = vadd.f32 %v1287_v42, %v1169_v45  ;;  %1410 = vmatmul.f32.gmra.mxu1 %v3286_v15  ;;  %1572 = vmatmul.f32.gmra.mxu2 %v4268_v35  ;;  %v4273_v15 = vld [vmem:[#allocation60_spill] sm:$0xff]  ;;  %v4277_v42 = vld [vmem:[#allocation45_spill] sm:$0xff] }
 0x19d   : > { %1744 = vmatmul.f32.gmra.mxu3 %v4270_v63  ;;  %v4279_v63 = vld [vmem:[#allocation52_spill] sm:$0xff] }
 0x19e   : > { %v956_v40 = vpop.f32.mrf.mxu2  ;;  %v1290_v54 = vpop.f32.mrf.mxu0 }
 0x19f   : > { %v1008_v56 = vadd.f32 %v956_v40, %v714_v19 }
 0x1a0   : > { %v716_v33 = vpop.f32.mrf.mxu1  ;;  %v1118_v23 = vpop.f32.mrf.mxu3 }
 0x1a1   : > { %v1170_v59 = vadd.f32 %v1118_v23, %v1008_v56  ;;  %1913 = vmatmul.f32.gmra.mxu0 %v4271_v55  ;;  %v717_v36 = vadd.f32 %v716_v33, %v4273_v15  ;;  %v4281_v56 = vld [vmem:[#allocation47_spill] sm:$0xff]  ;;  %v4282_v23 = vld [vmem:[#allocation30_spill] sm:$0xff] }
 0x1a3   : > { %v3797_v52 = vadd.f32 %v1290_v54, %v1170_v59  ;;  %1413 = vmatmul.f32.gmra.mxu1 %v4267_v57  ;;  %1575 = vmatmul.f32.gmra.mxu2 %v4272_v9  ;;  %v4280_v54 = vld [vmem:[#allocation19_spill] sm:$0xff] }
 0x1a5   : > { %1747 = vmatmul.f32.gmra.mxu3 %v4274_v29 }
 0x1a6   : > { %v959_v6 = vpop.f32.mrf.mxu2  ;;  %v1293_v1 = vpop.f32.mrf.mxu0 }
 0x1a7   : > { %v1009_v49 = vadd.f32 %v959_v6, %v717_v36  ;;  %v4283_v6 = vld [vmem:[#allocation54_spill] sm:$0xff] }
 0x1a8   : > { %v719_v2 = vpop.f32.mrf.mxu1  ;;  %v1121_v44 = vpop.f32.mrf.mxu3 }
 0x1a9   : > { %v1171_v5 = vadd.f32 %v1121_v44, %v1009_v49  ;;  %1916 = vmatmul.f32.gmra.mxu0 %v4275_v18  ;;  %v720_v7 = vadd.f32 %v719_v2, %v4277_v42  ;;  %v4284_v49 = vld [vmem:[#allocation32_spill] sm:$0xff]  ;;  %v4285_v2 = vld [vmem:[#allocation49_spill] sm:$0xff] }
 0x1ab   : > { %v3804_v53 = vadd.f32 %v1293_v1, %v1171_v5  ;;  %1416 = vmatmul.f32.gmra.mxu1 %v4271_v55  ;;  %1578 = vmatmul.f32.gmra.mxu2 %v4276_v13  ;;  %v4286_v5 = vld [vmem:[#allocation39_spill] sm:$0xff] }
 0x1ad   : > { %1750 = vmatmul.f32.gmra.mxu3 %v4278_v39 }
 0x1ae   : > { %v962_v58 = vpop.f32.mrf.mxu2  ;;  %v1296_v45 = vpop.f32.mrf.mxu0 }
 0x1af   : > { %v1010_v57 = vadd.f32 %v962_v58, %v720_v7 }
 0x1b0   : > { %v722_v35 = vpop.f32.mrf.mxu1  ;;  %v1124_v26 = vpop.f32.mrf.mxu3 }
 0x1b1   : > { %v1172_v19 = vadd.f32 %v1124_v26, %v1010_v57  ;;  %1919 = vmatmul.f32.gmra.mxu0 %v4279_v63  ;;  %v723_v33 = vadd.f32 %v722_v35, %v4281_v56  ;;  %v4288_v35 = vld [vmem:[#allocation33_spill] sm:$0xff]  ;;  %v4289_v26 = vld [vmem:[#allocation51_spill] sm:$0xff] }
 0x1b3   : > { %v3811_v40 = vadd.f32 %v1296_v45, %v1172_v19  ;;  %1419 = vmatmul.f32.gmra.mxu1 %v4275_v18  ;;  %1581 = vmatmul.f32.gmra.mxu2 %v4280_v54  ;;  %v4287_v45 = vld [vmem:[#allocation56_spill] sm:$0xff] }
 0x1b5   : > { %1753 = vmatmul.f32.gmra.mxu3 %v4282_v23 }
 0x1b6   : > { %v965_v59 = vpop.f32.mrf.mxu2  ;;  %v1299_v55 = vpop.f32.mrf.mxu0 }
 0x1b7   : > { %v1011_v9 = vadd.f32 %v965_v59, %v723_v33 }
 0x1b8   : > { %v725_v15 = vpop.f32.mrf.mxu1  ;;  %v1127_v36 = vpop.f32.mrf.mxu3 }
 0x1b9   : > { %v1173_v29 = vadd.f32 %v1127_v36, %v1011_v9  ;;  %1922 = vmatmul.f32.gmra.mxu0 %v4283_v6  ;;  %v726_v44 = vadd.f32 %v725_v15, %v4285_v2  ;;  %v4291_v9 = vld [vmem:[#allocation59_spill] sm:$0xff]  ;;  %v4292_v36 = vld [vmem:[#allocation2_spill] sm:$0xff] }
 0x1bb   : > { %v3818_v1 = vadd.f32 %v1299_v55, %v1173_v29  ;;  %1422 = vmatmul.f32.gmra.mxu1 %v4279_v63  ;;  %1584 = vmatmul.f32.gmra.mxu2 %v4284_v49  ;;  %v4290_v63 = vld [vmem:[#allocation42_spill] sm:$0xff]  ;;  %v4293_v29 = vld [vmem:[#allocation53_spill] sm:$0xff] }
 0x1bc   : > { %v4294_v49 = vld [vmem:[#allocation6_spill] sm:$0xff] }
 0x1bd   : > { %1756 = vmatmul.f32.gmra.mxu3 %v4286_v5 }
 0x1be   : > { %v968_v18 = vpop.f32.mrf.mxu2  ;;  %v1302_v13 = vpop.f32.mrf.mxu0 }
 0x1bf   : > { %v1012_v42 = vadd.f32 %v968_v18, %v726_v44 }
 0x1c0   : > { %v728_v7 = vpop.f32.mrf.mxu1  ;;  %v1130_v39 = vpop.f32.mrf.mxu3 }
 0x1c1   : > { %v1174_v58 = vadd.f32 %v1130_v39, %v1012_v42  ;;  %1925 = vmatmul.f32.gmra.mxu0 %v4287_v45  ;;  %v729_v19 = vadd.f32 %v728_v7, %v4289_v26  ;;  %v4295_v7 = vld [vmem:[#allocation62_spill] sm:$0xff] }
 0x1c3   : > { %v3825_v57 = vadd.f32 %v1302_v13, %v1174_v58  ;;  %1425 = vmatmul.f32.gmra.mxu1 %v4283_v6  ;;  %1587 = vmatmul.f32.gmra.mxu2 %v4288_v35  ;;  %v4296_v58 = vld [vmem:[#allocation55_spill] sm:$0xff]  ;;  %v4297_v35 = vld [vmem:[#allocation10_spill] sm:$0xff] }
 0x1c5   : > { %1759 = vmatmul.f32.gmra.mxu3 %v4290_v63 }
 0x1c6   : > { %v971_v54 = vpop.f32.mrf.mxu2  ;;  %v1305_v56 = vpop.f32.mrf.mxu0 }
 0x1c7   : > { %v1013_v33 = vadd.f32 %v971_v54, %v729_v19 }
 0x1c8   : > { %v731_v23 = vpop.f32.mrf.mxu1  ;;  %v1133_v59 = vpop.f32.mrf.mxu3 }
 0x1c9   : > { %v1175_v55 = vadd.f32 %v1133_v59, %v1013_v33  ;;  %1928 = vmatmul.f32.gmra.mxu0 %v4291_v9  ;;  %v732_v6 = vadd.f32 %v731_v23, %v4293_v29  ;;  %v4298_v59 = vld [vmem:[#allocation58_spill] sm:$0xff] }
 0x1cb   : > { %v3832_v15 = vadd.f32 %v1305_v56, %v1175_v55  ;;  %1428 = vmatmul.f32.gmra.mxu1 %v4287_v45  ;;  %1590 = vmatmul.f32.gmra.mxu2 %v4292_v36 }
 0x1cd   : > { %1762 = vmatmul.f32.gmra.mxu3 %v4294_v49 }
 0x1ce   : > { %v974_v2 = vpop.f32.mrf.mxu2  ;;  %v1308_v44 = vpop.f32.mrf.mxu0 }
 0x1cf   : > { %v1014_v5 = vadd.f32 %v974_v2, %v732_v6 }
 0x1d0   : > { %v734_v18 = vpop.f32.mrf.mxu1  ;;  %v1136_v13 = vpop.f32.mrf.mxu3 }
 0x1d1   : > { %v1176_v42 = vadd.f32 %v1136_v13, %v1014_v5  ;;  %1931 = vmatmul.f32.gmra.mxu0 %v4295_v7  ;;  %v735_v45 = vadd.f32 %v734_v18, %v4296_v58  ;;  %v4300_v58 = vld [vmem:[#allocation65_spill] sm:$0xff] }
 0x1d3   : > { %v3839_v39 = vadd.f32 %v1308_v44, %v1176_v42  ;;  %1431 = vmatmul.f32.gmra.mxu1 %v4291_v9  ;;  %1593 = vmatmul.f32.gmra.mxu2 %v2562_v21  ;;  %v4299_v44 = vld [vmem:[#allocation61_spill] sm:$0xff] }
 0x1d5   : > { %1765 = vmatmul.f32.gmra.mxu3 %v4297_v35  ;;  %v4302_v35 = vld [vmem:[#allocation28_spill] sm:$0xff] }
 0x1d6   : > { %v977_v26 = vpop.f32.mrf.mxu2  ;;  %v1311_v19 = vpop.f32.mrf.mxu0 }
 0x1d7   : > { %v1015_v63 = vadd.f32 %v977_v26, %v735_v45 }
 0x1d8   : > { %v737_v54 = vpop.f32.mrf.mxu1  ;;  %v1139_v56 = vpop.f32.mrf.mxu3 }
 0x1d9   : > { %v1177_v33 = vadd.f32 %v1139_v56, %v1015_v63  ;;  %1934 = vmatmul.f32.gmra.mxu0 %v3487_v24  ;;  %v738_v21 = vadd.f32 %v737_v54, %v4298_v59 }
 0x1db   : > { %v3846_v23 = vadd.f32 %v1311_v19, %v1177_v33  ;;  %1434 = vmatmul.f32.gmra.mxu1 %v4295_v7  ;;  %1596 = vmatmul.f32.gmra.mxu2 %v2683_v11  ;;  %v4303_v33 = vld [vmem:[#allocation21_spill] sm:$0xff] }
 0x1dd   : > { %1768 = vmatmul.f32.gmra.mxu3 %v2769_v62 }
 0x1de   : > { %v980_v55 = vpop.f32.mrf.mxu2  ;;  %v1314_v9 = vpop.f32.mrf.mxu0 }
 0x1df   : > { %v1016_v36 = vadd.f32 %v980_v55, %v738_v21  ;;  %v4305_v21 = vld [vmem:[#allocation31_spill] sm:$0xff] }
 0x1e0   : > { %v740_v29 = vpop.f32.mrf.mxu1  ;;  %v1142_v6 = vpop.f32.mrf.mxu3 }
 0x1e1   : > { %v1178_v49 = vadd.f32 %v1142_v6, %v1016_v36  ;;  %1937 = vmatmul.f32.gmra.mxu0 %v3502_v34  ;;  %v741_v11 = vadd.f32 %v740_v29, %v4299_v44 }
 0x1e3   : > { %v3853_v2 = vadd.f32 %v1314_v9, %v1178_v49  ;;  %1437 = vmatmul.f32.gmra.mxu1 %v3487_v24  ;;  %1599 = vmatmul.f32.gmra.mxu2 %v2685_v12  ;;  %v4301_v12 = vld [vmem:[#allocation63_spill] sm:$0xff] }
 0x1e5   : > { %1771 = vmatmul.f32.gmra.mxu3 %v2853_v25 }
 0x1e6   : > { %v983_v62 = vpop.f32.mrf.mxu2  ;;  %v1317_v5 = vpop.f32.mrf.mxu0 }
 0x1e7   : > { %v1017_v18 = vadd.f32 %v983_v62, %v741_v11  ;;  %v4306_v11 = vld [vmem:[#allocation66_spill] sm:$0xff] }
 0x1e8   : > { %v1145_v13 = vpop.f32.mrf.mxu3  ;;  %v1393_v42 = vpop.f32.mrf.mxu1 }
 0x1e9   : > { %v1179_v7 = vadd.f32 %v1145_v13, %v1017_v18  ;;  %1940 = vmatmul.f32.gmra.mxu0 %v4300_v58  ;;  %v1489_v24 = vadd.f32 %v1393_v42, %v4301_v12  ;;  %v4307_v13 = vld [vmem:[#allocation40_spill] sm:$0xff] }
 0x1eb   : > { %v3860_v45 = vadd.f32 %v1317_v5, %v1179_v7  ;;  %1440 = vmatmul.f32.gmra.mxu1 %v3502_v34  ;;  %1602 = vmatmul.f32.gmra.mxu2 %v2855_v27  ;;  %v4304_v34 = vld [vmem:[#allocation64_spill] sm:$0xff] }
 0x1ed   : > { %1774 = vmatmul.f32.gmra.mxu3 %v4302_v35 }
 0x1ee   : > { %v1555_v25 = vpop.f32.mrf.mxu2  ;;  %v1896_v26 = vpop.f32.mrf.mxu0 }
 0x1ef   : > { %v1651_v19 = vadd.f32 %v1555_v25, %v1489_v24 }
 0x1f0   : > { %v1396_v63 = vpop.f32.mrf.mxu1  ;;  %v1727_v54 = vpop.f32.mrf.mxu3 }
 0x1f1   : > { %v1823_v56 = vadd.f32 %v1727_v54, %v1651_v19  ;;  %1943 = vmatmul.f32.gmra.mxu0 %v4303_v33  ;;  %v1490_v59 = vadd.f32 %v1396_v63, %v4304_v34 }
 0x1f3   : > { %v1992_v27 = vadd.f32 %v1896_v26, %v1823_v56  ;;  %1443 = vmatmul.f32.gmra.mxu1 %v4300_v58  ;;  %1605 = vmatmul.f32.gmra.mxu2 %v4216_v20  ;;  %v4309_v56 = vld [vmem:[#allocation43_spill] sm:$0xff] }
 0x1f5   : > { %2024 = vst [vmem:[%s3871_s9] sm:$0xff] %v1992_v27  ;;  %1777 = vmatmul.f32.gmra.mxu3 %v4305_v21  ;;  %v2094_v20 = vmul.f32 %v1992_v27, %v1992_v27 }
 0x1f6   : > { %v1558_v55 = vpop.f32.mrf.mxu2  ;;  %v1899_v9 = vpop.f32.mrf.mxu0 }
 0x1f7   : > { %v1652_v36 = vadd.f32 %v1558_v55, %v1490_v59 }
 0x1f8   : > { %v1399_v29 = vpop.f32.mrf.mxu1  ;;  %v1730_v6 = vpop.f32.mrf.mxu3 }
 0x1f9   : > { %v1824_v49 = vadd.f32 %v1730_v6, %v1652_v36  ;;  %1946 = vmatmul.f32.gmra.mxu0 %v3559_v41  ;;  %v1491_v62 = vadd.f32 %v1399_v29, %v4306_v11  ;;  %v4310_v36 = vld [vmem:[#allocation35_spill] sm:$0xff] }
 0x1fb   : > { %v1993_v44 = vadd.f32 %v1899_v9, %v1824_v49  ;;  %1446 = vmatmul.f32.gmra.mxu1 %v4303_v33  ;;  %1608 = vmatmul.f32.gmra.mxu2 %v4222_v51  ;;  %v4308_v51 = vld [vmem:[#allocation67_spill] sm:$0xff] }
 0x1fd   : > { %2025 = vst [vmem:[%s3871_s9 + $0x8] sm:$0xff] %v1993_v44  ;;  %v2056_v5 = vadd.f32 %v1993_v44, %v1992_v27  ;;  %v2095_v18 = vmul.f32 %v1993_v44, %v1993_v44  ;;  %1780 = vmatmul.f32.gmra.mxu3 %v4307_v13  ;;  %v4312_v44 = vld [vmem:[#allocation7_spill] sm:$0xff] }
 0x1fe   : > { %v1561_v42 = vpop.f32.mrf.mxu2  ;;  %v1902_v7 = vpop.f32.mrf.mxu0 }
 0x1ff   : > { %v2126_v58 = vadd.f32 %v2095_v18, %v2094_v20  ;;  %v1653_v12 = vadd.f32 %v1561_v42, %v1491_v62 }
 0x200   : > { %v1402_v24 = vpop.f32.mrf.mxu1  ;;  %v1733_v35 = vpop.f32.mrf.mxu3 }
 0x201   : > { %v1825_v25 = vadd.f32 %v1733_v35, %v1653_v12  ;;  %1949 = vmatmul.f32.gmra.mxu0 %v3574_v46  ;;  %v1492_v19 = vadd.f32 %v1402_v24, %v4308_v51  ;;  %v4315_v35 = vld [vmem:[#allocation13_spill] sm:$0xff] }
 0x203   : > { %v1994_v26 = vadd.f32 %v1902_v7, %v1825_v25  ;;  %1449 = vmatmul.f32.gmra.mxu1 %v3559_v41  ;;  %1611 = vmatmul.f32.gmra.mxu2 %v4225_v31  ;;  %v4311_v31 = vld [vmem:[#allocation25_spill] sm:$0xff]  ;;  %v4313_v7 = vld [vmem:[#allocation4_spill] sm:$0xff] }
 0x205   : > { %2026 = vst [vmem:[%s3871_s9 + $0x10] sm:$0xff] %v1994_v26  ;;  %v2057_v63 = vadd.f32 %v2056_v5, %v1994_v26  ;;  %v2096_v54 = vmul.f32 %v1994_v26, %v1994_v26  ;;  %1783 = vmatmul.f32.gmra.mxu3 %v4309_v56 }
 0x206   : > { %v1564_v33 = vpop.f32.mrf.mxu2  ;;  %v1905_v27 = vpop.f32.mrf.mxu0 }
 0x207   : > { %v2127_v34 = vadd.f32 %v2126_v58, %v2096_v54  ;;  %v1654_v59 = vadd.f32 %v1564_v33, %v1492_v19  ;;  %v4316_v33 = vld [vmem:[#allocation5_spill] sm:$0xff] }
 0x208   : > { %v1405_v21 = vpop.f32.mrf.mxu1  ;;  %v1736_v55 = vpop.f32.mrf.mxu3 }
 0x209   : > { %v1826_v9 = vadd.f32 %v1736_v55, %v1654_v59  ;;  %1952 = vmatmul.f32.gmra.mxu0 %v4310_v36  ;;  %v1493_v29 = vadd.f32 %v1405_v21, %v4311_v31  ;;  %v4318_v55 = vld [vmem:[#allocation17_spill] sm:$0xff] }
 0x20b   : > { %v1995_v41 = vadd.f32 %v1905_v27, %v1826_v9  ;;  %1452 = vmatmul.f32.gmra.mxu1 %v3574_v46  ;;  %1614 = vmatmul.f32.gmra.mxu2 %v4228_v4  ;;  %v4314_v4 = vld [vmem:[#allocation34_spill] sm:$0xff] }
 0x20d   : > { %2027 = vst [vmem:[%s3871_s9 + $0x18] sm:$0xff] %v1995_v41  ;;  %v2058_v6 = vadd.f32 %v2057_v63, %v1995_v41  ;;  %v2097_v49 = vmul.f32 %v1995_v41, %v1995_v41  ;;  %1786 = vmatmul.f32.gmra.mxu3 %v4312_v44  ;;  %v4319_v44 = vld [vmem:[#allocation69_spill] sm:$0xff] }
 0x20e   : > { %v1567_v20 = vpop.f32.mrf.mxu2  ;;  %v1908_v11 = vpop.f32.mrf.mxu0 }
 0x20f   : > { %v2128_v62 = vadd.f32 %v2127_v34, %v2097_v49  ;;  %v1655_v5 = vadd.f32 %v1567_v20, %v1493_v29 }
 0x210   : > { %v1408_v18 = vpop.f32.mrf.mxu1  ;;  %v1739_v13 = vpop.f32.mrf.mxu3 }
 0x211   : > { %v1827_v42 = vadd.f32 %v1739_v13, %v1655_v5  ;;  %1955 = vmatmul.f32.gmra.mxu0 %v4313_v7  ;;  %v1494_v58 = vadd.f32 %v1408_v18, %v4314_v4  ;;  %v4322_v13 = vld [vmem:[#allocation23_spill] sm:$0xff] }
 0x213   : > { %v1996_v46 = vadd.f32 %v1908_v11, %v1827_v42  ;;  %1455 = vmatmul.f32.gmra.mxu1 %v4310_v36  ;;  %1617 = vmatmul.f32.gmra.mxu2 %v4232_v14  ;;  %v4317_v14 = vld [vmem:[#allocation3_spill] sm:$0xff]  ;;  %v4321_v11 = vld [vmem:[#allocation68_spill] sm:$0xff] }
 0x215   : > { %2028 = vst [vmem:[%s3871_s9 + $0x20] sm:$0xff] %v1996_v46  ;;  %v2059_v12 = vadd.f32 %v2058_v6, %v1996_v46  ;;  %v2098_v24 = vmul.f32 %v1996_v46, %v1996_v46  ;;  %1789 = vmatmul.f32.gmra.mxu3 %v4315_v35  ;;  %v4323_v35 = vld [vmem:[#allocation15_spill] sm:$0xff] }
 0x216   : > { %v1570_v25 = vpop.f32.mrf.mxu2  ;;  %v1911_v26 = vpop.f32.mrf.mxu0 }
 0x217   : > { %v2129_v51 = vadd.f32 %v2128_v62, %v2098_v24  ;;  %v1656_v19 = vadd.f32 %v1570_v25, %v1494_v58 }
 0x218   : > { %v1411_v63 = vpop.f32.mrf.mxu1  ;;  %v1742_v54 = vpop.f32.mrf.mxu3 }
 0x219   : > { %v1828_v56 = vadd.f32 %v1742_v54, %v1656_v19  ;;  %1958 = vmatmul.f32.gmra.mxu0 %v4316_v33  ;;  %v1495_v34 = vadd.f32 %v1411_v63, %v4317_v14  ;;  %v4325_v54 = vld [vmem:[#allocation29_spill] sm:$0xff] }
 0x21b   : > { %v1997_v27 = vadd.f32 %v1911_v26, %v1828_v56  ;;  %1458 = vmatmul.f32.gmra.mxu1 %v4313_v7  ;;  %1620 = vmatmul.f32.gmra.mxu2 %v4238_v22  ;;  %v4320_v22 = vld [vmem:[#allocation14_spill] sm:$0xff]  ;;  %v4324_v26 = vld [vmem:[#allocation12_spill] sm:$0xff] }
 0x21d   : > { %2029 = vst [vmem:[%s3871_s9 + $0x28] sm:$0xff] %v1997_v27  ;;  %v2060_v59 = vadd.f32 %v2059_v12, %v1997_v27  ;;  %v2099_v21 = vmul.f32 %v1997_v27, %v1997_v27  ;;  %1792 = vmatmul.f32.gmra.mxu3 %v4318_v55  ;;  %v4326_v55 = vld [vmem:[#allocation71_spill] sm:$0xff] }
 0x21e   : > { %v1573_v9 = vpop.f32.mrf.mxu2  ;;  %v1914_v36 = vpop.f32.mrf.mxu0 }
 0x21f   : > { %v2130_v41 = vadd.f32 %v2129_v51, %v2099_v21  ;;  %v1657_v31 = vadd.f32 %v1573_v9, %v1495_v34 }
 0x220   : > { %v1414_v29 = vpop.f32.mrf.mxu1  ;;  %v1745_v6 = vpop.f32.mrf.mxu3 }
 0x221   : > { %v1829_v49 = vadd.f32 %v1745_v6, %v1657_v31  ;;  %1961 = vmatmul.f32.gmra.mxu0 %v4319_v44  ;;  %v1496_v62 = vadd.f32 %v1414_v29, %v4321_v11  ;;  %v4329_v6 = vld [vmem:[#allocation37_spill] sm:$0xff] }
 0x223   : > { %v1998_v20 = vadd.f32 %v1914_v36, %v1829_v49  ;;  %1461 = vmatmul.f32.gmra.mxu1 %v4316_v33  ;;  %1623 = vmatmul.f32.gmra.mxu2 %v4320_v22  ;;  %v4328_v36 = vld [vmem:[#allocation70_spill] sm:$0xff] }
 0x225   : > { %2030 = vst [vmem:[%s3871_s9 + $0x30] sm:$0xff] %v1998_v20  ;;  %v2061_v5 = vadd.f32 %v2060_v59, %v1998_v20  ;;  %v2100_v18 = vmul.f32 %v1998_v20, %v1998_v20  ;;  %1795 = vmatmul.f32.gmra.mxu3 %v4322_v13 }
 0x226   : > { %v1576_v42 = vpop.f32.mrf.mxu2  ;;  %v1917_v7 = vpop.f32.mrf.mxu0 }
 0x227   : > { %v2131_v46 = vadd.f32 %v2130_v41, %v2100_v18  ;;  %v1658_v4 = vadd.f32 %v1576_v42, %v1496_v62  ;;  %v4330_v18 = vld [vmem:[#allocation26_spill] sm:$0xff]  ;;  %v4331_v42 = vld [vmem:[#allocation36_spill] sm:$0xff] }
 0x228   : > { %v1417_v58 = vpop.f32.mrf.mxu1  ;;  %v1748_v12 = vpop.f32.mrf.mxu3 }
 0x229   : > { %v1830_v24 = vadd.f32 %v1748_v12, %v1658_v4  ;;  %1964 = vmatmul.f32.gmra.mxu0 %v4323_v35  ;;  %v1497_v51 = vadd.f32 %v1417_v58, %v4324_v26  ;;  %v4333_v12 = vld [vmem:[#allocation41_spill] sm:$0xff] }
 0x22b   : > { %v1999_v25 = vadd.f32 %v1917_v7, %v1830_v24  ;;  %1464 = vmatmul.f32.gmra.mxu1 %v4319_v44  ;;  %1626 = vmatmul.f32.gmra.mxu2 %v4248_v43  ;;  %v4327_v43 = vld [vmem:[#allocation24_spill] sm:$0xff]  ;;  %v4332_v7 = vld [vmem:[#allocation22_spill] sm:$0xff] }
 0x22d   : > { %2031 = vst [vmem:[%s3871_s9 + $0x38] sm:$0xff] %v1999_v25  ;;  %v2062_v19 = vadd.f32 %v2061_v5, %v1999_v25  ;;  %v2101_v63 = vmul.f32 %v1999_v25, %v1999_v25  ;;  %1798 = vmatmul.f32.gmra.mxu3 %v4325_v54  ;;  %v4334_v54 = vld [vmem:[#allocation38_spill] sm:$0xff] }
 0x22e   : > { %v1579_v56 = vpop.f32.mrf.mxu2  ;;  %v1920_v33 = vpop.f32.mrf.mxu0 }
 0x22f   : > { %v2132_v27 = vadd.f32 %v2131_v46, %v2101_v63  ;;  %v1659_v14 = vadd.f32 %v1579_v56, %v1497_v51 }
 0x230   : > { %v1420_v34 = vpop.f32.mrf.mxu1  ;;  %v1751_v59 = vpop.f32.mrf.mxu3 }
 0x231   : > { %v1831_v21 = vadd.f32 %v1751_v59, %v1659_v14  ;;  %1967 = vmatmul.f32.gmra.mxu0 %v4326_v55  ;;  %v1498_v41 = vadd.f32 %v1420_v34, %v4328_v36  ;;  %v4336_v59 = vld [vmem:[#allocation44_spill] sm:$0xff] }
 0x233   : > { %v2000_v9 = vadd.f32 %v1920_v33, %v1831_v21  ;;  %1467 = vmatmul.f32.gmra.mxu1 %v4323_v35  ;;  %1629 = vmatmul.f32.gmra.mxu2 %v4327_v43  ;;  %v4335_v33 = vld [vmem:[#allocation72_spill] sm:$0xff] }
 0x235   : > { %2032 = vst [vmem:[%s3871_s9 + $0x40] sm:$0xff] %v2000_v9  ;;  %v2063_v31 = vadd.f32 %v2062_v19, %v2000_v9  ;;  %v2102_v29 = vmul.f32 %v2000_v9, %v2000_v9  ;;  %1801 = vmatmul.f32.gmra.mxu3 %v4329_v6 }
 0x236   : > { %v1582_v49 = vpop.f32.mrf.mxu2  ;;  %v1923_v44 = vpop.f32.mrf.mxu0 }
 0x237   : > { %v2133_v20 = vadd.f32 %v2132_v27, %v2102_v29  ;;  %v1660_v22 = vadd.f32 %v1582_v49, %v1498_v41  ;;  %v1353_v29 = vrot.slane %v3707_v17, 2  ;;  %v4337_v49 = vld [vmem:[#allocation73_spill] sm:$0xff] }
 0x238   : > { %v1423_v11 = vpop.f32.mrf.mxu1  ;;  %v1754_v62 = vpop.f32.mrf.mxu3 }
 0x239   : > { %v1832_v5 = vadd.f32 %v1754_v62, %v1660_v22  ;;  %1970 = vmatmul.f32.gmra.mxu0 %v4330_v18  ;;  %v1499_v46 = vadd.f32 %v1423_v11, %v4332_v7  ;;  %v267_v7 = vld [vmem:[%s2539_s12 + $0x1a0] sm:$0xff] }
 0x23b   : > { %v2001_v13 = vadd.f32 %v1923_v44, %v1832_v5  ;;  %1470 = vmatmul.f32.gmra.mxu1 %v4326_v55  ;;  %1632 = vmatmul.f32.gmra.mxu2 %v4331_v42  ;;  %v266_v42 = vld [vmem:[%s2539_s12 + $0x198] sm:$0xff] }
 0x23d   : > { %2033 = vst [vmem:[%s3871_s9 + $0x48] sm:$0xff] %v2001_v13  ;;  %v2064_v4 = vadd.f32 %v2063_v31, %v2001_v13  ;;  %v2103_v58 = vmul.f32 %v2001_v13, %v2001_v13  ;;  %1804 = vmatmul.f32.gmra.mxu3 %v4333_v12  ;;  %v321_v12 = vmax.f32 %v267_v7, 0.0 }
 0x23e   : > { %v1585_v24 = vpop.f32.mrf.mxu2  ;;  %v1926_v35 = vpop.f32.mrf.mxu0 }
 0x23f   : > { %v2134_v25 = vadd.f32 %v2133_v20, %v2103_v58  ;;  %v1661_v26 = vadd.f32 %v1585_v24, %v1499_v46  ;;  %v1355_v24 = vrot.slane %v319_v60, 2 }
 0x240   : > { %v1426_v51 = vpop.f32.mrf.mxu1  ;;  %v1757_v19 = vpop.f32.mrf.mxu3 }
 0x241   : > { %v1833_v63 = vadd.f32 %v1757_v19, %v1661_v26  ;;  %1973 = vmatmul.f32.gmra.mxu0 %v4334_v54  ;;  %v1500_v27 = vadd.f32 %v1426_v51, %v4335_v33  ;;  %v1356_v8 = vsel %vm743_vm1, %v1353_v29, %v1355_v24 }
 0x243   : > { %v2002_v56 = vadd.f32 %v1926_v35, %v1833_v63  ;;  %1473 = vmatmul.f32.gmra.mxu1 %v4330_v18  ;;  %1635 = vmatmul.f32.gmra.mxu2 %v4262_v61  ;;  %v1352_v61 = vrot.slane %v3712_v0, 2  ;;  %v4338_v35 = vld [vmem:[#allocation74_spill] sm:$0xff] }
 0x245   : > { %2034 = vst [vmem:[%s3871_s9 + $0x50] sm:$0xff] %v2002_v56  ;;  %v2065_v14 = vadd.f32 %v2064_v4, %v2002_v56  ;;  %v2104_v34 = vmul.f32 %v2002_v56, %v2002_v56  ;;  %1807 = vmatmul.f32.gmra.mxu3 %v4336_v59  ;;  %v1354_v5 = vsel %vm743_vm1, %v1352_v61, %v1353_v29  ;;  %v1687_v56 = vrot.slane %v321_v12, 1 }
 0x246   : > { %v1588_v21 = vpop.f32.mrf.mxu2  ;;  %v1929_v55 = vpop.f32.mrf.mxu0 }
 0x247   : > { %v2135_v9 = vadd.f32 %v2134_v25, %v2104_v34  ;;  %v1662_v43 = vadd.f32 %v1588_v21, %v1500_v27  ;;  %v268_v27 = vld [vmem:[%s2539_s12 + $0x1a8] sm:$0x3] }
 0x248   : > { %v1429_v36 = vpop.f32.mrf.mxu1  ;;  %v1760_v41 = vpop.f32.mrf.mxu3  ;;  %v322_v59 = vmax.f32 %v268_v27, 0.0 }
 0x249   : > { %v1834_v31 = vadd.f32 %v1760_v41, %v1662_v43  ;;  %1976 = vmatmul.f32.gmra.mxu0 %v3733_v37  ;;  %v1501_v44 = vadd.f32 %v1429_v36, %v4337_v49 }
 0x24a   : > { %v1689_v61 = vrot.slane %v322_v59, 1 }
 0x24b   : > { %v2003_v6 = vadd.f32 %v1929_v55, %v1834_v31  ;;  %1476 = vmatmul.f32.gmra.mxu1 %v4334_v54  ;;  %1638 = vmatmul.f32.gmra.mxu2 %v3712_v0  ;;  %v320_v0 = vmax.f32 %v266_v42, 0.0  ;;  %v1856_v55 = vrot.slane %v321_v12, 2 }
 0x24d   : > { %2035 = vst [vmem:[%s3871_s9 + $0x58] sm:$0xff] %v2003_v6  ;;  %v2066_v20 = vadd.f32 %v2065_v14, %v2003_v6  ;;  %v2105_v22 = vmul.f32 %v2003_v6, %v2003_v6  ;;  %1810 = vmatmul.f32.gmra.mxu3 %v3729_v28  ;;  %v1686_v54 = vrot.slane %v320_v0, 1  ;;  %v1855_v21 = vrot.slane %v320_v0, 2 }
 0x24e   : > { %v1591_v11 = vpop.f32.mrf.mxu2  ;;  %v1932_v62 = vpop.f32.mrf.mxu0 }
 0x24f   : > { %v2136_v18 = vadd.f32 %v2135_v9, %v2105_v22  ;;  %v1663_v13 = vadd.f32 %v1591_v11, %v1501_v44  ;;  %v1688_v34 = vsel %vm387_vm0, %v1686_v54, %v1687_v56  ;;  %v1857_v29 = vsel %vm743_vm1, %v1855_v21, %v1856_v55 }
 0x250   : > { %v1432_v46 = vpop.f32.mrf.mxu1  ;;  %v1763_v4 = vpop.f32.mrf.mxu3  ;;  %v1690_v11 = vsel %vm387_vm0, %v1687_v56, %v1689_v61 }
 0x251   : > { %v1835_v58 = vadd.f32 %v1763_v4, %v1663_v13  ;;  %1979 = vmatmul.f32.gmra.mxu0 %v1354_v5  ;;  %v1502_v25 = vadd.f32 %v1432_v46, %v4338_v35 }
 0x253   : > { %v2004_v28 = vadd.f32 %v1932_v62, %v1835_v58  ;;  %1479 = vmatmul.f32.gmra.mxu1 %v3733_v37  ;;  %1641 = vmatmul.f32.gmra.mxu2 %v3707_v17  ;;  %v1858_v62 = vrot.slane %v322_v59, 2 }
 0x255   : > { %2036 = vst [vmem:[%s3871_s9 + $0x60] sm:$0xff] %v2004_v28  ;;  %v2067_v26 = vadd.f32 %v2066_v20, %v2004_v28  ;;  %v2106_v51 = vmul.f32 %v2004_v28, %v2004_v28  ;;  %1813 = vmatmul.f32.gmra.mxu3 %v3745_v38  ;;  %v1859_v46 = vsel %vm743_vm1, %v1856_v55, %v1858_v62 }
 0x256   : > { %v1594_v19 = vpop.f32.mrf.mxu2  ;;  %v1935_v63 = vpop.f32.mrf.mxu0 }
 0x257   : > { %v2137_v60 = vadd.f32 %v2136_v18, %v2106_v51  ;;  %v1664_v33 = vadd.f32 %v1594_v19, %v1502_v25 }
 0x258   : > { %v1435_v37 = vpop.f32.mrf.mxu1  ;;  %v1766_v14 = vpop.f32.mrf.mxu3 }
 0x259   : > { %v1836_v17 = vadd.f32 %v1766_v14, %v1664_v33  ;;  %1982 = vmatmul.f32.gmra.mxu0 %v1356_v8  ;;  %v1503_v9 = vadd.f32 %v1435_v37, %v3738_v32 }
 0x25b   : > { %v2005_v38 = vadd.f32 %v1935_v63, %v1836_v17  ;;  %1482 = vmatmul.f32.gmra.mxu1 %v1354_v5  ;;  %1644 = vmatmul.f32.gmra.mxu2 %v320_v0 }
 0x25d   : > { %2037 = vst [vmem:[%s3871_s9 + $0x68] sm:$0xff] %v2005_v38  ;;  %v2068_v43 = vadd.f32 %v2067_v26, %v2005_v38  ;;  %v2107_v36 = vmul.f32 %v2005_v38, %v2005_v38  ;;  %1816 = vmatmul.f32.gmra.mxu3 %v1688_v34 }
 0x25e   : > { %v1597_v41 = vpop.f32.mrf.mxu2  ;;  %v1938_v31 = vpop.f32.mrf.mxu0 }
 0x25f   : > { %v2138_v6 = vadd.f32 %v2137_v60, %v2107_v36  ;;  %v1665_v49 = vadd.f32 %v1597_v41, %v1503_v9 }
 0x260   : > { %v1438_v44 = vpop.f32.mrf.mxu1  ;;  %v1769_v20 = vpop.f32.mrf.mxu3 }
 0x261   : > { %v1837_v22 = vadd.f32 %v1769_v20, %v1665_v49  ;;  %1985 = vmatmul.f32.gmra.mxu0 %v1857_v29  ;;  %v1504_v5 = vadd.f32 %v1438_v44, %v3748_v30 }
 0x263   : > { %v2006_v32 = vadd.f32 %v1938_v31, %v1837_v22  ;;  %1485 = vmatmul.f32.gmra.mxu1 %v1356_v8  ;;  %1647 = vmatmul.f32.gmra.mxu2 %v321_v12 }
 0x265   : > { %2038 = vst [vmem:[%s3871_s9 + $0x70] sm:$0xff] %v2006_v32  ;;  %v2069_v18 = vadd.f32 %v2068_v43, %v2006_v32  ;;  %v2108_v13 = vmul.f32 %v2006_v32, %v2006_v32  ;;  %1819 = vmatmul.f32.gmra.mxu3 %v1690_v11 }
 0x266   : > { %v1600_v42 = vpop.f32.mrf.mxu2  ;;  %v1941_v7 = vpop.f32.mrf.mxu0 }
 0x267   : > { %v2139_v4 = vadd.f32 %v2138_v6, %v2108_v13  ;;  %v1666_v58 = vadd.f32 %v1600_v42, %v1504_v5 }
 0x268   : > { %v1441_v0 = vpop.f32.mrf.mxu1  ;;  %v1772_v24 = vpop.f32.mrf.mxu3 }
 0x269   : > { %v1838_v28 = vadd.f32 %v1772_v24, %v1666_v58  ;;  %1988 = vmatmul.f32.gmra.mxu0 %v1859_v46  ;;  %v1505_v12 = vadd.f32 %v1441_v0, %v3755_v3 }
 0x26b   : > { %v2007_v35 = vadd.f32 %v1941_v7, %v1838_v28 }
 0x26d   : > { %2039 = vst [vmem:[%s3871_s9 + $0x78] sm:$0xff] %v2007_v35  ;;  %v2070_v30 = vadd.f32 %v2069_v18, %v2007_v35  ;;  %v2109_v25 = vmul.f32 %v2007_v35, %v2007_v35 }
 0x26e   : > { %v1603_v26 = vpop.f32.mrf.mxu2  ;;  %v1944_v51 = vpop.f32.mrf.mxu0 }
 0x26f   : > { %v2140_v19 = vadd.f32 %v2139_v4, %v2109_v25  ;;  %v1667_v63 = vadd.f32 %v1603_v26, %v1505_v12 }
 0x270   : > { %v1444_v54 = vpop.f32.mrf.mxu1  ;;  %v1775_v56 = vpop.f32.mrf.mxu3 }
 0x271   : > { %v1839_v8 = vadd.f32 %v1775_v56, %v1667_v63  ;;  %v1506_v33 = vadd.f32 %v1444_v54, %v3762_v10 }
 0x273   : > { %v2008_v60 = vadd.f32 %v1944_v51, %v1839_v8 }
 0x275   : > { %2040 = vst [vmem:[%s3871_s9 + $0x80] sm:$0xff] %v2008_v60  ;;  %v2071_v27 = vadd.f32 %v2070_v30, %v2008_v60  ;;  %v2110_v37 = vmul.f32 %v2008_v60, %v2008_v60 }
 0x276   : > { %v1606_v14 = vpop.f32.mrf.mxu2  ;;  %v1947_v17 = vpop.f32.mrf.mxu0 }
 0x277   : > { %v2141_v3 = vadd.f32 %v2140_v19, %v2110_v37  ;;  %v1668_v34 = vadd.f32 %v1606_v14, %v1506_v33 }
 0x278   : > { %v1447_v59 = vpop.f32.mrf.mxu1  ;;  %v1778_v21 = vpop.f32.mrf.mxu3 }
 0x279   : > { %v1840_v55 = vadd.f32 %v1778_v21, %v1668_v34  ;;  %v1507_v9 = vadd.f32 %v1447_v59, %v3769_v50 }
 0x27b   : > { %v2009_v38 = vadd.f32 %v1947_v17, %v1840_v55 }
 0x27d   : > { %2041 = vst [vmem:[%s3871_s9 + $0x88] sm:$0xff] %v2009_v38  ;;  %v2072_v43 = vadd.f32 %v2071_v27, %v2009_v38  ;;  %v2111_v36 = vmul.f32 %v2009_v38, %v2009_v38 }
 0x27e   : > { %v1609_v41 = vpop.f32.mrf.mxu2  ;;  %v1950_v31 = vpop.f32.mrf.mxu0 }
 0x27f   : > { %v2142_v10 = vadd.f32 %v2141_v3, %v2111_v36  ;;  %v1669_v61 = vadd.f32 %v1609_v41, %v1507_v9 }
 0x280   : > { %v1450_v29 = vpop.f32.mrf.mxu1  ;;  %v1781_v6 = vpop.f32.mrf.mxu3 }
 0x281   : > { %v1841_v49 = vadd.f32 %v1781_v6, %v1669_v61  ;;  %v1508_v20 = vadd.f32 %v1450_v29, %v3776_v47 }
 0x283   : > { %v2010_v44 = vadd.f32 %v1950_v31, %v1841_v49 }
 0x285   : > { %2042 = vst [vmem:[%s3871_s9 + $0x90] sm:$0xff] %v2010_v44  ;;  %v2073_v22 = vadd.f32 %v2072_v43, %v2010_v44  ;;  %v2112_v11 = vmul.f32 %v2010_v44, %v2010_v44 }
 0x286   : > { %v1612_v62 = vpop.f32.mrf.mxu2  ;;  %v1953_v32 = vpop.f32.mrf.mxu0 }
 0x287   : > { %v2143_v50 = vadd.f32 %v2142_v10, %v2112_v11  ;;  %v1670_v5 = vadd.f32 %v1612_v62, %v1508_v20 }
 0x288   : > { %v1453_v18 = vpop.f32.mrf.mxu1  ;;  %v1784_v13 = vpop.f32.mrf.mxu3 }
 0x289   : > { %v1842_v42 = vadd.f32 %v1784_v13, %v1670_v5  ;;  %v1509_v46 = vadd.f32 %v1453_v18, %v3783_v16 }
 0x28b   : > { %v2011_v7 = vadd.f32 %v1953_v32, %v1842_v42 }
 0x28d   : > { %2043 = vst [vmem:[%s3871_s9 + $0x98] sm:$0xff] %v2011_v7  ;;  %v2074_v4 = vadd.f32 %v2073_v22, %v2011_v7  ;;  %v2113_v58 = vmul.f32 %v2011_v7, %v2011_v7 }
 0x28e   : > { %v1615_v0 = vpop.f32.mrf.mxu2  ;;  %v1956_v24 = vpop.f32.mrf.mxu0 }
 0x28f   : > { %v2144_v47 = vadd.f32 %v2143_v50, %v2113_v58  ;;  %v1671_v28 = vadd.f32 %v1615_v0, %v1509_v46 }
 0x290   : > { %v1456_v35 = vpop.f32.mrf.mxu1  ;;  %v1787_v12 = vpop.f32.mrf.mxu3 }
 0x291   : > { %v1843_v30 = vadd.f32 %v1787_v12, %v1671_v28  ;;  %v1510_v26 = vadd.f32 %v1456_v35, %v3790_v48 }
 0x293   : > { %v2012_v25 = vadd.f32 %v1956_v24, %v1843_v30 }
 0x295   : > { %2044 = vst [vmem:[%s3871_s9 + $0xa0] sm:$0xff] %v2012_v25  ;;  %v2075_v51 = vadd.f32 %v2074_v4, %v2012_v25  ;;  %v2114_v19 = vmul.f32 %v2012_v25, %v2012_v25 }
 0x296   : > { %v1618_v63 = vpop.f32.mrf.mxu2  ;;  %v1959_v54 = vpop.f32.mrf.mxu0 }
 0x297   : > { %v2145_v16 = vadd.f32 %v2144_v47, %v2114_v19  ;;  %v1672_v56 = vadd.f32 %v1618_v63, %v1510_v26 }
 0x298   : > { %v1459_v8 = vpop.f32.mrf.mxu1  ;;  %v1790_v60 = vpop.f32.mrf.mxu3 }
 0x299   : > { %v1844_v33 = vadd.f32 %v1790_v60, %v1672_v56  ;;  %v1511_v37 = vadd.f32 %v1459_v8, %v3797_v52 }
 0x29b   : > { %v2013_v27 = vadd.f32 %v1959_v54, %v1844_v33 }
 0x29d   : > { %2045 = vst [vmem:[%s3871_s9 + $0xa8] sm:$0xff] %v2013_v27  ;;  %v2076_v14 = vadd.f32 %v2075_v51, %v2013_v27  ;;  %v2115_v17 = vmul.f32 %v2013_v27, %v2013_v27 }
 0x29e   : > { %v1621_v3 = vpop.f32.mrf.mxu2  ;;  %v1962_v34 = vpop.f32.mrf.mxu0 }
 0x29f   : > { %v2146_v48 = vadd.f32 %v2145_v16, %v2115_v17  ;;  %v1673_v59 = vadd.f32 %v1621_v3, %v1511_v37 }
 0x2a0   : > { %v1462_v21 = vpop.f32.mrf.mxu1  ;;  %v1793_v55 = vpop.f32.mrf.mxu3 }
 0x2a1   : > { %v1845_v38 = vadd.f32 %v1793_v55, %v1673_v59  ;;  %v1512_v43 = vadd.f32 %v1462_v21, %v3804_v53 }
 0x2a3   : > { %v2014_v9 = vadd.f32 %v1962_v34, %v1845_v38 }
 0x2a5   : > { %2046 = vst [vmem:[%s3871_s9 + $0xb0] sm:$0xff] %v2014_v9  ;;  %v2077_v36 = vadd.f32 %v2076_v14, %v2014_v9  ;;  %v2116_v41 = vmul.f32 %v2014_v9, %v2014_v9 }
 0x2a6   : > { %v1624_v31 = vpop.f32.mrf.mxu2  ;;  %v1965_v10 = vpop.f32.mrf.mxu0 }
 0x2a7   : > { %v2147_v52 = vadd.f32 %v2146_v48, %v2116_v41  ;;  %v1674_v61 = vadd.f32 %v1624_v31, %v1512_v43 }
 0x2a8   : > { %v1465_v29 = vpop.f32.mrf.mxu1  ;;  %v1796_v6 = vpop.f32.mrf.mxu3 }
 0x2a9   : > { %v1846_v49 = vadd.f32 %v1796_v6, %v1674_v61  ;;  %v1513_v20 = vadd.f32 %v1465_v29, %v3811_v40 }
 0x2ab   : > { %v2015_v44 = vadd.f32 %v1965_v10, %v1846_v49 }
 0x2ad   : > { %2047 = vst [vmem:[%s3871_s9 + $0xb8] sm:$0xff] %v2015_v44  ;;  %v2078_v22 = vadd.f32 %v2077_v36, %v2015_v44  ;;  %v2117_v11 = vmul.f32 %v2015_v44, %v2015_v44 }
 0x2ae   : > { %v1627_v62 = vpop.f32.mrf.mxu2  ;;  %v1968_v32 = vpop.f32.mrf.mxu0 }
 0x2af   : > { %v2148_v53 = vadd.f32 %v2147_v52, %v2117_v11  ;;  %v1675_v50 = vadd.f32 %v1627_v62, %v1513_v20 }
 0x2b0   : > { %v1468_v5 = vpop.f32.mrf.mxu1  ;;  %v1799_v18 = vpop.f32.mrf.mxu3 }
 0x2b1   : > { %v1847_v13 = vadd.f32 %v1799_v18, %v1675_v50  ;;  %v1514_v7 = vadd.f32 %v1468_v5, %v3818_v1 }
 0x2b3   : > { %v2016_v42 = vadd.f32 %v1968_v32, %v1847_v13 }
 0x2b5   : > { %2048 = vst [vmem:[%s3871_s9 + $0xc0] sm:$0xff] %v2016_v42  ;;  %v2079_v46 = vadd.f32 %v2078_v22, %v2016_v42  ;;  %v2118_v4 = vmul.f32 %v2016_v42, %v2016_v42 }
 0x2b6   : > { %v1630_v58 = vpop.f32.mrf.mxu2  ;;  %v1971_v0 = vpop.f32.mrf.mxu0 }
 0x2b7   : > { %v2149_v40 = vadd.f32 %v2148_v53, %v2118_v4  ;;  %v1676_v24 = vadd.f32 %v1630_v58, %v1514_v7 }
 0x2b8   : > { %v1471_v47 = vpop.f32.mrf.mxu1  ;;  %v1802_v28 = vpop.f32.mrf.mxu3 }
 0x2b9   : > { %v1848_v35 = vadd.f32 %v1802_v28, %v1676_v24  ;;  %v1515_v30 = vadd.f32 %v1471_v47, %v3825_v57 }
 0x2bb   : > { %v2017_v12 = vadd.f32 %v1971_v0, %v1848_v35 }
 0x2bd   : > { %2049 = vst [vmem:[%s3871_s9 + $0xc8] sm:$0xff] %v2017_v12  ;;  %v2080_v25 = vadd.f32 %v2079_v46, %v2017_v12  ;;  %v2119_v26 = vmul.f32 %v2017_v12, %v2017_v12 }
 0x2be   : > { %v1633_v51 = vpop.f32.mrf.mxu2  ;;  %v1974_v19 = vpop.f32.mrf.mxu0 }
 0x2bf   : > { %v2150_v1 = vadd.f32 %v2149_v40, %v2119_v26  ;;  %v1677_v63 = vadd.f32 %v1633_v51, %v1515_v30 }
 0x2c0   : > { %v1474_v54 = vpop.f32.mrf.mxu1  ;;  %v1805_v16 = vpop.f32.mrf.mxu3 }
 0x2c1   : > { %v1849_v56 = vadd.f32 %v1805_v16, %v1677_v63  ;;  %v1516_v60 = vadd.f32 %v1474_v54, %v3832_v15 }
 0x2c3   : > { %v2018_v8 = vadd.f32 %v1974_v19, %v1849_v56 }
 0x2c5   : > { %2050 = vst [vmem:[%s3871_s9 + $0xd0] sm:$0xff] %v2018_v8  ;;  %v2081_v33 = vadd.f32 %v2080_v25, %v2018_v8  ;;  %v2120_v27 = vmul.f32 %v2018_v8, %v2018_v8 }
 0x2c6   : > { %v1636_v37 = vpop.f32.mrf.mxu2  ;;  %v1977_v14 = vpop.f32.mrf.mxu0 }
 0x2c7   : > { %v2151_v57 = vadd.f32 %v2150_v1, %v2120_v27  ;;  %v1678_v17 = vadd.f32 %v1636_v37, %v1516_v60 }
 0x2c8   : > { %v1477_v3 = vpop.f32.mrf.mxu1  ;;  %v1808_v34 = vpop.f32.mrf.mxu3 }
 0x2c9   : > { %v1850_v48 = vadd.f32 %v1808_v34, %v1678_v17  ;;  %v1517_v21 = vadd.f32 %v1477_v3, %v3839_v39 }
 0x2cb   : > { %v2019_v59 = vadd.f32 %v1977_v14, %v1850_v48 }
 0x2cd   : > { %2051 = vst [vmem:[%s3871_s9 + $0xd8] sm:$0xff] %v2019_v59  ;;  %v2082_v55 = vadd.f32 %v2081_v33, %v2019_v59  ;;  %v2121_v38 = vmul.f32 %v2019_v59, %v2019_v59 }
 0x2ce   : > { %v1639_v9 = vpop.f32.mrf.mxu2  ;;  %v1980_v43 = vpop.f32.mrf.mxu0 }
 0x2cf   : > { %v2152_v15 = vadd.f32 %v2151_v57, %v2121_v38  ;;  %v1679_v36 = vadd.f32 %v1639_v9, %v1517_v21 }
 0x2d0   : > { %v1480_v41 = vpop.f32.mrf.mxu1  ;;  %v1811_v31 = vpop.f32.mrf.mxu3 }
 0x2d1   : > { %v1851_v10 = vadd.f32 %v1811_v31, %v1679_v36  ;;  %v1518_v61 = vadd.f32 %v1480_v41, %v3846_v23 }
 0x2d3   : > { %v2020_v52 = vadd.f32 %v1980_v43, %v1851_v10 }
 0x2d5   : > { %2052 = vst [vmem:[%s3871_s9 + $0xe0] sm:$0xff] %v2020_v52  ;;  %v2083_v29 = vadd.f32 %v2082_v55, %v2020_v52  ;;  %v2122_v6 = vmul.f32 %v2020_v52, %v2020_v52 }
 0x2d6   : > { %v1642_v49 = vpop.f32.mrf.mxu2  ;;  %v1983_v44 = vpop.f32.mrf.mxu0 }
 0x2d7   : > { %v2153_v39 = vadd.f32 %v2152_v15, %v2122_v6  ;;  %v1680_v20 = vadd.f32 %v1642_v49, %v1518_v61 }
 0x2d8   : > { %v1483_v22 = vpop.f32.mrf.mxu1  ;;  %v1814_v11 = vpop.f32.mrf.mxu3 }
 0x2d9   : > { %v1852_v62 = vadd.f32 %v1814_v11, %v1680_v20  ;;  %v1519_v53 = vadd.f32 %v1483_v22, %v3853_v2 }
 0x2db   : > { %v2021_v32 = vadd.f32 %v1983_v44, %v1852_v62 }
 0x2dd   : > { %2053 = vst [vmem:[%s3871_s9 + $0xe8] sm:$0xff] %v2021_v32  ;;  %v2084_v50 = vadd.f32 %v2083_v29, %v2021_v32  ;;  %v2123_v5 = vmul.f32 %v2021_v32, %v2021_v32 }
 0x2de   : > { %v1645_v18 = vpop.f32.mrf.mxu2  ;;  %v1986_v13 = vpop.f32.mrf.mxu0 }
 0x2df   : > { %v2154_v23 = vadd.f32 %v2153_v39, %v2123_v5  ;;  %v1681_v42 = vadd.f32 %v1645_v18, %v1519_v53 }
 0x2e0   : > { %v1817_v7 = vpop.f32.mrf.mxu3  ;;  %v1486_v4 = vpop.f32.mrf.mxu1 }
 0x2e1   : > { %v1853_v46 = vadd.f32 %v1817_v7, %v1681_v42  ;;  %v1520_v0 = vadd.f32 %v1486_v4, %v3860_v45 }
 0x2e3   : > { %v2022_v58 = vadd.f32 %v1986_v13, %v1853_v46 }
 0x2e5   : > { %2054 = vst [vmem:[%s3871_s9 + $0xf0] sm:$0xff] %v2022_v58  ;;  %v2085_v40 = vadd.f32 %v2084_v50, %v2022_v58  ;;  %v2124_v24 = vmul.f32 %v2022_v58, %v2022_v58 }
 0x2e6   : > { %v1648_v47 = vpop.f32.mrf.mxu2  ;;  %v1989_v12 = vpop.f32.mrf.mxu0 }
 0x2e7   : > { %v2155_v28 = vadd.f32 %v2154_v23, %v2124_v24  ;;  %v1682_v2 = vadd.f32 %v1648_v47, %v1520_v0 }
 0x2e8   : > { %v1820_v35 = vpop.f32.mrf.mxu3 }
 0x2e9   : > { %v1854_v30 = vadd.f32 %v1820_v35, %v1682_v2 }
 0x2eb   : > { %v2023_v25 = vadd.f32 %v1989_v12, %v1854_v30 }
 0x2ed   : > { %2055 = vst [vmem:[%s3871_s9 + $0xf8] sm:$0xff] %v2023_v25  ;;  %v2086_v26 = vadd.f32 %v2085_v40, %v2023_v25  ;;  %v2125_v51 = vmul.f32 %v2023_v25, %v2023_v25 }
 0x2ef   : > { %v2087_v19 = vrot.slane %v2086_v26, 4  ;;  %v2156_v1 = vadd.f32 %v2155_v28, %v2125_v51 }
 0x2f1   : > { %v2088_v63 = vadd.f32 %v2087_v19, %v2086_v26  ;;  %v2157_v54 = vrot.slane %v2156_v1, 4 }
 0x2f3   : > { %v2089_v45 = vrot.slane %v2088_v63, 2  ;;  %v2158_v16 = vadd.f32 %v2157_v54, %v2156_v1 }
 0x2f5   : > { %v2090_v56 = vadd.f32 %v2089_v45, %v2088_v63  ;;  %v2159_v8 = vrot.slane %v2158_v16, 2 }
 0x2f7   : > { %v2091_v60 = vrot.slane %v2090_v56, 1  ;;  %v2160_v33 = vadd.f32 %v2159_v8, %v2158_v16 }
 0x2f9   : > { %v2092_v27 = vadd.f32 %v2091_v60, %v2090_v56  ;;  %v2161_v37 = vrot.slane %v2160_v33, 1 }
 0x2fb   : > { %2093 = vst [vmem:[%s211_s11] sm:$0x1] %v2092_v27  ;;  %v2162_v14 = vadd.f32 %v2161_v37, %v2160_v33 }
 0x2fd   : > { %2163 = vst [vmem:[%s214_s17] sm:$0x1] %v2162_v14 }
 0x2fe PF: > { %s15_s15 = sadd.s32 1, %s2471_s15  }
 0x2ff   : > { %p12_p4 = scmp.ge.s32.totalorder %s15_s15, 4  }
 0x301   :  { %14 = sbr.rel (!%p12_p4) target bundleno = 1 (0x1), region = 90 }

</bundles_post_ra>
